<compile_context>
chip_gen: v5e
topology: v5e:2x2
jax: 0.10.0
libtpu: 0.0.40
codegen_flags: <defaults>
</compile_context>

<pallas_src>
import random

import jax
import jax.numpy as jnp
from jax import lax
from jax.experimental import pallas as pl
from jax.experimental.pallas import tpu as pltpu

LANE = 128
SUBLANE = 8
NEG_BIG = -1e30


def _round_up(x, m):
    return (x + m - 1) // m * m


def _nbytes(a):
    return int(a.size) * a.dtype.itemsize


def _vmem_limit(*byte_counts):
    # Explicit VMEM budget: resident footprint x2 (double-buffered streamed
    # blocks) + headroom, clamped to a safe window (>= 32 MiB so toy sizes never
    # under-budget, <= 100 MiB to stay under every generation's physical VMEM;
    # production-size weight stacks that exceed v7x's 64 MiB should be streamed
    # with pltpu.emit_pipeline instead of made resident).
    budget = 2 * sum(int(b) for b in byte_counts) + (4 << 20)
    return int(min(100 << 20, max(32 << 20, budget)))


# --------------------- bulk layer-0 input projection kernel -------------------

def _proj_kernel(x_ref, w_ref, b_ref, o_ref):
    o_ref[...] = (jnp.dot(x_ref[...], w_ref[...],
                          preferred_element_type=jnp.float32) + b_ref[...])


def project_inputs(x_emb, w_ih0, b0):
    """xproj = x_emb @ W_ih0 + b0 for all timesteps, row-tiled + parallel grid."""
    m, e = x_emb.shape
    n = w_ih0.shape[1]
    tm = m
    for cand in (512, 256, 128, 64, 32, 16, 8):
        if m % cand == 0:
            tm = cand
            break
    return pl.pallas_call(
        _proj_kernel,
        grid=(m // tm,),
        in_specs=[pl.BlockSpec((tm, e), lambda i: (i, 0)),
                  pl.BlockSpec((e, n), lambda i: (0, 0)),
                  pl.BlockSpec((1, n), lambda i: (0, 0))],
        out_specs=pl.BlockSpec((tm, n), lambda i: (i, 0)),
        out_shape=jax.ShapeDtypeStruct((m, n), jnp.float32),
        compiler_params=pltpu.CompilerParams(
            dimension_semantics=("parallel",),
            vmem_limit_bytes=_vmem_limit(_nbytes(x_emb), _nbytes(w_ih0),
                                         _nbytes(b0), m * n * 4)),
    )(x_emb, w_ih0, b0)


# ----------------------------- fused encoder kernel ---------------------------

def _make_encoder_kernel(n_layers, hid, src_len, batch_p):
    def kernel(xproj_ref, whh0_ref, *refs):
        w_cat = refs[0:n_layers - 1]                    # fused [W_ih;W_hh], layers 1..L-1
        b = refs[n_layers - 1:2 * (n_layers - 1)]       # biases, layers 1..L-1
        h_out = refs[2 * n_layers - 2]                  # [L, B, H]
        c_out = refs[2 * n_layers - 1]

        def step(t, carry):
            hs, cs = carry
            new_h, new_c = [], []
            x = None
            for l in range(n_layers):
                if l == 0:
                    # layer-0 x@W_ih + b hoisted out of the recurrence (xproj)
                    gates = xproj_ref[t] + jnp.dot(
                        hs[0].astype(jnp.bfloat16), whh0_ref[...],
                        preferred_element_type=jnp.float32)
                else:
                    xh = jnp.concatenate([x, hs[l].astype(jnp.bfloat16)], axis=-1)
                    gates = (jnp.dot(xh, w_cat[l - 1][...],
                                     preferred_element_type=jnp.float32)
                             + b[l - 1][...])
                # NOTE: keep hid a multiple of 128 at production sizes so these
                # gate slices are whole lane tiles (no per-step XLU relayouts).
                i = jax.nn.sigmoid(gates[:, 0 * hid:1 * hid])
                f = jax.nn.sigmoid(gates[:, 1 * hid:2 * hid])
                g = jnp.tanh(gates[:, 2 * hid:3 * hid])
                o = jax.nn.sigmoid(gates[:, 3 * hid:4 * hid])
                c_new = f * cs[l] + i * g
                h_new = o * jnp.tanh(c_new)
                new_h.append(h_new)
                new_c.append(c_new)
                x = h_new.astype(jnp.bfloat16)
            return tuple(new_h), tuple(new_c)

        init = (tuple(jnp.zeros((batch_p, hid), jnp.float32) for _ in range(n_layers)),
                tuple(jnp.zeros((batch_p, hid), jnp.float32) for _ in range(n_layers)))
        unroll = src_len if src_len <= 16 else 4
        h_fin, c_fin = lax.fori_loop(0, src_len, step, init, unroll=unroll)
        for l in range(n_layers):
            h_out[l] = h_fin[l]
            c_out[l] = c_fin[l]
    return kernel


def encoder_forward(enc, src_emb, n_layers, hid, batch_p):
    """src_emb: [src_len, batch_p, emb] bf16 -> (h, c) each [n_layers, batch_p, hid] f32."""
    src_len, _, emb = src_emb.shape

    # Bulk embedding projection for ALL timesteps in one tiled matmul kernel.
    xproj = project_inputs(src_emb.reshape(src_len * batch_p, emb),
                           enc["w_ih0"], enc["b"][0])
    xproj = xproj.reshape(src_len, batch_p, 4 * hid)

    vmem = pl.BlockSpec(memory_space=pltpu.MemorySpace.VMEM)
    inputs = [xproj, enc["w_hh0"]] + list(enc["w_cat"]) + list(enc["b"][1:])
    state_shape = (n_layers, batch_p, hid)

    # Single kernel invocation; time iterated with an in-kernel fori_loop.
    h, c = pl.pallas_call(
        _make_encoder_kernel(n_layers, hid, src_len, batch_p),
        in_specs=[vmem] * len(inputs),
        out_specs=(vmem, vmem),
        out_shape=(jax.ShapeDtypeStruct(state_shape, jnp.float32),
                   jax.ShapeDtypeStruct(state_shape, jnp.float32)),
        compiler_params=pltpu.CompilerParams(
            vmem_limit_bytes=_vmem_limit(*[_nbytes(a) for a in inputs])),
    )(*inputs)
    return h, c


# ----------------------------- fused decoder kernel ---------------------------

def _make_decoder_kernel(n_layers, hid, vocab_pad, batch_p):
    def kernel(tf_ref, trg_emb_ref, emb_ref, *refs):
        L = n_layers
        w_cat = refs[0:L]
        b = refs[L:2 * L]
        fc_w_ref = refs[2 * L]
        fc_b_ref = refs[2 * L + 1]
        h0_ref = refs[2 * L + 2]
        c0_ref = refs[2 * L + 3]
        ids_ref = refs[2 * L + 4]          # (1, vocab_pad) iota, hoisted constant
        negmask_ref = refs[2 * L + 5]      # (1, vocab_pad) 0 / -1e30 pad mask
        out_ref = refs[2 * L + 6]
        h_s = refs[2 * L + 7]
        c_s = refs[2 * L + 8]
        x_s = refs[2 * L + 9]
        top1_s = refs[2 * L + 10]

        k = pl.program_id(0)

        @pl.when(k == 0)
        def _():
            h_s[...] = h0_ref[...]
            c_s[...] = c0_ref[...]

        # Input select: teacher-forced steps read the pre-gathered embedding
        # block trg_emb[k]; non-forced steps embed the carried argmax one-hot
        # with a single (batch_p, vocab_pad) @ (vocab_pad, emb) MXU pass.
        forced = jnp.logical_or(k == 0, tf_ref[jnp.maximum(k - 1, 0)] != 0)

        @pl.when(forced)
        def _():
            x_s[...] = trg_emb_ref[0]

        @pl.when(jnp.logical_not(forced))
        def _():
            x_s[...] = jnp.dot(
                top1_s[...], emb_ref[...],
                preferred_element_type=jnp.float32).astype(jnp.bfloat16)

        x = x_s[...]
        for l in range(n_layers):
            xh = jnp.concatenate([x, h_s[l].astype(jnp.bfloat16)], axis=-1)
            gates = (jnp.dot(xh, w_cat[l][...],
                             preferred_element_type=jnp.float32) + b[l][...])
            i = jax.nn.sigmoid(gates[:, 0 * hid:1 * hid])
            f = jax.nn.sigmoid(gates[:, 1 * hid:2 * hid])
            g = jnp.tanh(gates[:, 2 * hid:3 * hid])
            o = jax.nn.sigmoid(gates[:, 3 * hid:4 * hid])
            c_new = f * c_s[l] + i * g
            h_new = o * jnp.tanh(c_new)
            h_s[l] = h_new
            c_s[l] = c_new
            x = h_new.astype(jnp.bfloat16)

        # fused output projection; vocab padded to 128 lanes => unmasked stores
        logits = (jnp.dot(x, fc_w_ref[...], preferred_element_type=jnp.float32)
                  + fc_b_ref[...])
        out_ref[0] = logits

        # greedy top-1 as a one-hot (first-occurrence tie-break, pad lanes
        # masked); iota / mask constants are hoisted into resident inputs.
        ids = ids_ref[...]
        masked = logits + negmask_ref[...]
        m = jnp.max(masked, axis=-1, keepdims=True)
        first = jnp.min(jnp.where(masked == m, ids, float(vocab_pad)),
                        axis=-1, keepdims=True)
        top1_s[...] = (ids == first).astype(jnp.bfloat16)
    return kernel


def decoder_forward(dec, trg_emb, tf_flags, h0, c0, argmax_ids, vocab_negmask,
                    n_layers, hid, vocab_pad, batch_p):
    steps, _, emb = trg_emb.shape

    def resident(shape):
        zeros = (0,) * len(shape)
        return pl.BlockSpec(shape, lambda k, tf, _z=zeros: _z)

    in_specs = [pl.BlockSpec((1, batch_p, emb), lambda k, tf: (k, 0, 0)),
                resident(dec["emb"].shape)]
    inputs = [trg_emb, dec["emb"]]
    for l in range(n_layers):
        in_specs.append(resident(dec["w_cat"][l].shape))
        inputs.append(dec["w_cat"][l])
    for l in range(n_layers):
        in_specs.append(resident(dec["b"][l].shape))
        inputs.append(dec["b"][l])
    for arr in (dec["fc_w"], dec["fc_b"], h0, c0, argmax_ids, vocab_negmask):
        in_specs.append(resident(arr.shape))
        inputs.append(arr)

    grid_spec = pltpu.PrefetchScalarGridSpec(
        num_scalar_prefetch=1,
        grid=(steps,),
        in_specs=in_specs,
        out_specs=pl.BlockSpec((1, batch_p, vocab_pad), lambda k, tf: (k, 0, 0)),
        scratch_shapes=[pltpu.VMEM((n_layers, batch_p, hid), jnp.float32),
                        pltpu.VMEM((n_layers, batch_p, hid), jnp.float32),
                        pltpu.VMEM((batch_p, emb), jnp.bfloat16),
                        pltpu.VMEM((batch_p, vocab_pad), jnp.bfloat16)],
    )

    logits = pl.pallas_call(
        _make_decoder_kernel(n_layers, hid, vocab_pad, batch_p),
        grid_spec=grid_spec,
        out_shape=jax.ShapeDtypeStruct((steps, batch_p, vocab_pad), jnp.float32),
        compiler_params=pltpu.CompilerParams(
            dimension_semantics=("arbitrary",),
            vmem_limit_bytes=_vmem_limit(*[_nbytes(a) for a in inputs],
                                         steps * batch_p * vocab_pad * 4)),
    )(tf_flags, *inputs)
    return logits


# ----------------------------- parameter setup --------------------------------

def init_params(key, input_dim, output_dim, emb_dim, hid_dim, n_layers):
    out_vocab_p = _round_up(output_dim, LANE)
    ks = iter(jax.random.split(key, 64))

    def rnd(shape, scale=0.1):
        return (scale * jax.random.normal(next(ks), shape)).astype(jnp.float32)

    # Encoder: layer-0 input projection is hoisted, so W_ih0 stays separate;
    # layers >= 1 use the fused [W_ih ; W_hh] weight (one matmul per layer).
    enc_w_ih0 = rnd((emb_dim, 4 * hid_dim)).astype(jnp.bfloat16)
    enc_w_hh0 = rnd((hid_dim, 4 * hid_dim)).astype(jnp.bfloat16)
    enc_w_cat = [jnp.concatenate([rnd((hid_dim, 4 * hid_dim)),
                                  rnd((hid_dim, 4 * hid_dim))],
                                 axis=0).astype(jnp.bfloat16)
                 for _ in range(n_layers - 1)]
    enc_b = [rnd((1, 4 * hid_dim)) for _ in range(n_layers)]   # f32, = b_ih + b_hh

    # Decoder: all layers fused [W_ih ; W_hh].
    dec_w_cat = []
    for layer in range(n_layers):
        d_in = emb_dim if layer == 0 else hid_dim
        dec_w_cat.append(jnp.concatenate([rnd((d_in, 4 * hid_dim)),
                                          rnd((hid_dim, 4 * hid_dim))],
                                         axis=0).astype(jnp.bfloat16))
    dec_b = [rnd((1, 4 * hid_dim)) for _ in range(n_layers)]

    # Encoder embedding is only ever gathered (jnp.take) -> no vocab padding.
    enc_emb = rnd((input_dim, emb_dim)).astype(jnp.bfloat16)
    # Decoder embedding needs vocab_pad rows (in-kernel argmax one-hot matmul).
    dec_emb = jnp.zeros((out_vocab_p, emb_dim), jnp.float32)
    dec_emb = dec_emb.at[:output_dim].set(rnd((output_dim, emb_dim)))
    dec_emb = dec_emb.astype(jnp.bfloat16)

    fc_w = jnp.zeros((hid_dim, out_vocab_p), jnp.float32)
    fc_w = fc_w.at[:, :output_dim].set(rnd((hid_dim, output_dim)))
    fc_b = jnp.zeros((1, out_vocab_p), jnp.float32)
    fc_b = fc_b.at[:, :output_dim].set(rnd((1, output_dim)))

    enc = {"emb": enc_emb, "w_ih0": enc_w_ih0, "w_hh0": enc_w_hh0,
           "w_cat": enc_w_cat, "b": enc_b}
    dec = {"emb": dec_emb, "w_cat": dec_w_cat, "b": dec_b,
           "fc_w": fc_w.astype(jnp.bfloat16), "fc_b": fc_b}
    config = dict(input_dim=input_dim, output_dim=output_dim, emb_dim=emb_dim,
                  hid_dim=hid_dim, n_layers=n_layers, out_vocab_pad=out_vocab_p)
    return {"enc": enc, "dec": dec}, config


# ----------------------------- model forward --------------------------------

def make_seq2seq_forward(config):
    n_layers = config["n_layers"]
    hid = config["hid_dim"]
    out_vocab = config["output_dim"]
    out_vocab_p = config["out_vocab_pad"]

    # Hoisted argmax constants (review item): iota row + pad mask as residents.
    argmax_ids = jnp.arange(out_vocab_p, dtype=jnp.float32).reshape(1, out_vocab_p)
    vocab_negmask = jnp.where(jnp.arange(out_vocab_p) < out_vocab,
                              0.0, NEG_BIG).astype(jnp.float32).reshape(1, out_vocab_p)

    @jax.jit
    def forward(params, src, trg, tf_flags):
        _, batch = src.shape
        batch_p = _round_up(batch, SUBLANE)
        pad = batch_p - batch

        src_p = jnp.pad(src, ((0, 0), (0, pad)))
        trg_p = jnp.pad(trg, ((0, 0), (0, pad)))

        # Embedding gathers done outside the kernels (no one-hot matmuls on the
        # hot path); decoder only needs trg[0 .. trg_len-2] as forced inputs.
        src_emb = jnp.take(params["enc"]["emb"], src_p, axis=0)        # bf16
        trg_emb = jnp.take(params["dec"]["emb"], trg_p[:-1], axis=0)   # bf16

        h0, c0 = encoder_forward(params["enc"], src_emb, n_layers, hid, batch_p)
        logits = decoder_forward(params["dec"], trg_emb, tf_flags, h0, c0,
                                 argmax_ids, vocab_negmask,
                                 n_layers, hid, out_vocab_p, batch_p)

        logits = logits[:, :batch, :out_vocab]            # strip batch/vocab padding
        zeros0 = jnp.zeros((1, batch, out_vocab), jnp.float32)
        return jnp.concatenate([zeros0, logits], axis=0)  # outputs[0] stays zero

    return forward


# ----------------------------- main --------------------------------

if __name__ == "__main__":
    SRC_LEN, TRG_LEN, BATCH = 8, 8, 2
    INPUT_VOCAB, OUTPUT_VOCAB = 16, 16
    EMB_DIM, HID_DIM, N_LAYERS = 32, 32, 2
    TEACHER_FORCING_RATIO = 0.5

    key = jax.random.PRNGKey(0)
    k_params, k_src, k_trg = jax.random.split(key, 3)

    params, config = init_params(k_params, INPUT_VOCAB, OUTPUT_VOCAB,
                                 EMB_DIM, HID_DIM, N_LAYERS)
    forward = make_seq2seq_forward(config)

    src = jax.random.randint(k_src, (SRC_LEN, BATCH), 0, INPUT_VOCAB, dtype=jnp.int32)
    trg = jax.random.randint(k_trg, (TRG_LEN, BATCH), 0, OUTPUT_VOCAB, dtype=jnp.int32)

    # Teacher-forcing decisions drawn on the host per call (matches torch's
    # per-step random.random()) and passed in as data so the graph stays jittable.
    random.seed(1234)
    tf_flags = jnp.array(
        [1 if random.random() < TEACHER_FORCING_RATIO else 0
         for _ in range(TRG_LEN - 1)], dtype=jnp.int32)

    outputs = forward(params, src, trg, tf_flags)
    outputs = jax.block_until_ready(outputs)

    assert outputs.shape == (TRG_LEN, BATCH, OUTPUT_VOCAB)
    assert bool(jnp.all(outputs[0] == 0.0))  # matches torch.zeros init of outputs[0]
    print("KERNEL_OK")
</pallas_src>

<mosaic_0001>
module attributes {stable_mosaic.version = 11 : i64} {
  func.func @_proj_kernel(%arg0: i32, %arg1: memref<64x32xbf16, #tpu.memory_space<vmem>>, %arg2: memref<32x128xbf16, #tpu.memory_space<vmem>>, %arg3: memref<1x128xf32, #tpu.memory_space<vmem>>, %arg4: memref<64x128xf32, #tpu.memory_space<vmem>>) attributes {dimension_semantics = [#tpu.dimension_semantics<parallel>], iteration_bounds = array<i64: 1>, scalar_prefetch = 0 : i64, scratch_operands = 0 : i64, tpu.core_type = #tpu.core_type<tc>, window_params = [{transform_indices = @transform_0, window_bounds = array<i64: 64, 32>}, {pipeline_mode = #tpu.pipeline_mode<synchronous>, transform_indices = @transform_1, window_bounds = array<i64: 32, 128>}, {pipeline_mode = #tpu.pipeline_mode<synchronous>, transform_indices = @transform_2, window_bounds = array<i64: 1, 128>}, {transform_indices = @transform_3, window_bounds = array<i64: 64, 128>}]} {
    %c0 = arith.constant 0 : index
    %c0_0 = arith.constant 0 : index
    %0 = vector.load %arg1[%c0, %c0_0] : memref<64x32xbf16, #tpu.memory_space<vmem>>, vector<64x32xbf16>
    %c0_1 = arith.constant 0 : index
    %c0_2 = arith.constant 0 : index
    %1 = vector.load %arg2[%c0_1, %c0_2] : memref<32x128xbf16, #tpu.memory_space<vmem>>, vector<32x128xbf16>
    %cst = arith.constant dense<0.000000e+00> : vector<64x128xf32>
    %2 = tpu.matmul %0, %1, %cst {dimension_numbers = #tpu.dot_dimension_numbers<[1], [0], [0], [1], [0, 0, 1, 1], [], []>} : vector<64x32xbf16>, vector<32x128xbf16>, vector<64x128xf32> -> vector<64x128xf32>
    %c0_3 = arith.constant 0 : index
    %c0_4 = arith.constant 0 : index
    %3 = vector.load %arg3[%c0_3, %c0_4] : memref<1x128xf32, #tpu.memory_space<vmem>>, vector<1x128xf32>
    %4 = vector.broadcast %3 : vector<1x128xf32> to vector<64x128xf32>
    %5 = arith.addf %2, %4 : vector<64x128xf32>
    %c0_5 = arith.constant 0 : index
    %c0_6 = arith.constant 0 : index
    %6 = vector.load %arg4[%c0_5, %c0_6] : memref<64x128xf32, #tpu.memory_space<vmem>>, vector<64x128xf32>
    tpu.vector_store %arg4[%c0_5, %c0_6], %5 {strides = array<i32>} : memref<64x128xf32, #tpu.memory_space<vmem>>, vector<64x128xf32>,
    return
  }
  func.func @transform_0(%arg0: i32) -> (i32, i32) {
    %c0_i32 = arith.constant 0 : i32
    %c0_i32_0 = arith.constant 0 : i32
    return %arg0, %c0_i32 : i32, i32
  }
  func.func @transform_1(%arg0: i32) -> (i32, i32) {
    %c0_i32 = arith.constant 0 : i32
    %c0_i32_0 = arith.constant 0 : i32
    %c0_i32_1 = arith.constant 0 : i32
    return %c0_i32, %c0_i32_0 : i32, i32
  }
  func.func @transform_2(%arg0: i32) -> (i32, i32) {
    %c0_i32 = arith.constant 0 : i32
    %c0_i32_0 = arith.constant 0 : i32
    %c0_i32_1 = arith.constant 0 : i32
    return %c0_i32, %c0_i32_0 : i32, i32
  }
  func.func @transform_3(%arg0: i32) -> (i32, i32) {
    %c0_i32 = arith.constant 0 : i32
    %c0_i32_0 = arith.constant 0 : i32
    return %arg0, %c0_i32 : i32, i32
  }
}

module attributes {stable_mosaic.version = 11 : i64} {
  func.func @kernel(%arg0: memref<8x8x128xf32, #tpu.memory_space<vmem>>, %arg1: memref<32x128xbf16, #tpu.memory_space<vmem>>, %arg2: memref<64x128xbf16, #tpu.memory_space<vmem>>, %arg3: memref<1x128xf32, #tpu.memory_space<vmem>>, %arg4: memref<2x8x32xf32, #tpu.memory_space<vmem>>, %arg5: memref<2x8x32xf32, #tpu.memory_space<vmem>>) attributes {dimension_semantics = [], scalar_prefetch = 0 : i64, scratch_operands = 0 : i64, tpu.core_type = #tpu.core_type<tc>} {
    %cst = arith.constant 0.000000e+00 : f32
    %0 = vector.broadcast %cst : f32 to vector<8x32xf32>
    %cst_0 = arith.constant 0.000000e+00 : f32
    %1 = vector.broadcast %cst_0 : f32 to vector<8x32xf32>
    %cst_1 = arith.constant 0.000000e+00 : f32
    %2 = vector.broadcast %cst_1 : f32 to vector<8x32xf32>
    %cst_2 = arith.constant 0.000000e+00 : f32
    %3 = vector.broadcast %cst_2 : f32 to vector<8x32xf32>
    %c0_i32 = arith.constant 0 : i32
    %4 = arith.index_cast %c0_i32 : i32 to index
    %c0 = arith.constant 0 : index
    %c0_3 = arith.constant 0 : index
    %5 = vector.load %arg0[%4, %c0, %c0_3] : memref<8x8x128xf32, #tpu.memory_space<vmem>>, vector<1x8x128xf32>
    %6 = vector.shape_cast %5 : vector<1x8x128xf32> to vector<8x128xf32>
    %7 = arith.truncf %0 : vector<8x32xf32> to vector<8x32xbf16>
    %c0_4 = arith.constant 0 : index
    %c0_5 = arith.constant 0 : index
    %8 = vector.load %arg1[%c0_4, %c0_5] : memref<32x128xbf16, #tpu.memory_space<vmem>>, vector<32x128xbf16>
    %cst_6 = arith.constant dense<0.000000e+00> : vector<8x128xf32>
    %9 = tpu.matmul %7, %8, %cst_6 {dimension_numbers = #tpu.dot_dimension_numbers<[1], [0], [0], [1], [0, 0, 1, 1], [], []>} : vector<8x32xbf16>, vector<32x128xbf16>, vector<8x128xf32> -> vector<8x128xf32>
    %10 = arith.addf %6, %9 : vector<8x128xf32>
    %11 = vector.extract_strided_slice %10 {offsets = [0, 0], sizes = [8, 32], strides = [1, 1]} : vector<8x128xf32> to vector<8x32xf32>
    %12 = arith.negf %11 : vector<8x32xf32>
    %13 = math.exp %12 : vector<8x32xf32>
    %cst_7 = arith.constant 1.000000e+00 : f32
    %14 = vector.broadcast %cst_7 : f32 to vector<8x32xf32>
    %15 = arith.addf %14, %13 : vector<8x32xf32>
    %16 = arith.divf %14, %15 : vector<8x32xf32>
    %17 = vector.extract_strided_slice %10 {offsets = [0, 32], sizes = [8, 32], strides = [1, 1]} : vector<8x128xf32> to vector<8x32xf32>
    %18 = arith.negf %17 : vector<8x32xf32>
    %19 = math.exp %18 : vector<8x32xf32>
    %cst_8 = arith.constant 1.000000e+00 : f32
    %20 = vector.broadcast %cst_8 : f32 to vector<8x32xf32>
    %21 = arith.addf %20, %19 : vector<8x32xf32>
    %22 = arith.divf %20, %21 : vector<8x32xf32>
    %23 = vector.extract_strided_slice %10 {offsets = [0, 64], sizes = [8, 32], strides = [1, 1]} : vector<8x128xf32> to vector<8x32xf32>
    %24 = math.tanh %23 : vector<8x32xf32>
    %25 = vector.extract_strided_slice %10 {offsets = [0, 96], sizes = [8, 32], strides = [1, 1]} : vector<8x128xf32> to vector<8x32xf32>
    %26 = arith.negf %25 : vector<8x32xf32>
    %27 = math.exp %26 : vector<8x32xf32>
    %cst_9 = arith.constant 1.000000e+00 : f32
    %28 = vector.broadcast %cst_9 : f32 to vector<8x32xf32>
    %29 = arith.addf %28, %27 : vector<8x32xf32>
    %30 = arith.divf %28, %29 : vector<8x32xf32>
    %31 = arith.mulf %22, %2 : vector<8x32xf32>
    %32 = arith.mulf %16, %24 : vector<8x32xf32>
    %33 = arith.addf %31, %32 : vector<8x32xf32>
    %34 = math.tanh %33 : vector<8x32xf32>
    %35 = arith.mulf %30, %34 : vector<8x32xf32>
    %36 = arith.truncf %35 : vector<8x32xf32> to vector<8x32xbf16>
    %37 = arith.truncf %1 : vector<8x32xf32> to vector<8x32xbf16>
    %38 = tpu.concatenate %36, %37 in 1 : vector<8x32xbf16>, vector<8x32xbf16> -> vector<8x64xbf16>
    %c0_10 = arith.constant 0 : index
    %c0_11 = arith.constant 0 : index
    %39 = vector.load %arg2[%c0_10, %c0_11] : memref<64x128xbf16, #tpu.memory_space<vmem>>, vector<64x128xbf16>
    %cst_12 = arith.constant dense<0.000000e+00> : vector<8x128xf32>
    %40 = tpu.matmul %38, %39, %cst_12 {dimension_numbers = #tpu.dot_dimension_numbers<[1], [0], [0], [1], [0, 0, 1, 1], [], []>} : vector<8x64xbf16>, vector<64x128xbf16>, vector<8x128xf32> -> vector<8x128xf32>
    %c0_13 = arith.constant 0 : index
    %c0_14 = arith.constant 0 : index
    %41 = vector.load %arg3[%c0_13, %c0_14] : memref<1x128xf32, #tpu.memory_space<vmem>>, vector<1x128xf32>
    %42 = vector.broadcast %41 : vector<1x128xf32> to vector<8x128xf32>
    %43 = arith.addf %40, %42 : vector<8x128xf32>
    %44 = vector.extract_strided_slice %43 {offsets = [0, 0], sizes = [8, 32], strides = [1, 1]} : vector<8x128xf32> to vector<8x32xf32>
    %45 = arith.negf %44 : vector<8x32xf32>
    %46 = math.exp %45 : vector<8x32xf32>
    %cst_15 = arith.constant 1.000000e+00 : f32
    %47 = vector.broadcast %cst_15 : f32 to vector<8x32xf32>
    %48 = arith.addf %47, %46 : vector<8x32xf32>
    %49 = arith.divf %47, %48 : vector<8x32xf32>
    %50 = vector.extract_strided_slice %43 {offsets = [0, 32], sizes = [8, 32], strides = [1, 1]} : vector<8x128xf32> to vector<8x32xf32>
    %51 = arith.negf %50 : vector<8x32xf32>
    %52 = math.exp %51 : vector<8x32xf32>
    %cst_16 = arith.constant 1.000000e+00 : f32
    %53 = vector.broadcast %cst_16 : f32 to vector<8x32xf32>
    %54 = arith.addf %53, %52 : vector<8x32xf32>
    %55 = arith.divf %53, %54 : vector<8x32xf32>
    %56 = vector.extract_strided_slice %43 {offsets = [0, 64], sizes = [8, 32], strides = [1, 1]} : vector<8x128xf32> to vector<8x32xf32>
    %57 = math.tanh %56 : vector<8x32xf32>
    %58 = vector.extract_strided_slice %43 {offsets = [0, 96], sizes = [8, 32], strides = [1, 1]} : vector<8x128xf32> to vector<8x32xf32>
    %59 = arith.negf %58 : vector<8x32xf32>
    %60 = math.exp %59 : vector<8x32xf32>
    %cst_17 = arith.constant 1.000000e+00 : f32
    %61 = vector.broadcast %cst_17 : f32 to vector<8x32xf32>
    %62 = arith.addf %61, %60 : vector<8x32xf32>
    %63 = arith.divf %61, %62 : vector<8x32xf32>
    %64 = arith.mulf %55, %3 : vector<8x32xf32>
    %65 = arith.mulf %49, %57 : vector<8x32xf32>
    %66 = arith.addf %64, %65 : vector<8x32xf32>
    %67 = math.tanh %66 : vector<8x32xf32>
    %68 = arith.mulf %63, %67 : vector<8x32xf32>
    %c1_i32 = arith.constant 1 : i32
    %69 = arith.index_cast %c1_i32 : i32 to index
    %c0_18 = arith.constant 0 : index
    %c0_19 = arith.constant 0 : index
    %70 = vector.load %arg0[%69, %c0_18, %c0_19] : memref<8x8x128xf32, #tpu.memory_space<vmem>>, vector<1x8x128xf32>
    %71 = vector.shape_cast %70 : vector<1x8x128xf32> to vector<8x128xf32>
    %72 = arith.truncf %35 : vector<8x32xf32> to vector<8x32xbf16>
    %c0_20 = arith.constant 0 : index
    %c0_21 = arith.constant 0 : index
    %73 = vector.load %arg1[%c0_20, %c0_21] : memref<32x128xbf16, #tpu.memory_space<vmem>>, vector<32x128xbf16>
    %cst_22 = arith.constant dense<0.000000e+00> : vector<8x128xf32>
    %74 = tpu.matmul %72, %73, %cst_22 {dimension_numbers = #tpu.dot_dimension_numbers<[1], [0], [0], [1], [0, 0, 1, 1], [], []>} : vector<8x32xbf16>, vector<32x128xbf16>, vector<8x128xf32> -> vector<8x128xf32>
    %75 = arith.addf %71, %74 : vector<8x128xf32>
    %76 = vector.extract_strided_slice %75 {offsets = [0, 0], sizes = [8, 32], strides = [1, 1]} : vector<8x128xf32> to vector<8x32xf32>
    %77 = arith.negf %76 : vector<8x32xf32>
    %78 = math.exp %77 : vector<8x32xf32>
    %cst_23 = arith.constant 1.000000e+00 : f32
    %79 = vector.broadcast %cst_23 : f32 to vector<8x32xf32>
    %80 = arith.addf %79, %78 : vector<8x32xf32>
    %81 = arith.divf %79, %80 : vector<8x32xf32>
    %82 = vector.extract_strided_slice %75 {offsets = [0, 32], sizes = [8, 32], strides = [1, 1]} : vector<8x128xf32> to vector<8x32xf32>
    %83 = arith.negf %82 : vector<8x32xf32>
    %84 = math.exp %83 : vector<8x32xf32>
    %cst_24 = arith.constant 1.000000e+00 : f32
    %85 = vector.broadcast %cst_24 : f32 to vector<8x32xf32>
    %86 = arith.addf %85, %84 : vector<8x32xf32>
    %87 = arith.divf %85, %86 : vector<8x32xf32>
    %88 = vector.extract_strided_slice %75 {offsets = [0, 64], sizes = [8, 32], strides = [1, 1]} : vector<8x128xf32> to vector<8x32xf32>
    %89 = math.tanh %88 : vector<8x32xf32>
    %90 = vector.extract_strided_slice %75 {offsets = [0, 96], sizes = [8, 32], strides = [1, 1]} : vector<8x128xf32> to vector<8x32xf32>
    %91 = arith.negf %90 : vector<8x32xf32>
    %92 = math.exp %91 : vector<8x32xf32>
    %cst_25 = arith.constant 1.000000e+00 : f32
    %93 = vector.broadcast %cst_25 : f32 to vector<8x32xf32>
    %94 = arith.addf %93, %92 : vector<8x32xf32>
    %95 = arith.divf %93, %94 : vector<8x32xf32>
    %96 = arith.mulf %87, %33 : vector<8x32xf32>
    %97 = arith.mulf %81, %89 : vector<8x32xf32>
    %98 = arith.addf %96, %97 : vector<8x32xf32>
    %99 = math.tanh %98 : vector<8x32xf32>
    %100 = arith.mulf %95, %99 : vector<8x32xf32>
    %101 = arith.truncf %100 : vector<8x32xf32> to vector<8x32xbf16>
    %102 = arith.truncf %68 : vector<8x32xf32> to vector<8x32xbf16>
    %103 = tpu.concatenate %101, %102 in 1 : vector<8x32xbf16>, vector<8x32xbf16> -> vector<8x64xbf16>
    %c0_26 = arith.constant 0 : index
    %c0_27 = arith.constant 0 : index
    %104 = vector.load %arg2[%c0_26, %c0_27] : memref<64x128xbf16, #tpu.memory_space<vmem>>, vector<64x128xbf16>
    %cst_28 = arith.constant dense<0.000000e+00> : vector<8x128xf32>
    %105 = tpu.matmul %103, %104, %cst_28 {dimension_numbers = #tpu.dot_dimension_numbers<[1], [0], [0], [1], [0, 0, 1, 1], [], []>} : vector<8x64xbf16>, vector<64x128xbf16>, vector<8x128xf32> -> vector<8x128xf32>
    %c0_29 = arith.constant 0 : index
    %c0_30 = arith.constant 0 : index
    %106 = vector.load %arg3[%c0_29, %c0_30] : memref<1x128xf32, #tpu.memory_space<vmem>>, vector<1x128xf32>
    %107 = vector.broadcast %106 : vector<1x128xf32> to vector<8x128xf32>
    %108 = arith.addf %105, %107 : vector<8x128xf32>
    %109 = vector.extract_strided_slice %108 {offsets = [0, 0], sizes = [8, 32], strides = [1, 1]} : vector<8x128xf32> to vector<8x32xf32>
    %110 = arith.negf %109 : vector<8x32xf32>
    %111 = math.exp %110 : vector<8x32xf32>
    %cst_31 = arith.constant 1.000000e+00 : f32
    %112 = vector.broadcast %cst_31 : f32 to vector<8x32xf32>
    %113 = arith.addf %112, %111 : vector<8x32xf32>
    %114 = arith.divf %112, %113 : vector<8x32xf32>
    %115 = vector.extract_strided_slice %108 {offsets = [0, 32], sizes = [8, 32], strides = [1, 1]} : vector<8x128xf32> to vector<8x32xf32>
    %116 = arith.negf %115 : vector<8x32xf32>
    %117 = math.exp %116 : vector<8x32xf32>
    %cst_32 = arith.constant 1.000000e+00 : f32
    %118 = vector.broadcast %cst_32 : f32 to vector<8x32xf32>
    %119 = arith.addf %118, %117 : vector<8x32xf32>
    %120 = arith.divf %118, %119 : vector<8x32xf32>
    %121 = vector.extract_strided_slice %108 {offsets = [0, 64], sizes = [8, 32], strides = [1, 1]} : vector<8x128xf32> to vector<8x32xf32>
    %122 = math.tanh %121 : vector<8x32xf32>
    %123 = vector.extract_strided_slice %108 {offsets = [0, 96], sizes = [8, 32], strides = [1, 1]} : vector<8x128xf32> to vector<8x32xf32>
    %124 = arith.negf %123 : vector<8x32xf32>
    %125 = math.exp %124 : vector<8x32xf32>
    %cst_33 = arith.constant 1.000000e+00 : f32
    %126 = vector.broadcast %cst_33 : f32 to vector<8x32xf32>
    %127 = arith.addf %126, %125 : vector<8x32xf32>
    %128 = arith.divf %126, %127 : vector<8x32xf32>
    %129 = arith.mulf %120, %66 : vector<8x32xf32>
    %130 = arith.mulf %114, %122 : vector<8x32xf32>
    %131 = arith.addf %129, %130 : vector<8x32xf32>
    %132 = math.tanh %131 : vector<8x32xf32>
    %133 = arith.mulf %128, %132 : vector<8x32xf32>
    %c2_i32 = arith.constant 2 : i32
    %134 = arith.index_cast %c2_i32 : i32 to index
    %c0_34 = arith.constant 0 : index
    %c0_35 = arith.constant 0 : index
    %135 = vector.load %arg0[%134, %c0_34, %c0_35] : memref<8x8x128xf32, #tpu.memory_space<vmem>>, vector<1x8x128xf32>
    %136 = vector.shape_cast %135 : vector<1x8x128xf32> to vector<8x128xf32>
    %137 = arith.truncf %100 : vector<8x32xf32> to vector<8x32xbf16>
    %c0_36 = arith.constant 0 : index
    %c0_37 = arith.constant 0 : index
    %138 = vector.load %arg1[%c0_36, %c0_37] : memref<32x128xbf16, #tpu.memory_space<vmem>>, vector<32x128xbf16>
    %cst_38 = arith.constant dense<0.000000e+00> : vector<8x128xf32>
    %139 = tpu.matmul %137, %138, %cst_38 {dimension_numbers = #tpu.dot_dimension_numbers<[1], [0], [0], [1], [0, 0, 1, 1], [], []>} : vector<8x32xbf16>, vector<32x128xbf16>, vector<8x128xf32> -> vector<8x128xf32>
    %140 = arith.addf %136, %139 : vector<8x128xf32>
    %141 = vector.extract_strided_slice %140 {offsets = [0, 0], sizes = [8, 32], strides = [1, 1]} : vector<8x128xf32> to vector<8x32xf32>
    %142 = arith.negf %141 : vector<8x32xf32>
    %143 = math.exp %142 : vector<8x32xf32>
    %cst_39 = arith.constant 1.000000e+00 : f32
    %144 = vector.broadcast %cst_39 : f32 to vector<8x32xf32>
    %145 = arith.addf %144, %143 : vector<8x32xf32>
    %146 = arith.divf %144, %145 : vector<8x32xf32>
    %147 = vector.extract_strided_slice %140 {offsets = [0, 32], sizes = [8, 32], strides = [1, 1]} : vector<8x128xf32> to vector<8x32xf32>
    %148 = arith.negf %147 : vector<8x32xf32>
    %149 = math.exp %148 : vector<8x32xf32>
    %cst_40 = arith.constant 1.000000e+00 : f32
    %150 = vector.broadcast %cst_40 : f32 to vector<8x32xf32>
    %151 = arith.addf %150, %149 : vector<8x32xf32>
    %152 = arith.divf %150, %151 : vector<8x32xf32>
    %153 = vector.extract_strided_slice %140 {offsets = [0, 64], sizes = [8, 32], strides = [1, 1]} : vector<8x128xf32> to vector<8x32xf32>
    %154 = math.tanh %153 : vector<8x32xf32>
    %155 = vector.extract_strided_slice %140 {offsets = [0, 96], sizes = [8, 32], strides = [1, 1]} : vector<8x128xf32> to vector<8x32xf32>
    %156 = arith.negf %155 : vector<8x32xf32>
    %157 = math.exp %156 : vector<8x32xf32>
    %cst_41 = arith.constant 1.000000e+00 : f32
    %158 = vector.broadcast %cst_41 : f32 to vector<8x32xf32>
    %159 = arith.addf %158, %157 : vector<8x32xf32>
    %160 = arith.divf %158, %159 : vector<8x32xf32>
    %161 = arith.mulf %152, %98 : vector<8x32xf32>
    %162 = arith.mulf %146, %154 : vector<8x32xf32>
    %163 = arith.addf %161, %162 : vector<8x32xf32>
    %164 = math.tanh %163 : vector<8x32xf32>
    %165 = arith.mulf %160, %164 : vector<8x32xf32>
    %166 = arith.truncf %165 : vector<8x32xf32> to vector<8x32xbf16>
    %167 = arith.truncf %133 : vector<8x32xf32> to vector<8x32xbf16>
    %168 = tpu.concatenate %166, %167 in 1 : vector<8x32xbf16>, vector<8x32xbf16> -> vector<8x64xbf16>
    %c0_42 = arith.constant 0 : index
    %c0_43 = arith.constant 0 : index
    %169 = vector.load %arg2[%c0_42, %c0_43] : memref<64x128xbf16, #tpu.memory_space<vmem>>, vector<64x128xbf16>
    %cst_44 = arith.constant dense<0.000000e+00> : vector<8x128xf32>
    %170 = tpu.matmul %168, %169, %cst_44 {dimension_numbers = #tpu.dot_dimension_numbers<[1], [0], [0], [1], [0, 0, 1, 1], [], []>} : vector<8x64xbf16>, vector<64x128xbf16>, vector<8x128xf32> -> vector<8x128xf32>
    %c0_45 = arith.constant 0 : index
    %c0_46 = arith.constant 0 : index
    %171 = vector.load %arg3[%c0_45, %c0_46] : memref<1x128xf32, #tpu.memory_space<vmem>>, vector<1x128xf32>
    %172 = vector.broadcast %171 : vector<1x128xf32> to vector<8x128xf32>
    %173 = arith.addf %170, %172 : vector<8x128xf32>
    %174 = vector.extract_strided_slice %173 {offsets = [0, 0], sizes = [8, 32], strides = [1, 1]} : vector<8x128xf32> to vector<8x32xf32>
    %175 = arith.negf %174 : vector<8x32xf32>
    %176 = math.exp %175 : vector<8x32xf32>
    %cst_47 = arith.constant 1.000000e+00 : f32
    %177 = vector.broadcast %cst_47 : f32 to vector<8x32xf32>
    %178 = arith.addf %177, %176 : vector<8x32xf32>
    %179 = arith.divf %177, %178 : vector<8x32xf32>
    %180 = vector.extract_strided_slice %173 {offsets = [0, 32], sizes = [8, 32], strides = [1, 1]} : vector<8x128xf32> to vector<8x32xf32>
    %181 = arith.negf %180 : vector<8x32xf32>
    %182 = math.exp %181 : vector<8x32xf32>
    %cst_48 = arith.constant 1.000000e+00 : f32
    %183 = vector.broadcast %cst_48 : f32 to vector<8x32xf32>
    %184 = arith.addf %183, %182 : vector<8x32xf32>
    %185 = arith.divf %183, %184 : vector<8x32xf32>
    %186 = vector.extract_strided_slice %173 {offsets = [0, 64], sizes = [8, 32], strides = [1, 1]} : vector<8x128xf32> to vector<8x32xf32>
    %187 = math.tanh %186 : vector<8x32xf32>
    %188 = vector.extract_strided_slice %173 {offsets = [0, 96], sizes = [8, 32], strides = [1, 1]} : vector<8x128xf32> to vector<8x32xf32>
    %189 = arith.negf %188 : vector<8x32xf32>
    %190 = math.exp %189 : vector<8x32xf32>
    %cst_49 = arith.constant 1.000000e+00 : f32
    %191 = vector.broadcast %cst_49 : f32 to vector<8x32xf32>
    %192 = arith.addf %191, %190 : vector<8x32xf32>
    %193 = arith.divf %191, %192 : vector<8x32xf32>
    %194 = arith.mulf %185, %131 : vector<8x32xf32>
    %195 = arith.mulf %179, %187 : vector<8x32xf32>
    %196 = arith.addf %194, %195 : vector<8x32xf32>
    %197 = math.tanh %196 : vector<8x32xf32>
    %198 = arith.mulf %193, %197 : vector<8x32xf32>
    %c3_i32 = arith.constant 3 : i32
    %199 = arith.index_cast %c3_i32 : i32 to index
    %c0_50 = arith.constant 0 : index
    %c0_51 = arith.constant 0 : index
    %200 = vector.load %arg0[%199, %c0_50, %c0_51] : memref<8x8x128xf32, #tpu.memory_space<vmem>>, vector<1x8x128xf32>
    %201 = vector.shape_cast %200 : vector<1x8x128xf32> to vector<8x128xf32>
    %202 = arith.truncf %165 : vector<8x32xf32> to vector<8x32xbf16>
    %c0_52 = arith.constant 0 : index
    %c0_53 = arith.constant 0 : index
    %203 = vector.load %arg1[%c0_52, %c0_53] : memref<32x128xbf16, #tpu.memory_space<vmem>>, vector<32x128xbf16>
    %cst_54 = arith.constant dense<0.000000e+00> : vector<8x128xf32>
    %204 = tpu.matmul %202, %203, %cst_54 {dimension_numbers = #tpu.dot_dimension_numbers<[1], [0], [0], [1], [0, 0, 1, 1], [], []>} : vector<8x32xbf16>, vector<32x128xbf16>, vector<8x128xf32> -> vector<8x128xf32>
    %205 = arith.addf %201, %204 : vector<8x128xf32>
    %206 = vector.extract_strided_slice %205 {offsets = [0, 0], sizes = [8, 32], strides = [1, 1]} : vector<8x128xf32> to vector<8x32xf32>
    %207 = arith.negf %206 : vector<8x32xf32>
    %208 = math.exp %207 : vector<8x32xf32>
    %cst_55 = arith.constant 1.000000e+00 : f32
    %209 = vector.broadcast %cst_55 : f32 to vector<8x32xf32>
    %210 = arith.addf %209, %208 : vector<8x32xf32>
    %211 = arith.divf %209, %210 : vector<8x32xf32>
    %212 = vector.extract_strided_slice %205 {offsets = [0, 32], sizes = [8, 32], strides = [1, 1]} : vector<8x128xf32> to vector<8x32xf32>
    %213 = arith.negf %212 : vector<8x32xf32>
    %214 = math.exp %213 : vector<8x32xf32>
    %cst_56 = arith.constant 1.000000e+00 : f32
    %215 = vector.broadcast %cst_56 : f32 to vector<8x32xf32>
    %216 = arith.addf %215, %214 : vector<8x32xf32>
    %217 = arith.divf %215, %216 : vector<8x32xf32>
    %218 = vector.extract_strided_slice %205 {offsets = [0, 64], sizes = [8, 32], strides = [1, 1]} : vector<8x128xf32> to vector<8x32xf32>
    %219 = math.tanh %218 : vector<8x32xf32>
    %220 = vector.extract_strided_slice %205 {offsets = [0, 96], sizes = [8, 32], strides = [1, 1]} : vector<8x128xf32> to vector<8x32xf32>
    %221 = arith.negf %220 : vector<8x32xf32>
    %222 = math.exp %221 : vector<8x32xf32>
    %cst_57 = arith.constant 1.000000e+00 : f32
    %223 = vector.broadcast %cst_57 : f32 to vector<8x32xf32>
    %224 = arith.addf %223, %222 : vector<8x32xf32>
    %225 = arith.divf %223, %224 : vector<8x32xf32>
    %226 = arith.mulf %217, %163 : vector<8x32xf32>
    %227 = arith.mulf %211, %219 : vector<8x32xf32>
    %228 = arith.addf %226, %227 : vector<8x32xf32>
    %229 = math.tanh %228 : vector<8x32xf32>
    %230 = arith.mulf %225, %229 : vector<8x32xf32>
    %231 = arith.truncf %230 : vector<8x32xf32> to vector<8x32xbf16>
    %232 = arith.truncf %198 : vector<8x32xf32> to vector<8x32xbf16>
    %233 = tpu.concatenate %231, %232 in 1 : vector<8x32xbf16>, vector<8x32xbf16> -> vector<8x64xbf16>
    %c0_58 = arith.constant 0 : index
    %c0_59 = arith.constant 0 : index
    %234 = vector.load %arg2[%c0_58, %c0_59] : memref<64x128xbf16, #tpu.memory_space<vmem>>, vector<64x128xbf16>
    %cst_60 = arith.constant dense<0.000000e+00> : vector<8x128xf32>
    %235 = tpu.matmul %233, %234, %cst_60 {dimension_numbers = #tpu.dot_dimension_numbers<[1], [0], [0], [1], [0, 0, 1, 1], [], []>} : vector<8x64xbf16>, vector<64x128xbf16>, vector<8x128xf32> -> vector<8x128xf32>
    %c0_61 = arith.constant 0 : index
    %c0_62 = arith.constant 0 : index
    %236 = vector.load %arg3[%c0_61, %c0_62] : memref<1x128xf32, #tpu.memory_space<vmem>>, vector<1x128xf32>
    %237 = vector.broadcast %236 : vector<1x128xf32> to vector<8x128xf32>
    %238 = arith.addf %235, %237 : vector<8x128xf32>
    %239 = vector.extract_strided_slice %238 {offsets = [0, 0], sizes = [8, 32], strides = [1, 1]} : vector<8x128xf32> to vector<8x32xf32>
    %240 = arith.negf %239 : vector<8x32xf32>
    %241 = math.exp %240 : vector<8x32xf32>
    %cst_63 = arith.constant 1.000000e+00 : f32
    %242 = vector.broadcast %cst_63 : f32 to vector<8x32xf32>
    %243 = arith.addf %242, %241 : vector<8x32xf32>
    %244 = arith.divf %242, %243 : vector<8x32xf32>
    %245 = vector.extract_strided_slice %238 {offsets = [0, 32], sizes = [8, 32], strides = [1, 1]} : vector<8x128xf32> to vector<8x32xf32>
    %246 = arith.negf %245 : vector<8x32xf32>
    %247 = math.exp %246 : vector<8x32xf32>
    %cst_64 = arith.constant 1.000000e+00 : f32
    %248 = vector.broadcast %cst_64 : f32 to vector<8x32xf32>
    %249 = arith.addf %248, %247 : vector<8x32xf32>
    %250 = arith.divf %248, %249 : vector<8x32xf32>
    %251 = vector.extract_strided_slice %238 {offsets = [0, 64], sizes = [8, 32], strides = [1, 1]} : vector<8x128xf32> to vector<8x32xf32>
    %252 = math.tanh %251 : vector<8x32xf32>
    %253 = vector.extract_strided_slice %238 {offsets = [0, 96], sizes = [8, 32], strides = [1, 1]} : vector<8x128xf32> to vector<8x32xf32>
    %254 = arith.negf %253 : vector<8x32xf32>
    %255 = math.exp %254 : vector<8x32xf32>
    %cst_65 = arith.constant 1.000000e+00 : f32
    %256 = vector.broadcast %cst_65 : f32 to vector<8x32xf32>
    %257 = arith.addf %256, %255 : vector<8x32xf32>
    %258 = arith.divf %256, %257 : vector<8x32xf32>
    %259 = arith.mulf %250, %196 : vector<8x32xf32>
    %260 = arith.mulf %244, %252 : vector<8x32xf32>
    %261 = arith.addf %259, %260 : vector<8x32xf32>
    %262 = math.tanh %261 : vector<8x32xf32>
    %263 = arith.mulf %258, %262 : vector<8x32xf32>
    %c4_i32 = arith.constant 4 : i32
    %264 = arith.index_cast %c4_i32 : i32 to index
    %c0_66 = arith.constant 0 : index
    %c0_67 = arith.constant 0 : index
    %265 = vector.load %arg0[%264, %c0_66, %c0_67] : memref<8x8x128xf32, #tpu.memory_space<vmem>>, vector<1x8x128xf32>
    %266 = vector.shape_cast %265 : vector<1x8x128xf32> to vector<8x128xf32>
    %267 = arith.truncf %230 : vector<8x32xf32> to vector<8x32xbf16>
    %c0_68 = arith.constant 0 : index
    %c0_69 = arith.constant 0 : index
    %268 = vector.load %arg1[%c0_68, %c0_69] : memref<32x128xbf16, #tpu.memory_space<vmem>>, vector<32x128xbf16>
    %cst_70 = arith.constant dense<0.000000e+00> : vector<8x128xf32>
    %269 = tpu.matmul %267, %268, %cst_70 {dimension_numbers = #tpu.dot_dimension_numbers<[1], [0], [0], [1], [0, 0, 1, 1], [], []>} : vector<8x32xbf16>, vector<32x128xbf16>, vector<8x128xf32> -> vector<8x128xf32>
    %270 = arith.addf %266, %269 : vector<8x128xf32>
    %271 = vector.extract_strided_slice %270 {offsets = [0, 0], sizes = [8, 32], strides = [1, 1]} : vector<8x128xf32> to vector<8x32xf32>
    %272 = arith.negf %271 : vector<8x32xf32>
    %273 = math.exp %272 : vector<8x32xf32>
    %cst_71 = arith.constant 1.000000e+00 : f32
    %274 = vector.broadcast %cst_71 : f32 to vector<8x32xf32>
    %275 = arith.addf %274, %273 : vector<8x32xf32>
    %276 = arith.divf %274, %275 : vector<8x32xf32>
    %277 = vector.extract_strided_slice %270 {offsets = [0, 32], sizes = [8, 32], strides = [1, 1]} : vector<8x128xf32> to vector<8x32xf32>
    %278 = arith.negf %277 : vector<8x32xf32>
    %279 = math.exp %278 : vector<8x32xf32>
    %cst_72 = arith.constant 1.000000e+00 : f32
    %280 = vector.broadcast %cst_72 : f32 to vector<8x32xf32>
    %281 = arith.addf %280, %279 : vector<8x32xf32>
    %282 = arith.divf %280, %281 : vector<8x32xf32>
    %283 = vector.extract_strided_slice %270 {offsets = [0, 64], sizes = [8, 32], strides = [1, 1]} : vector<8x128xf32> to vector<8x32xf32>
    %284 = math.tanh %283 : vector<8x32xf32>
    %285 = vector.extract_strided_slice %270 {offsets = [0, 96], sizes = [8, 32], strides = [1, 1]} : vector<8x128xf32> to vector<8x32xf32>
    %286 = arith.negf %285 : vector<8x32xf32>
    %287 = math.exp %286 : vector<8x32xf32>
    %cst_73 = arith.constant 1.000000e+00 : f32
    %288 = vector.broadcast %cst_73 : f32 to vector<8x32xf32>
    %289 = arith.addf %288, %287 : vector<8x32xf32>
    %290 = arith.divf %288, %289 : vector<8x32xf32>
    %291 = arith.mulf %282, %228 : vector<8x32xf32>
    %292 = arith.mulf %276, %284 : vector<8x32xf32>
    %293 = arith.addf %291, %292 : vector<8x32xf32>
    %294 = math.tanh %293 : vector<8x32xf32>
    %295 = arith.mulf %290, %294 : vector<8x32xf32>
    %296 = arith.truncf %295 : vector<8x32xf32> to vector<8x32xbf16>
    %297 = arith.truncf %263 : vector<8x32xf32> to vector<8x32xbf16>
    %298 = tpu.concatenate %296, %297 in 1 : vector<8x32xbf16>, vector<8x32xbf16> -> vector<8x64xbf16>
    %c0_74 = arith.constant 0 : index
    %c0_75 = arith.constant 0 : index
    %299 = vector.load %arg2[%c0_74, %c0_75] : memref<64x128xbf16, #tpu.memory_space<vmem>>, vector<64x128xbf16>
    %cst_76 = arith.constant dense<0.000000e+00> : vector<8x128xf32>
    %300 = tpu.matmul %298, %299, %cst_76 {dimension_numbers = #tpu.dot_dimension_numbers<[1], [0], [0], [1], [0, 0, 1, 1], [], []>} : vector<8x64xbf16>, vector<64x128xbf16>, vector<8x128xf32> -> vector<8x128xf32>
    %c0_77 = arith.constant 0 : index
    %c0_78 = arith.constant 0 : index
    %301 = vector.load %arg3[%c0_77, %c0_78] : memref<1x128xf32, #tpu.memory_space<vmem>>, vector<1x128xf32>
    %302 = vector.broadcast %301 : vector<1x128xf32> to vector<8x128xf32>
    %303 = arith.addf %300, %302 : vector<8x128xf32>
    %304 = vector.extract_strided_slice %303 {offsets = [0, 0], sizes = [8, 32], strides = [1, 1]} : vector<8x128xf32> to vector<8x32xf32>
    %305 = arith.negf %304 : vector<8x32xf32>
    %306 = math.exp %305 : vector<8x32xf32>
    %cst_79 = arith.constant 1.000000e+00 : f32
    %307 = vector.broadcast %cst_79 : f32 to vector<8x32xf32>
    %308 = arith.addf %307, %306 : vector<8x32xf32>
    %309 = arith.divf %307, %308 : vector<8x32xf32>
    %310 = vector.extract_strided_slice %303 {offsets = [0, 32], sizes = [8, 32], strides = [1, 1]} : vector<8x128xf32> to vector<8x32xf32>
    %311 = arith.negf %310 : vector<8x32xf32>
    %312 = math.exp %311 : vector<8x32xf32>
    %cst_80 = arith.constant 1.000000e+00 : f32
    %313 = vector.broadcast %cst_80 : f32 to vector<8x32xf32>
    %314 = arith.addf %313, %312 : vector<8x32xf32>
    %315 = arith.divf %313, %314 : vector<8x32xf32>
    %316 = vector.extract_strided_slice %303 {offsets = [0, 64], sizes = [8, 32], strides = [1, 1]} : vector<8x128xf32> to vector<8x32xf32>
    %317 = math.tanh %316 : vector<8x32xf32>
    %318 = vector.extract_strided_slice %303 {offsets = [0, 96], sizes = [8, 32], strides = [1, 1]} : vector<8x128xf32> to vector<8x32xf32>
    %319 = arith.negf %318 : vector<8x32xf32>
    %320 = math.exp %319 : vector<8x32xf32>
    %cst_81 = arith.constant 1.000000e+00 : f32
    %321 = vector.broadcast %cst_81 : f32 to vector<8x32xf32>
    %322 = arith.addf %321, %320 : vector<8x32xf32>
    %323 = arith.divf %321, %322 : vector<8x32xf32>
    %324 = arith.mulf %315, %261 : vector<8x32xf32>
    %325 = arith.mulf %309, %317 : vector<8x32xf32>
    %326 = arith.addf %324, %325 : vector<8x32xf32>
    %327 = math.tanh %326 : vector<8x32xf32>
    %328 = arith.mulf %323, %327 : vector<8x32xf32>
    %c5_i32 = arith.constant 5 : i32
    %329 = arith.index_cast %c5_i32 : i32 to index
    %c0_82 = arith.constant 0 : index
    %c0_83 = arith.constant 0 : index
    %330 = vector.load %arg0[%329, %c0_82, %c0_83] : memref<8x8x128xf32, #tpu.memory_space<vmem>>, vector<1x8x128xf32>
    %331 = vector.shape_cast %330 : vector<1x8x128xf32> to vector<8x128xf32>
    %332 = arith.truncf %295 : vector<8x32xf32> to vector<8x32xbf16>
    %c0_84 = arith.constant 0 : index
    %c0_85 = arith.constant 0 : index
    %333 = vector.load %arg1[%c0_84, %c0_85] : memref<32x128xbf16, #tpu.memory_space<vmem>>, vector<32x128xbf16>
    %cst_86 = arith.constant dense<0.000000e+00> : vector<8x128xf32>
    %334 = tpu.matmul %332, %333, %cst_86 {dimension_numbers = #tpu.dot_dimension_numbers<[1], [0], [0], [1], [0, 0, 1, 1], [], []>} : vector<8x32xbf16>, vector<32x128xbf16>, vector<8x128xf32> -> vector<8x128xf32>
    %335 = arith.addf %331, %334 : vector<8x128xf32>
    %336 = vector.extract_strided_slice %335 {offsets = [0, 0], sizes = [8, 32], strides = [1, 1]} : vector<8x128xf32> to vector<8x32xf32>
    %337 = arith.negf %336 : vector<8x32xf32>
    %338 = math.exp %337 : vector<8x32xf32>
    %cst_87 = arith.constant 1.000000e+00 : f32
    %339 = vector.broadcast %cst_87 : f32 to vector<8x32xf32>
    %340 = arith.addf %339, %338 : vector<8x32xf32>
    %341 = arith.divf %339, %340 : vector<8x32xf32>
    %342 = vector.extract_strided_slice %335 {offsets = [0, 32], sizes = [8, 32], strides = [1, 1]} : vector<8x128xf32> to vector<8x32xf32>
    %343 = arith.negf %342 : vector<8x32xf32>
    %344 = math.exp %343 : vector<8x32xf32>
    %cst_88 = arith.constant 1.000000e+00 : f32
    %345 = vector.broadcast %cst_88 : f32 to vector<8x32xf32>
    %346 = arith.addf %345, %344 : vector<8x32xf32>
    %347 = arith.divf %345, %346 : vector<8x32xf32>
    %348 = vector.extract_strided_slice %335 {offsets = [0, 64], sizes = [8, 32], strides = [1, 1]} : vector<8x128xf32> to vector<8x32xf32>
    %349 = math.tanh %348 : vector<8x32xf32>
    %350 = vector.extract_strided_slice %335 {offsets = [0, 96], sizes = [8, 32], strides = [1, 1]} : vector<8x128xf32> to vector<8x32xf32>
    %351 = arith.negf %350 : vector<8x32xf32>
    %352 = math.exp %351 : vector<8x32xf32>
    %cst_89 = arith.constant 1.000000e+00 : f32
    %353 = vector.broadcast %cst_89 : f32 to vector<8x32xf32>
    %354 = arith.addf %353, %352 : vector<8x32xf32>
    %355 = arith.divf %353, %354 : vector<8x32xf32>
    %356 = arith.mulf %347, %293 : vector<8x32xf32>
    %357 = arith.mulf %341, %349 : vector<8x32xf32>
    %358 = arith.addf %356, %357 : vector<8x32xf32>
    %359 = math.tanh %358 : vector<8x32xf32>
    %360 = arith.mulf %355, %359 : vector<8x32xf32>
    %361 = arith.truncf %360 : vector<8x32xf32> to vector<8x32xbf16>
    %362 = arith.truncf %328 : vector<8x32xf32> to vector<8x32xbf16>
    %363 = tpu.concatenate %361, %362 in 1 : vector<8x32xbf16>, vector<8x32xbf16> -> vector<8x64xbf16>
    %c0_90 = arith.constant 0 : index
    %c0_91 = arith.constant 0 : index
    %364 = vector.load %arg2[%c0_90, %c0_91] : memref<64x128xbf16, #tpu.memory_space<vmem>>, vector<64x128xbf16>
    %cst_92 = arith.constant dense<0.000000e+00> : vector<8x128xf32>
    %365 = tpu.matmul %363, %364, %cst_92 {dimension_numbers = #tpu.dot_dimension_numbers<[1], [0], [0], [1], [0, 0, 1, 1], [], []>} : vector<8x64xbf16>, vector<64x128xbf16>, vector<8x128xf32> -> vector<8x128xf32>
    %c0_93 = arith.constant 0 : index
    %c0_94 = arith.constant 0 : index
    %366 = vector.load %arg3[%c0_93, %c0_94] : memref<1x128xf32, #tpu.memory_space<vmem>>, vector<1x128xf32>
    %367 = vector.broadcast %366 : vector<1x128xf32> to vector<8x128xf32>
    %368 = arith.addf %365, %367 : vector<8x128xf32>
    %369 = vector.extract_strided_slice %368 {offsets = [0, 0], sizes = [8, 32], strides = [1, 1]} : vector<8x128xf32> to vector<8x32xf32>
    %370 = arith.negf %369 : vector<8x32xf32>
    %371 = math.exp %370 : vector<8x32xf32>
    %cst_95 = arith.constant 1.000000e+00 : f32
    %372 = vector.broadcast %cst_95 : f32 to vector<8x32xf32>
    %373 = arith.addf %372, %371 : vector<8x32xf32>
    %374 = arith.divf %372, %373 : vector<8x32xf32>
    %375 = vector.extract_strided_slice %368 {offsets = [0, 32], sizes = [8, 32], strides = [1, 1]} : vector<8x128xf32> to vector<8x32xf32>
    %376 = arith.negf %375 : vector<8x32xf32>
    %377 = math.exp %376 : vector<8x32xf32>
    %cst_96 = arith.constant 1.000000e+00 : f32
    %378 = vector.broadcast %cst_96 : f32 to vector<8x32xf32>
    %379 = arith.addf %378, %377 : vector<8x32xf32>
    %380 = arith.divf %378, %379 : vector<8x32xf32>
    %381 = vector.extract_strided_slice %368 {offsets = [0, 64], sizes = [8, 32], strides = [1, 1]} : vector<8x128xf32> to vector<8x32xf32>
    %382 = math.tanh %381 : vector<8x32xf32>
    %383 = vector.extract_strided_slice %368 {offsets = [0, 96], sizes = [8, 32], strides = [1, 1]} : vector<8x128xf32> to vector<8x32xf32>
    %384 = arith.negf %383 : vector<8x32xf32>
    %385 = math.exp %384 : vector<8x32xf32>
    %cst_97 = arith.constant 1.000000e+00 : f32
    %386 = vector.broadcast %cst_97 : f32 to vector<8x32xf32>
    %387 = arith.addf %386, %385 : vector<8x32xf32>
    %388 = arith.divf %386, %387 : vector<8x32xf32>
    %389 = arith.mulf %380, %326 : vector<8x32xf32>
    %390 = arith.mulf %374, %382 : vector<8x32xf32>
    %391 = arith.addf %389, %390 : vector<8x32xf32>
    %392 = math.tanh %391 : vector<8x32xf32>
    %393 = arith.mulf %388, %392 : vector<8x32xf32>
    %c6_i32 = arith.constant 6 : i32
    %394 = arith.index_cast %c6_i32 : i32 to index
    %c0_98 = arith.constant 0 : index
    %c0_99 = arith.constant 0 : index
    %395 = vector.load %arg0[%394, %c0_98, %c0_99] : memref<8x8x128xf32, #tpu.memory_space<vmem>>, vector<1x8x128xf32>
    %396 = vector.shape_cast %395 : vector<1x8x128xf32> to vector<8x128xf32>
    %397 = arith.truncf %360 : vector<8x32xf32> to vector<8x32xbf16>
    %c0_100 = arith.constant 0 : index
    %c0_101 = arith.constant 0 : index
    %398 = vector.load %arg1[%c0_100, %c0_101] : memref<32x128xbf16, #tpu.memory_space<vmem>>, vector<32x128xbf16>
    %cst_102 = arith.constant dense<0.000000e+00> : vector<8x128xf32>
    %399 = tpu.matmul %397, %398, %cst_102 {dimension_numbers = #tpu.dot_dimension_numbers<[1], [0], [0], [1], [0, 0, 1, 1], [], []>} : vector<8x32xbf16>, vector<32x128xbf16>, vector<8x128xf32> -> vector<8x128xf32>
    %400 = arith.addf %396, %399 : vector<8x128xf32>
    %401 = vector.extract_strided_slice %400 {offsets = [0, 0], sizes = [8, 32], strides = [1, 1]} : vector<8x128xf32> to vector<8x32xf32>
    %402 = arith.negf %401 : vector<8x32xf32>
    %403 = math.exp %402 : vector<8x32xf32>
    %cst_103 = arith.constant 1.000000e+00 : f32
    %404 = vector.broadcast %cst_103 : f32 to vector<8x32xf32>
    %405 = arith.addf %404, %403 : vector<8x32xf32>
    %406 = arith.divf %404, %405 : vector<8x32xf32>
    %407 = vector.extract_strided_slice %400 {offsets = [0, 32], sizes = [8, 32], strides = [1, 1]} : vector<8x128xf32> to vector<8x32xf32>
    %408 = arith.negf %407 : vector<8x32xf32>
    %409 = math.exp %408 : vector<8x32xf32>
    %cst_104 = arith.constant 1.000000e+00 : f32
    %410 = vector.broadcast %cst_104 : f32 to vector<8x32xf32>
    %411 = arith.addf %410, %409 : vector<8x32xf32>
    %412 = arith.divf %410, %411 : vector<8x32xf32>
    %413 = vector.extract_strided_slice %400 {offsets = [0, 64], sizes = [8, 32], strides = [1, 1]} : vector<8x128xf32> to vector<8x32xf32>
    %414 = math.tanh %413 : vector<8x32xf32>
    %415 = vector.extract_strided_slice %400 {offsets = [0, 96], sizes = [8, 32], strides = [1, 1]} : vector<8x128xf32> to vector<8x32xf32>
    %416 = arith.negf %415 : vector<8x32xf32>
    %417 = math.exp %416 : vector<8x32xf32>
    %cst_105 = arith.constant 1.000000e+00 : f32
    %418 = vector.broadcast %cst_105 : f32 to vector<8x32xf32>
    %419 = arith.addf %418, %417 : vector<8x32xf32>
    %420 = arith.divf %418, %419 : vector<8x32xf32>
    %421 = arith.mulf %412, %358 : vector<8x32xf32>
    %422 = arith.mulf %406, %414 : vector<8x32xf32>
    %423 = arith.addf %421, %422 : vector<8x32xf32>
    %424 = math.tanh %423 : vector<8x32xf32>
    %425 = arith.mulf %420, %424 : vector<8x32xf32>
    %426 = arith.truncf %425 : vector<8x32xf32> to vector<8x32xbf16>
    %427 = arith.truncf %393 : vector<8x32xf32> to vector<8x32xbf16>
    %428 = tpu.concatenate %426, %427 in 1 : vector<8x32xbf16>, vector<8x32xbf16> -> vector<8x64xbf16>
    %c0_106 = arith.constant 0 : index
    %c0_107 = arith.constant 0 : index
    %429 = vector.load %arg2[%c0_106, %c0_107] : memref<64x128xbf16, #tpu.memory_space<vmem>>, vector<64x128xbf16>
    %cst_108 = arith.constant dense<0.000000e+00> : vector<8x128xf32>
    %430 = tpu.matmul %428, %429, %cst_108 {dimension_numbers = #tpu.dot_dimension_numbers<[1], [0], [0], [1], [0, 0, 1, 1], [], []>} : vector<8x64xbf16>, vector<64x128xbf16>, vector<8x128xf32> -> vector<8x128xf32>
    %c0_109 = arith.constant 0 : index
    %c0_110 = arith.constant 0 : index
    %431 = vector.load %arg3[%c0_109, %c0_110] : memref<1x128xf32, #tpu.memory_space<vmem>>, vector<1x128xf32>
    %432 = vector.broadcast %431 : vector<1x128xf32> to vector<8x128xf32>
    %433 = arith.addf %430, %432 : vector<8x128xf32>
    %434 = vector.extract_strided_slice %433 {offsets = [0, 0], sizes = [8, 32], strides = [1, 1]} : vector<8x128xf32> to vector<8x32xf32>
    %435 = arith.negf %434 : vector<8x32xf32>
    %436 = math.exp %435 : vector<8x32xf32>
    %cst_111 = arith.constant 1.000000e+00 : f32
    %437 = vector.broadcast %cst_111 : f32 to vector<8x32xf32>
    %438 = arith.addf %437, %436 : vector<8x32xf32>
    %439 = arith.divf %437, %438 : vector<8x32xf32>
    %440 = vector.extract_strided_slice %433 {offsets = [0, 32], sizes = [8, 32], strides = [1, 1]} : vector<8x128xf32> to vector<8x32xf32>
    %441 = arith.negf %440 : vector<8x32xf32>
    %442 = math.exp %441 : vector<8x32xf32>
    %cst_112 = arith.constant 1.000000e+00 : f32
    %443 = vector.broadcast %cst_112 : f32 to vector<8x32xf32>
    %444 = arith.addf %443, %442 : vector<8x32xf32>
    %445 = arith.divf %443, %444 : vector<8x32xf32>
    %446 = vector.extract_strided_slice %433 {offsets = [0, 64], sizes = [8, 32], strides = [1, 1]} : vector<8x128xf32> to vector<8x32xf32>
    %447 = math.tanh %446 : vector<8x32xf32>
    %448 = vector.extract_strided_slice %433 {offsets = [0, 96], sizes = [8, 32], strides = [1, 1]} : vector<8x128xf32> to vector<8x32xf32>
    %449 = arith.negf %448 : vector<8x32xf32>
    %450 = math.exp %449 : vector<8x32xf32>
    %cst_113 = arith.constant 1.000000e+00 : f32
    %451 = vector.broadcast %cst_113 : f32 to vector<8x32xf32>
    %452 = arith.addf %451, %450 : vector<8x32xf32>
    %453 = arith.divf %451, %452 : vector<8x32xf32>
    %454 = arith.mulf %445, %391 : vector<8x32xf32>
    %455 = arith.mulf %439, %447 : vector<8x32xf32>
    %456 = arith.addf %454, %455 : vector<8x32xf32>
    %457 = math.tanh %456 : vector<8x32xf32>
    %458 = arith.mulf %453, %457 : vector<8x32xf32>
    %c7_i32 = arith.constant 7 : i32
    %459 = arith.index_cast %c7_i32 : i32 to index
    %c0_114 = arith.constant 0 : index
    %c0_115 = arith.constant 0 : index
    %460 = vector.load %arg0[%459, %c0_114, %c0_115] : memref<8x8x128xf32, #tpu.memory_space<vmem>>, vector<1x8x128xf32>
    %461 = vector.shape_cast %460 : vector<1x8x128xf32> to vector<8x128xf32>
    %462 = arith.truncf %425 : vector<8x32xf32> to vector<8x32xbf16>
    %c0_116 = arith.constant 0 : index
    %c0_117 = arith.constant 0 : index
    %463 = vector.load %arg1[%c0_116, %c0_117] : memref<32x128xbf16, #tpu.memory_space<vmem>>, vector<32x128xbf16>
    %cst_118 = arith.constant dense<0.000000e+00> : vector<8x128xf32>
    %464 = tpu.matmul %462, %463, %cst_118 {dimension_numbers = #tpu.dot_dimension_numbers<[1], [0], [0], [1], [0, 0, 1, 1], [], []>} : vector<8x32xbf16>, vector<32x128xbf16>, vector<8x128xf32> -> vector<8x128xf32>
    %465 = arith.addf %461, %464 : vector<8x128xf32>
    %466 = vector.extract_strided_slice %465 {offsets = [0, 0], sizes = [8, 32], strides = [1, 1]} : vector<8x128xf32> to vector<8x32xf32>
    %467 = arith.negf %466 : vector<8x32xf32>
    %468 = math.exp %467 : vector<8x32xf32>
    %cst_119 = arith.constant 1.000000e+00 : f32
    %469 = vector.broadcast %cst_119 : f32 to vector<8x32xf32>
    %470 = arith.addf %469, %468 : vector<8x32xf32>
    %471 = arith.divf %469, %470 : vector<8x32xf32>
    %472 = vector.extract_strided_slice %465 {offsets = [0, 32], sizes = [8, 32], strides = [1, 1]} : vector<8x128xf32> to vector<8x32xf32>
    %473 = arith.negf %472 : vector<8x32xf32>
    %474 = math.exp %473 : vector<8x32xf32>
    %cst_120 = arith.constant 1.000000e+00 : f32
    %475 = vector.broadcast %cst_120 : f32 to vector<8x32xf32>
    %476 = arith.addf %475, %474 : vector<8x32xf32>
    %477 = arith.divf %475, %476 : vector<8x32xf32>
    %478 = vector.extract_strided_slice %465 {offsets = [0, 64], sizes = [8, 32], strides = [1, 1]} : vector<8x128xf32> to vector<8x32xf32>
    %479 = math.tanh %478 : vector<8x32xf32>
    %480 = vector.extract_strided_slice %465 {offsets = [0, 96], sizes = [8, 32], strides = [1, 1]} : vector<8x128xf32> to vector<8x32xf32>
    %481 = arith.negf %480 : vector<8x32xf32>
    %482 = math.exp %481 : vector<8x32xf32>
    %cst_121 = arith.constant 1.000000e+00 : f32
    %483 = vector.broadcast %cst_121 : f32 to vector<8x32xf32>
    %484 = arith.addf %483, %482 : vector<8x32xf32>
    %485 = arith.divf %483, %484 : vector<8x32xf32>
    %486 = arith.mulf %477, %423 : vector<8x32xf32>
    %487 = arith.mulf %471, %479 : vector<8x32xf32>
    %488 = arith.addf %486, %487 : vector<8x32xf32>
    %489 = math.tanh %488 : vector<8x32xf32>
    %490 = arith.mulf %485, %489 : vector<8x32xf32>
    %491 = arith.truncf %490 : vector<8x32xf32> to vector<8x32xbf16>
    %492 = arith.truncf %458 : vector<8x32xf32> to vector<8x32xbf16>
    %493 = tpu.concatenate %491, %492 in 1 : vector<8x32xbf16>, vector<8x32xbf16> -> vector<8x64xbf16>
    %c0_122 = arith.constant 0 : index
    %c0_123 = arith.constant 0 : index
    %494 = vector.load %arg2[%c0_122, %c0_123] : memref<64x128xbf16, #tpu.memory_space<vmem>>, vector<64x128xbf16>
    %cst_124 = arith.constant dense<0.000000e+00> : vector<8x128xf32>
    %495 = tpu.matmul %493, %494, %cst_124 {dimension_numbers = #tpu.dot_dimension_numbers<[1], [0], [0], [1], [0, 0, 1, 1], [], []>} : vector<8x64xbf16>, vector<64x128xbf16>, vector<8x128xf32> -> vector<8x128xf32>
    %c0_125 = arith.constant 0 : index
    %c0_126 = arith.constant 0 : index
    %496 = vector.load %arg3[%c0_125, %c0_126] : memref<1x128xf32, #tpu.memory_space<vmem>>, vector<1x128xf32>
    %497 = vector.broadcast %496 : vector<1x128xf32> to vector<8x128xf32>
    %498 = arith.addf %495, %497 : vector<8x128xf32>
    %499 = vector.extract_strided_slice %498 {offsets = [0, 0], sizes = [8, 32], strides = [1, 1]} : vector<8x128xf32> to vector<8x32xf32>
    %500 = arith.negf %499 : vector<8x32xf32>
    %501 = math.exp %500 : vector<8x32xf32>
    %cst_127 = arith.constant 1.000000e+00 : f32
    %502 = vector.broadcast %cst_127 : f32 to vector<8x32xf32>
    %503 = arith.addf %502, %501 : vector<8x32xf32>
    %504 = arith.divf %502, %503 : vector<8x32xf32>
    %505 = vector.extract_strided_slice %498 {offsets = [0, 32], sizes = [8, 32], strides = [1, 1]} : vector<8x128xf32> to vector<8x32xf32>
    %506 = arith.negf %505 : vector<8x32xf32>
    %507 = math.exp %506 : vector<8x32xf32>
    %cst_128 = arith.constant 1.000000e+00 : f32
    %508 = vector.broadcast %cst_128 : f32 to vector<8x32xf32>
    %509 = arith.addf %508, %507 : vector<8x32xf32>
    %510 = arith.divf %508, %509 : vector<8x32xf32>
    %511 = vector.extract_strided_slice %498 {offsets = [0, 64], sizes = [8, 32], strides = [1, 1]} : vector<8x128xf32> to vector<8x32xf32>
    %512 = math.tanh %511 : vector<8x32xf32>
    %513 = vector.extract_strided_slice %498 {offsets = [0, 96], sizes = [8, 32], strides = [1, 1]} : vector<8x128xf32> to vector<8x32xf32>
    %514 = arith.negf %513 : vector<8x32xf32>
    %515 = math.exp %514 : vector<8x32xf32>
    %cst_129 = arith.constant 1.000000e+00 : f32
    %516 = vector.broadcast %cst_129 : f32 to vector<8x32xf32>
    %517 = arith.addf %516, %515 : vector<8x32xf32>
    %518 = arith.divf %516, %517 : vector<8x32xf32>
    %519 = arith.mulf %510, %456 : vector<8x32xf32>
    %520 = arith.mulf %504, %512 : vector<8x32xf32>
    %521 = arith.addf %519, %520 : vector<8x32xf32>
    %522 = math.tanh %521 : vector<8x32xf32>
    %523 = arith.mulf %518, %522 : vector<8x32xf32>
    %c8_i32 = arith.constant 8 : i32
    %c0_130 = arith.constant 0 : index
    %c0_131 = arith.constant 0 : index
    %c0_132 = arith.constant 0 : index
    %524 = vector.load %arg4[%c0_130, %c0_131, %c0_132] : memref<2x8x32xf32, #tpu.memory_space<vmem>>, vector<1x8x32xf32>
    %525 = vector.shape_cast %524 : vector<1x8x32xf32> to vector<8x32xf32>
    %526 = vector.shape_cast %490 : vector<8x32xf32> to vector<1x8x32xf32>
    tpu.vector_store %arg4[%c0_130, %c0_131, %c0_132], %526 {strides = array<i32>} : memref<2x8x32xf32, #tpu.memory_space<vmem>>, vector<1x8x32xf32>,
    %c0_133 = arith.constant 0 : index
    %c0_134 = arith.constant 0 : index
    %c0_135 = arith.constant 0 : index
    %527 = vector.load %arg5[%c0_133, %c0_134, %c0_135] : memref<2x8x32xf32, #tpu.memory_space<vmem>>, vector<1x8x32xf32>
    %528 = vector.shape_cast %527 : vector<1x8x32xf32> to vector<8x32xf32>
    %529 = vector.shape_cast %488 : vector<8x32xf32> to vector<1x8x32xf32>
    tpu.vector_store %arg5[%c0_133, %c0_134, %c0_135], %529 {strides = array<i32>} : memref<2x8x32xf32, #tpu.memory_space<vmem>>, vector<1x8x32xf32>,
    %c1 = arith.constant 1 : index
    %c0_136 = arith.constant 0 : index
    %c0_137 = arith.constant 0 : index
    %530 = vector.load %arg4[%c1, %c0_136, %c0_137] : memref<2x8x32xf32, #tpu.memory_space<vmem>>, vector<1x8x32xf32>
    %531 = vector.shape_cast %530 : vector<1x8x32xf32> to vector<8x32xf32>
    %532 = vector.shape_cast %523 : vector<8x32xf32> to vector<1x8x32xf32>
    tpu.vector_store %arg4[%c1, %c0_136, %c0_137], %532 {strides = array<i32>} : memref<2x8x32xf32, #tpu.memory_space<vmem>>, vector<1x8x32xf32>,
    %c1_138 = arith.constant 1 : index
    %c0_139 = arith.constant 0 : index
    %c0_140 = arith.constant 0 : index
    %533 = vector.load %arg5[%c1_138, %c0_139, %c0_140] : memref<2x8x32xf32, #tpu.memory_space<vmem>>, vector<1x8x32xf32>
    %534 = vector.shape_cast %533 : vector<1x8x32xf32> to vector<8x32xf32>
    %535 = vector.shape_cast %521 : vector<8x32xf32> to vector<1x8x32xf32>
    tpu.vector_store %arg5[%c1_138, %c0_139, %c0_140], %535 {strides = array<i32>} : memref<2x8x32xf32, #tpu.memory_space<vmem>>, vector<1x8x32xf32>,
    return
  }
}

module attributes {stable_mosaic.version = 11 : i64} {
  func.func @kernel(%arg0: i32, %arg1: memref<7xi32, #tpu.memory_space<smem>>, %arg2: memref<1x8x32xbf16, #tpu.memory_space<vmem>>, %arg3: memref<128x32xbf16, #tpu.memory_space<vmem>>, %arg4: memref<64x128xbf16, #tpu.memory_space<vmem>>, %arg5: memref<64x128xbf16, #tpu.memory_space<vmem>>, %arg6: memref<1x128xf32, #tpu.memory_space<vmem>>, %arg7: memref<1x128xf32, #tpu.memory_space<vmem>>, %arg8: memref<32x128xbf16, #tpu.memory_space<vmem>>, %arg9: memref<1x128xf32, #tpu.memory_space<vmem>>, %arg10: memref<2x8x32xf32, #tpu.memory_space<vmem>>, %arg11: memref<2x8x32xf32, #tpu.memory_space<vmem>>, %arg12: memref<1x128xf32, #tpu.memory_space<vmem>>, %arg13: memref<1x128xf32, #tpu.memory_space<vmem>>, %arg14: memref<1x8x128xf32, #tpu.memory_space<vmem>>, %arg15: memref<2x8x32xf32, #tpu.memory_space<vmem>>, %arg16: memref<2x8x32xf32, #tpu.memory_space<vmem>>, %arg17: memref<8x32xbf16, #tpu.memory_space<vmem>>, %arg18: memref<8x128xbf16, #tpu.memory_space<vmem>>) attributes {dimension_semantics = [#tpu.dimension_semantics<arbitrary>], iteration_bounds = array<i64: 7>, scalar_prefetch = 1 : i64, scratch_operands = 4 : i64, tpu.core_type = #tpu.core_type<tc>, window_params = [{transform_indices = @transform_0, window_bounds = array<i64: 1, 8, 32>}, {pipeline_mode = #tpu.pipeline_mode<synchronous>, transform_indices = @transform_1, window_bounds = array<i64: 128, 32>}, {pipeline_mode = #tpu.pipeline_mode<synchronous>, transform_indices = @transform_2, window_bounds = array<i64: 64, 128>}, {pipeline_mode = #tpu.pipeline_mode<synchronous>, transform_indices = @transform_3, window_bounds = array<i64: 64, 128>}, {pipeline_mode = #tpu.pipeline_mode<synchronous>, transform_indices = @transform_4, window_bounds = array<i64: 1, 128>}, {pipeline_mode = #tpu.pipeline_mode<synchronous>, transform_indices = @transform_5, window_bounds = array<i64: 1, 128>}, {pipeline_mode = #tpu.pipeline_mode<synchronous>, transform_indices = @transform_6, window_bounds = array<i64: 32, 128>}, {pipeline_mode = #tpu.pipeline_mode<synchronous>, transform_indices = @transform_7, window_bounds = array<i64: 1, 128>}, {pipeline_mode = #tpu.pipeline_mode<synchronous>, transform_indices = @transform_8, window_bounds = array<i64: 2, 8, 32>}, {pipeline_mode = #tpu.pipeline_mode<synchronous>, transform_indices = @transform_9, window_bounds = array<i64: 2, 8, 32>}, {pipeline_mode = #tpu.pipeline_mode<synchronous>, transform_indices = @transform_10, window_bounds = array<i64: 1, 128>}, {pipeline_mode = #tpu.pipeline_mode<synchronous>, transform_indices = @transform_11, window_bounds = array<i64: 1, 128>}, {transform_indices = @transform_12, window_bounds = array<i64: 1, 8, 128>}]} {
    %c0_i32 = arith.constant 0 : i32
    %0 = arith.cmpi eq, %arg0, %c0_i32 : i32
    %1 = arith.extui %0 : i1 to i32
    %c0_i32_0 = arith.constant 0 : i32
    %2 = arith.cmpi ne, %1, %c0_i32_0 : i32
    scf.if %2 {
      %c0_62 = arith.constant 0 : index
      %c0_63 = arith.constant 0 : index
      %c0_64 = arith.constant 0 : index
      %131 = vector.load %arg10[%c0_62, %c0_63, %c0_64] : memref<2x8x32xf32, #tpu.memory_space<vmem>>, vector<2x8x32xf32>
      %c0_65 = arith.constant 0 : index
      %c0_66 = arith.constant 0 : index
      %c0_67 = arith.constant 0 : index
      %132 = vector.load %arg15[%c0_65, %c0_66, %c0_67] : memref<2x8x32xf32, #tpu.memory_space<vmem>>, vector<2x8x32xf32>
      tpu.vector_store %arg15[%c0_65, %c0_66, %c0_67], %131 {strides = array<i32>} : memref<2x8x32xf32, #tpu.memory_space<vmem>>, vector<2x8x32xf32>,
      %c0_68 = arith.constant 0 : index
      %c0_69 = arith.constant 0 : index
      %c0_70 = arith.constant 0 : index
      %133 = vector.load %arg11[%c0_68, %c0_69, %c0_70] : memref<2x8x32xf32, #tpu.memory_space<vmem>>, vector<2x8x32xf32>
      %c0_71 = arith.constant 0 : index
      %c0_72 = arith.constant 0 : index
      %c0_73 = arith.constant 0 : index
      %134 = vector.load %arg16[%c0_71, %c0_72, %c0_73] : memref<2x8x32xf32, #tpu.memory_space<vmem>>, vector<2x8x32xf32>
      tpu.vector_store %arg16[%c0_71, %c0_72, %c0_73], %133 {strides = array<i32>} : memref<2x8x32xf32, #tpu.memory_space<vmem>>, vector<2x8x32xf32>,
    } else {
    }
    %c0_i32_1 = arith.constant 0 : i32
    %3 = arith.cmpi eq, %arg0, %c0_i32_1 : i32
    %c1_i32 = arith.constant 1 : i32
    %4 = arith.subi %arg0, %c1_i32 : i32
    %c0_i32_2 = arith.constant 0 : i32
    %5 = arith.maxsi %4, %c0_i32_2 : i32
    %6 = arith.index_cast %5 : i32 to index
    %7 = memref.load %arg1[%6] : memref<7xi32, #tpu.memory_space<smem>>
    %c0_i32_3 = arith.constant 0 : i32
    %8 = arith.cmpi ne, %7, %c0_i32_3 : i32
    %9 = arith.ori %3, %8 : i1
    %10 = arith.extui %9 : i1 to i32
    %c0_i32_4 = arith.constant 0 : i32
    %11 = arith.cmpi ne, %10, %c0_i32_4 : i32
    scf.if %11 {
      %c0_62 = arith.constant 0 : index
      %c0_63 = arith.constant 0 : index
      %c0_64 = arith.constant 0 : index
      %131 = vector.load %arg2[%c0_62, %c0_63, %c0_64] : memref<1x8x32xbf16, #tpu.memory_space<vmem>>, vector<1x8x32xbf16>
      %132 = vector.shape_cast %131 : vector<1x8x32xbf16> to vector<8x32xbf16>
      %c0_65 = arith.constant 0 : index
      %c0_66 = arith.constant 0 : index
      %133 = vector.load %arg17[%c0_65, %c0_66] : memref<8x32xbf16, #tpu.memory_space<vmem>>, vector<8x32xbf16>
      tpu.vector_store %arg17[%c0_65, %c0_66], %132 {strides = array<i32>} : memref<8x32xbf16, #tpu.memory_space<vmem>>, vector<8x32xbf16>,
    } else {
    }
    %true = arith.constant true
    %12 = arith.xori %9, %true : i1
    %13 = arith.extui %12 : i1 to i32
    %c0_i32_5 = arith.constant 0 : i32
    %14 = arith.cmpi ne, %13, %c0_i32_5 : i32
    scf.if %14 {
      %c0_62 = arith.constant 0 : index
      %c0_63 = arith.constant 0 : index
      %131 = vector.load %arg18[%c0_62, %c0_63] : memref<8x128xbf16, #tpu.memory_space<vmem>>, vector<8x128xbf16>
      %c0_64 = arith.constant 0 : index
      %c0_65 = arith.constant 0 : index
      %132 = vector.load %arg3[%c0_64, %c0_65] : memref<128x32xbf16, #tpu.memory_space<vmem>>, vector<128x32xbf16>
      %cst_66 = arith.constant dense<0.000000e+00> : vector<8x32xf32>
      %133 = tpu.matmul %131, %132, %cst_66 {dimension_numbers = #tpu.dot_dimension_numbers<[1], [0], [0], [1], [0, 0, 1, 1], [], []>} : vector<8x128xbf16>, vector<128x32xbf16>, vector<8x32xf32> -> vector<8x32xf32>
      %134 = arith.truncf %133 : vector<8x32xf32> to vector<8x32xbf16>
      %c0_67 = arith.constant 0 : index
      %c0_68 = arith.constant 0 : index
      %135 = vector.load %arg17[%c0_67, %c0_68] : memref<8x32xbf16, #tpu.memory_space<vmem>>, vector<8x32xbf16>
      tpu.vector_store %arg17[%c0_67, %c0_68], %134 {strides = array<i32>} : memref<8x32xbf16, #tpu.memory_space<vmem>>, vector<8x32xbf16>,
    } else {
    }
    %c0 = arith.constant 0 : index
    %c0_6 = arith.constant 0 : index
    %15 = vector.load %arg17[%c0, %c0_6] : memref<8x32xbf16, #tpu.memory_space<vmem>>, vector<8x32xbf16>
    %c0_7 = arith.constant 0 : index
    %c0_8 = arith.constant 0 : index
    %c0_9 = arith.constant 0 : index
    %16 = vector.load %arg15[%c0_7, %c0_8, %c0_9] : memref<2x8x32xf32, #tpu.memory_space<vmem>>, vector<1x8x32xf32>
    %17 = vector.shape_cast %16 : vector<1x8x32xf32> to vector<8x32xf32>
    %18 = arith.truncf %17 : vector<8x32xf32> to vector<8x32xbf16>
    %19 = tpu.concatenate %15, %18 in 1 : vector<8x32xbf16>, vector<8x32xbf16> -> vector<8x64xbf16>
    %c0_10 = arith.constant 0 : index
    %c0_11 = arith.constant 0 : index
    %20 = vector.load %arg4[%c0_10, %c0_11] : memref<64x128xbf16, #tpu.memory_space<vmem>>, vector<64x128xbf16>
    %cst = arith.constant dense<0.000000e+00> : vector<8x128xf32>
    %21 = tpu.matmul %19, %20, %cst {dimension_numbers = #tpu.dot_dimension_numbers<[1], [0], [0], [1], [0, 0, 1, 1], [], []>} : vector<8x64xbf16>, vector<64x128xbf16>, vector<8x128xf32> -> vector<8x128xf32>
    %c0_12 = arith.constant 0 : index
    %c0_13 = arith.constant 0 : index
    %22 = vector.load %arg6[%c0_12, %c0_13] : memref<1x128xf32, #tpu.memory_space<vmem>>, vector<1x128xf32>
    %23 = vector.broadcast %22 : vector<1x128xf32> to vector<8x128xf32>
    %24 = arith.addf %21, %23 : vector<8x128xf32>
    %25 = vector.extract_strided_slice %24 {offsets = [0, 0], sizes = [8, 32], strides = [1, 1]} : vector<8x128xf32> to vector<8x32xf32>
    %26 = arith.negf %25 : vector<8x32xf32>
    %27 = math.exp %26 : vector<8x32xf32>
    %cst_14 = arith.constant 1.000000e+00 : f32
    %28 = vector.broadcast %cst_14 : f32 to vector<8x32xf32>
    %29 = arith.addf %28, %27 : vector<8x32xf32>
    %30 = arith.divf %28, %29 : vector<8x32xf32>
    %31 = vector.extract_strided_slice %24 {offsets = [0, 32], sizes = [8, 32], strides = [1, 1]} : vector<8x128xf32> to vector<8x32xf32>
    %32 = arith.negf %31 : vector<8x32xf32>
    %33 = math.exp %32 : vector<8x32xf32>
    %cst_15 = arith.constant 1.000000e+00 : f32
    %34 = vector.broadcast %cst_15 : f32 to vector<8x32xf32>
    %35 = arith.addf %34, %33 : vector<8x32xf32>
    %36 = arith.divf %34, %35 : vector<8x32xf32>
    %37 = vector.extract_strided_slice %24 {offsets = [0, 64], sizes = [8, 32], strides = [1, 1]} : vector<8x128xf32> to vector<8x32xf32>
    %38 = math.tanh %37 : vector<8x32xf32>
    %39 = vector.extract_strided_slice %24 {offsets = [0, 96], sizes = [8, 32], strides = [1, 1]} : vector<8x128xf32> to vector<8x32xf32>
    %40 = arith.negf %39 : vector<8x32xf32>
    %41 = math.exp %40 : vector<8x32xf32>
    %cst_16 = arith.constant 1.000000e+00 : f32
    %42 = vector.broadcast %cst_16 : f32 to vector<8x32xf32>
    %43 = arith.addf %42, %41 : vector<8x32xf32>
    %44 = arith.divf %42, %43 : vector<8x32xf32>
    %c0_17 = arith.constant 0 : index
    %c0_18 = arith.constant 0 : index
    %c0_19 = arith.constant 0 : index
    %45 = vector.load %arg16[%c0_17, %c0_18, %c0_19] : memref<2x8x32xf32, #tpu.memory_space<vmem>>, vector<1x8x32xf32>
    %46 = vector.shape_cast %45 : vector<1x8x32xf32> to vector<8x32xf32>
    %47 = arith.mulf %36, %46 : vector<8x32xf32>
    %48 = arith.mulf %30, %38 : vector<8x32xf32>
    %49 = arith.addf %47, %48 : vector<8x32xf32>
    %50 = math.tanh %49 : vector<8x32xf32>
    %51 = arith.mulf %44, %50 : vector<8x32xf32>
    %c0_20 = arith.constant 0 : index
    %c0_21 = arith.constant 0 : index
    %c0_22 = arith.constant 0 : index
    %52 = vector.load %arg15[%c0_20, %c0_21, %c0_22] : memref<2x8x32xf32, #tpu.memory_space<vmem>>, vector<1x8x32xf32>
    %53 = vector.shape_cast %52 : vector<1x8x32xf32> to vector<8x32xf32>
    %54 = vector.shape_cast %51 : vector<8x32xf32> to vector<1x8x32xf32>
    tpu.vector_store %arg15[%c0_20, %c0_21, %c0_22], %54 {strides = array<i32>} : memref<2x8x32xf32, #tpu.memory_space<vmem>>, vector<1x8x32xf32>,
    %c0_23 = arith.constant 0 : index
    %c0_24 = arith.constant 0 : index
    %c0_25 = arith.constant 0 : index
    %55 = vector.load %arg16[%c0_23, %c0_24, %c0_25] : memref<2x8x32xf32, #tpu.memory_space<vmem>>, vector<1x8x32xf32>
    %56 = vector.shape_cast %55 : vector<1x8x32xf32> to vector<8x32xf32>
    %57 = vector.shape_cast %49 : vector<8x32xf32> to vector<1x8x32xf32>
    tpu.vector_store %arg16[%c0_23, %c0_24, %c0_25], %57 {strides = array<i32>} : memref<2x8x32xf32, #tpu.memory_space<vmem>>, vector<1x8x32xf32>,
    %58 = arith.truncf %51 : vector<8x32xf32> to vector<8x32xbf16>
    %c1 = arith.constant 1 : index
    %c0_26 = arith.constant 0 : index
    %c0_27 = arith.constant 0 : index
    %59 = vector.load %arg15[%c1, %c0_26, %c0_27] : memref<2x8x32xf32, #tpu.memory_space<vmem>>, vector<1x8x32xf32>
    %60 = vector.shape_cast %59 : vector<1x8x32xf32> to vector<8x32xf32>
    %61 = arith.truncf %60 : vector<8x32xf32> to vector<8x32xbf16>
    %62 = tpu.concatenate %58, %61 in 1 : vector<8x32xbf16>, vector<8x32xbf16> -> vector<8x64xbf16>
    %c0_28 = arith.constant 0 : index
    %c0_29 = arith.constant 0 : index
    %63 = vector.load %arg5[%c0_28, %c0_29] : memref<64x128xbf16, #tpu.memory_space<vmem>>, vector<64x128xbf16>
    %cst_30 = arith.constant dense<0.000000e+00> : vector<8x128xf32>
    %64 = tpu.matmul %62, %63, %cst_30 {dimension_numbers = #tpu.dot_dimension_numbers<[1], [0], [0], [1], [0, 0, 1, 1], [], []>} : vector<8x64xbf16>, vector<64x128xbf16>, vector<8x128xf32> -> vector<8x128xf32>
    %c0_31 = arith.constant 0 : index
    %c0_32 = arith.constant 0 : index
    %65 = vector.load %arg7[%c0_31, %c0_32] : memref<1x128xf32, #tpu.memory_space<vmem>>, vector<1x128xf32>
    %66 = vector.broadcast %65 : vector<1x128xf32> to vector<8x128xf32>
    %67 = arith.addf %64, %66 : vector<8x128xf32>
    %68 = vector.extract_strided_slice %67 {offsets = [0, 0], sizes = [8, 32], strides = [1, 1]} : vector<8x128xf32> to vector<8x32xf32>
    %69 = arith.negf %68 : vector<8x32xf32>
    %70 = math.exp %69 : vector<8x32xf32>
    %cst_33 = arith.constant 1.000000e+00 : f32
    %71 = vector.broadcast %cst_33 : f32 to vector<8x32xf32>
    %72 = arith.addf %71, %70 : vector<8x32xf32>
    %73 = arith.divf %71, %72 : vector<8x32xf32>
    %74 = vector.extract_strided_slice %67 {offsets = [0, 32], sizes = [8, 32], strides = [1, 1]} : vector<8x128xf32> to vector<8x32xf32>
    %75 = arith.negf %74 : vector<8x32xf32>
    %76 = math.exp %75 : vector<8x32xf32>
    %cst_34 = arith.constant 1.000000e+00 : f32
    %77 = vector.broadcast %cst_34 : f32 to vector<8x32xf32>
    %78 = arith.addf %77, %76 : vector<8x32xf32>
    %79 = arith.divf %77, %78 : vector<8x32xf32>
    %80 = vector.extract_strided_slice %67 {offsets = [0, 64], sizes = [8, 32], strides = [1, 1]} : vector<8x128xf32> to vector<8x32xf32>
    %81 = math.tanh %80 : vector<8x32xf32>
    %82 = vector.extract_strided_slice %67 {offsets = [0, 96], sizes = [8, 32], strides = [1, 1]} : vector<8x128xf32> to vector<8x32xf32>
    %83 = arith.negf %82 : vector<8x32xf32>
    %84 = math.exp %83 : vector<8x32xf32>
    %cst_35 = arith.constant 1.000000e+00 : f32
    %85 = vector.broadcast %cst_35 : f32 to vector<8x32xf32>
    %86 = arith.addf %85, %84 : vector<8x32xf32>
    %87 = arith.divf %85, %86 : vector<8x32xf32>
    %c1_36 = arith.constant 1 : index
    %c0_37 = arith.constant 0 : index
    %c0_38 = arith.constant 0 : index
    %88 = vector.load %arg16[%c1_36, %c0_37, %c0_38] : memref<2x8x32xf32, #tpu.memory_space<vmem>>, vector<1x8x32xf32>
    %89 = vector.shape_cast %88 : vector<1x8x32xf32> to vector<8x32xf32>
    %90 = arith.mulf %79, %89 : vector<8x32xf32>
    %91 = arith.mulf %73, %81 : vector<8x32xf32>
    %92 = arith.addf %90, %91 : vector<8x32xf32>
    %93 = math.tanh %92 : vector<8x32xf32>
    %94 = arith.mulf %87, %93 : vector<8x32xf32>
    %c1_39 = arith.constant 1 : index
    %c0_40 = arith.constant 0 : index
    %c0_41 = arith.constant 0 : index
    %95 = vector.load %arg15[%c1_39, %c0_40, %c0_41] : memref<2x8x32xf32, #tpu.memory_space<vmem>>, vector<1x8x32xf32>
    %96 = vector.shape_cast %95 : vector<1x8x32xf32> to vector<8x32xf32>
    %97 = vector.shape_cast %94 : vector<8x32xf32> to vector<1x8x32xf32>
    tpu.vector_store %arg15[%c1_39, %c0_40, %c0_41], %97 {strides = array<i32>} : memref<2x8x32xf32, #tpu.memory_space<vmem>>, vector<1x8x32xf32>,
    %c1_42 = arith.constant 1 : index
    %c0_43 = arith.constant 0 : index
    %c0_44 = arith.constant 0 : index
    %98 = vector.load %arg16[%c1_42, %c0_43, %c0_44] : memref<2x8x32xf32, #tpu.memory_space<vmem>>, vector<1x8x32xf32>
    %99 = vector.shape_cast %98 : vector<1x8x32xf32> to vector<8x32xf32>
    %100 = vector.shape_cast %92 : vector<8x32xf32> to vector<1x8x32xf32>
    tpu.vector_store %arg16[%c1_42, %c0_43, %c0_44], %100 {strides = array<i32>} : memref<2x8x32xf32, #tpu.memory_space<vmem>>, vector<1x8x32xf32>,
    %101 = arith.truncf %94 : vector<8x32xf32> to vector<8x32xbf16>
    %c0_45 = arith.constant 0 : index
    %c0_46 = arith.constant 0 : index
    %102 = vector.load %arg8[%c0_45, %c0_46] : memref<32x128xbf16, #tpu.memory_space<vmem>>, vector<32x128xbf16>
    %cst_47 = arith.constant dense<0.000000e+00> : vector<8x128xf32>
    %103 = tpu.matmul %101, %102, %cst_47 {dimension_numbers = #tpu.dot_dimension_numbers<[1], [0], [0], [1], [0, 0, 1, 1], [], []>} : vector<8x32xbf16>, vector<32x128xbf16>, vector<8x128xf32> -> vector<8x128xf32>
    %c0_48 = arith.constant 0 : index
    %c0_49 = arith.constant 0 : index
    %104 = vector.load %arg9[%c0_48, %c0_49] : memref<1x128xf32, #tpu.memory_space<vmem>>, vector<1x128xf32>
    %105 = vector.broadcast %104 : vector<1x128xf32> to vector<8x128xf32>
    %106 = arith.addf %103, %105 : vector<8x128xf32>
    %c0_50 = arith.constant 0 : index
    %c0_51 = arith.constant 0 : index
    %c0_52 = arith.constant 0 : index
    %107 = vector.load %arg14[%c0_50, %c0_51, %c0_52] : memref<1x8x128xf32, #tpu.memory_space<vmem>>, vector<1x8x128xf32>
    %108 = vector.shape_cast %107 : vector<1x8x128xf32> to vector<8x128xf32>
    %109 = vector.shape_cast %106 : vector<8x128xf32> to vector<1x8x128xf32>
    tpu.vector_store %arg14[%c0_50, %c0_51, %c0_52], %109 {strides = array<i32>} : memref<1x8x128xf32, #tpu.memory_space<vmem>>, vector<1x8x128xf32>,
    %c0_53 = arith.constant 0 : index
    %c0_54 = arith.constant 0 : index
    %110 = vector.load %arg12[%c0_53, %c0_54] : memref<1x128xf32, #tpu.memory_space<vmem>>, vector<1x128xf32>
    %c0_55 = arith.constant 0 : index
    %c0_56 = arith.constant 0 : index
    %111 = vector.load %arg13[%c0_55, %c0_56] : memref<1x128xf32, #tpu.memory_space<vmem>>, vector<1x128xf32>
    %112 = vector.broadcast %111 : vector<1x128xf32> to vector<8x128xf32>
    %113 = arith.addf %106, %112 : vector<8x128xf32>
    %cst_57 = arith.constant dense<0xFF800000> : vector<8xf32>
    %114 = vector.multi_reduction <maximumf>, %113, %cst_57 [1] : vector<8x128xf32> to vector<8xf32>
    %115 = vector.shape_cast %114 : vector<8xf32> to vector<8x1xf32>
    %116 = vector.broadcast %115 : vector<8x1xf32> to vector<8x128xf32>
    %117 = arith.cmpf oeq, %113, %116 : vector<8x128xf32>
    %cst_58 = arith.constant 1.280000e+02 : f32
    %118 = vector.shape_cast %110 : vector<1x128xf32> to vector<1x128xf32>
    %119 = vector.broadcast %118 : vector<1x128xf32> to vector<8x128xf32>
    %120 = vector.broadcast %cst_58 : f32 to vector<8x128xf32>
    %121 = arith.select %117, %119, %120 : vector<8x128xi1>, vector<8x128xf32>
    %cst_59 = arith.constant dense<0x7F800000> : vector<8xf32>
    %122 = vector.multi_reduction <minimumf>, %121, %cst_59 [1] : vector<8x128xf32> to vector<8xf32>
    %123 = vector.shape_cast %122 : vector<8xf32> to vector<8x1xf32>
    %124 = vector.broadcast %110 : vector<1x128xf32> to vector<8x128xf32>
    %125 = vector.broadcast %123 : vector<8x1xf32> to vector<8x128xf32>
    %126 = arith.cmpf oeq, %124, %125 : vector<8x128xf32>
    %127 = arith.extui %126 : vector<8x128xi1> to vector<8x128xi32>
    %128 = arith.sitofp %127 : vector<8x128xi32> to vector<8x128xf32>
    %129 = arith.truncf %128 : vector<8x128xf32> to vector<8x128xbf16>
    %c0_60 = arith.constant 0 : index
    %c0_61 = arith.constant 0 : index
    %130 = vector.load %arg18[%c0_60, %c0_61] : memref<8x128xbf16, #tpu.memory_space<vmem>>, vector<8x128xbf16>
    tpu.vector_store %arg18[%c0_60, %c0_61], %129 {strides = array<i32>} : memref<8x128xbf16, #tpu.memory_space<vmem>>, vector<8x128xbf16>,
    return
  }
  func.func @transform_0(%arg0: i32, %arg1: memref<7xi32, #tpu.memory_space<smem>>) -> (i32, i32, i32) {
    %c0_i32 = arith.constant 0 : i32
    %c0_i32_0 = arith.constant 0 : i32
    %c0_i32_1 = arith.constant 0 : i32
    return %arg0, %c0_i32, %c0_i32_0 : i32, i32, i32
  }
  func.func @transform_1(%arg0: i32, %arg1: memref<7xi32, #tpu.memory_space<smem>>) -> (i32, i32) {
    %c0_i32 = arith.constant 0 : i32
    %c0_i32_0 = arith.constant 0 : i32
    %c0_i32_1 = arith.constant 0 : i32
    return %c0_i32, %c0_i32_0 : i32, i32
  }
  func.func @transform_2(%arg0: i32, %arg1: memref<7xi32, #tpu.memory_space<smem>>) -> (i32, i32) {
    %c0_i32 = arith.constant 0 : i32
    %c0_i32_0 = arith.constant 0 : i32
    %c0_i32_1 = arith.constant 0 : i32
    return %c0_i32, %c0_i32_0 : i32, i32
  }
  func.func @transform_3(%arg0: i32, %arg1: memref<7xi32, #tpu.memory_space<smem>>) -> (i32, i32) {
    %c0_i32 = arith.constant 0 : i32
    %c0_i32_0 = arith.constant 0 : i32
    %c0_i32_1 = arith.constant 0 : i32
    return %c0_i32, %c0_i32_0 : i32, i32
  }
  func.func @transform_4(%arg0: i32, %arg1: memref<7xi32, #tpu.memory_space<smem>>) -> (i32, i32) {
    %c0_i32 = arith.constant 0 : i32
    %c0_i32_0 = arith.constant 0 : i32
    %c0_i32_1 = arith.constant 0 : i32
    return %c0_i32, %c0_i32_0 : i32, i32
  }
  func.func @transform_5(%arg0: i32, %arg1: memref<7xi32, #tpu.memory_space<smem>>) -> (i32, i32) {
    %c0_i32 = arith.constant 0 : i32
    %c0_i32_0 = arith.constant 0 : i32
    %c0_i32_1 = arith.constant 0 : i32
    return %c0_i32, %c0_i32_0 : i32, i32
  }
  func.func @transform_6(%arg0: i32, %arg1: memref<7xi32, #tpu.memory_space<smem>>) -> (i32, i32) {
    %c0_i32 = arith.constant 0 : i32
    %c0_i32_0 = arith.constant 0 : i32
    %c0_i32_1 = arith.constant 0 : i32
    return %c0_i32, %c0_i32_0 : i32, i32
  }
  func.func @transform_7(%arg0: i32, %arg1: memref<7xi32, #tpu.memory_space<smem>>) -> (i32, i32) {
    %c0_i32 = arith.constant 0 : i32
    %c0_i32_0 = arith.constant 0 : i32
    %c0_i32_1 = arith.constant 0 : i32
    return %c0_i32, %c0_i32_0 : i32, i32
  }
  func.func @transform_8(%arg0: i32, %arg1: memref<7xi32, #tpu.memory_space<smem>>) -> (i32, i32, i32) {
    %c0_i32 = arith.constant 0 : i32
    %c0_i32_0 = arith.constant 0 : i32
    %c0_i32_1 = arith.constant 0 : i32
    %c0_i32_2 = arith.constant 0 : i32
    return %c0_i32, %c0_i32_0, %c0_i32_1 : i32, i32, i32
  }
  func.func @transform_9(%arg0: i32, %arg1: memref<7xi32, #tpu.memory_space<smem>>) -> (i32, i32, i32) {
    %c0_i32 = arith.constant 0 : i32
    %c0_i32_0 = arith.constant 0 : i32
    %c0_i32_1 = arith.constant 0 : i32
    %c0_i32_2 = arith.constant 0 : i32
    return %c0_i32, %c0_i32_0, %c0_i32_1 : i32, i32, i32
  }
  func.func @transform_10(%arg0: i32, %arg1: memref<7xi32, #tpu.memory_space<smem>>) -> (i32, i32) {
    %c0_i32 = arith.constant 0 : i32
    %c0_i32_0 = arith.constant 0 : i32
    %c0_i32_1 = arith.constant 0 : i32
    return %c0_i32, %c0_i32_0 : i32, i32
  }
  func.func @transform_11(%arg0: i32, %arg1: memref<7xi32, #tpu.memory_space<smem>>) -> (i32, i32) {
    %c0_i32 = arith.constant 0 : i32
    %c0_i32_0 = arith.constant 0 : i32
    %c0_i32_1 = arith.constant 0 : i32
    return %c0_i32, %c0_i32_0 : i32, i32
  }
  func.func @transform_12(%arg0: i32, %arg1: memref<7xi32, #tpu.memory_space<smem>>) -> (i32, i32, i32) {
    %c0_i32 = arith.constant 0 : i32
    %c0_i32_0 = arith.constant 0 : i32
    %c0_i32_1 = arith.constant 0 : i32
    return %arg0, %c0_i32, %c0_i32_0 : i32, i32, i32
  }
}

</mosaic_0001>

<bundles_post_ra>
// kernel: forward.3
= control target key start
LH: loop header
LB: loop body
LE: loop exit
PB: predicated region body
PF: predicated region fallthrough
CT: control target
= control target key end

     0   :  { %vm63_vm0 = vcmask 261120   ;;  %s223_s1 = inlined_call_operand.vmem [shape: bf16[32,128], index: 1, kind: input, shape index: {}]   ;;  %s224_s2 = inlined_call_operand.vmem [shape: f32[1,128], index: 2, kind: input, shape index: {}]   ;;  %s225_s0 = inlined_call_operand.vmem [shape: bf16[64,32], index: 0, kind: input, shape index: {}]   ;;  %s226_s3 = inlined_call_operand.vmem [shape: f32[64,128], index: 3, kind: output, shape index: {}]  }
   0x1   :  { %v150_v0 = vld [vmem:[%s223_s1 + $0x8] sm:$0xff]  ;;  %v149_v1 = vld [vmem:[%s223_s1] sm:$0xff]  ;;  %v147_v4 = vld [vmem:[%s225_s0 + $0x10] sm:$0xff] }
   0x2   :  { %82 = vmatpush.bf16.msra.mxu0 %v150_v0  ;;  %151 = vmatpush.bf16.msra.mxu1 %v150_v0  ;;  %v145_v2 = vld [vmem:[%s225_s0] sm:$0xff]  ;;  %v146_v3 = vld [vmem:[%s225_s0 + $0x8] sm:$0xff]  ;;  %v148_v5 = vld [vmem:[%s225_s0 + $0x18] sm:$0xff] }
   0x3   :  { %152 = vmatpush.bf16.msra.mxu2 %v150_v0  ;;  %153 = vmatpush.bf16.msra.mxu3 %v150_v0  ;;  %v157_v6 = vld [vmem:[%s224_s2] ss:$0 sm:$0xff] }
   0x6   :  { %83 = vmatpush.bf16.msra.mxu0 %v149_v1  ;;  %154 = vmatpush.bf16.msra.mxu1 %v149_v1 }
   0x7   :  { %155 = vmatpush.bf16.msra.mxu2 %v149_v1  ;;  %156 = vmatpush.bf16.msra.mxu3 %v149_v1 }
   0x9   :  { %141 = vmatmul.msk.bf16.vlgmr.msra.gmra.mxu0 %vm63_vm0, %v145_v2  ;;  %142 = vmatmul.msk.bf16.vlgmr.msra.gmra.mxu1 %vm63_vm0, %v146_v3 }
   0xa   :  { %143 = vmatmul.msk.bf16.vlgmr.msra.gmra.mxu2 %vm63_vm0, %v147_v4  ;;  %144 = vmatmul.msk.bf16.vlgmr.msra.gmra.mxu3 %vm63_vm0, %v148_v5 }
  0x86   :  { %v85_v7 = vpop.f32.mrf.mxu0  ;;  %v90_v8 = vpop.f32.mrf.mxu1 }
  0x87   :  { %v86_v9 = vadd.f32 %v157_v6, %v85_v7  ;;  %v91_v10 = vadd.f32 %v157_v6, %v90_v8 }
  0x89   :  { %105 = vst [vmem:[%s226_s3] sm:$0xff] %v86_v9 }
  0x8a   :  { %107 = vst [vmem:[%s226_s3 + $0x10] sm:$0xff] %v91_v10 }
  0x8d   :  { %v95_v11 = vpop.f32.mrf.mxu2  ;;  %v100_v12 = vpop.f32.mrf.mxu3 }
  0x8e   :  { %v96_v13 = vadd.f32 %v157_v6, %v95_v11  ;;  %v101_v14 = vadd.f32 %v157_v6, %v100_v12  ;;  %v87_v15 = vpop.f32.mrf.mxu0  ;;  %v92_v16 = vpop.f32.mrf.mxu1 }
  0x8f   :  { %v88_v17 = vadd.f32 %v157_v6, %v87_v15  ;;  %v93_v18 = vadd.f32 %v157_v6, %v92_v16 }
  0x90   :  { %109 = vst [vmem:[%s226_s3 + $0x20] sm:$0xff] %v96_v13 }
  0x91   :  { %111 = vst [vmem:[%s226_s3 + $0x30] sm:$0xff] %v101_v14 }
  0x92   :  { %106 = vst [vmem:[%s226_s3 + $0x8] sm:$0xff] %v88_v17 }
  0x93   :  { %108 = vst [vmem:[%s226_s3 + $0x18] sm:$0xff] %v93_v18 }
  0x95   :  { %v97_v19 = vpop.f32.mrf.mxu2  ;;  %v102_v20 = vpop.f32.mrf.mxu3 }
  0x96   :  { %v98_v21 = vadd.f32 %v157_v6, %v97_v19  ;;  %v103_v22 = vadd.f32 %v157_v6, %v102_v20 }
  0x98   :  { %110 = vst [vmem:[%s226_s3 + $0x28] sm:$0xff] %v98_v21 }
  0x99   :  { %112 = vst [vmem:[%s226_s3 + $0x38] sm:$0xff] %v103_v22 }

// kernel: forward.5
= control target key start
LH: loop header
LB: loop body
LE: loop exit
PB: predicated region body
PF: predicated region fallthrough
CT: control target
= control target key end

     0   :  { %s1042_s28 = smov [#allocation7]   ;;  %s1249_s0 = inlined_call_operand.vmem [shape: s32[7], index: 0, kind: input, shape index: {}]   ;;  %s1250_s1 = inlined_call_operand.vmem [shape: bf16[7,8,32], index: 1, kind: input, shape index: {}]   ;;  %s1251_s2 = inlined_call_operand.vmem [shape: bf16[128,32], index: 2, kind: input, shape index: {}]   ;;  %s1252_s3 = inlined_call_operand.vmem [shape: bf16[64,128], index: 3, kind: input, shape index: {}]   ;;  %s1253_s4 = inlined_call_operand.vmem [shape: bf16[64,128], index: 4, kind: input, shape index: {}]   ;;  %s1254_s5 = inlined_call_operand.vmem [shape: f32[1,128], index: 5, kind: input, shape index: {}]   ;;  %s1255_s6 = inlined_call_operand.vmem [shape: f32[1,128], index: 6, kind: input, shape index: {}]   ;;  %s1256_s7 = inlined_call_operand.vmem [shape: bf16[32,128], index: 7, kind: input, shape index: {}]   ;;  %s1257_s8 = inlined_call_operand.vmem [shape: f32[1,128], index: 8, kind: input, shape index: {}]   ;;  %s1258_s9 = inlined_call_operand.vmem [shape: f32[2,8,32], index: 9, kind: input, shape index: {}]   ;;  %s1259_s10 = inlined_call_operand.vmem [shape: f32[2,8,32], index: 10, kind: input, shape index: {}]   ;;  %s1260_s11 = inlined_call_operand.vmem [shape: f32[1,128], index: 11, kind: input, shape index: {}]   ;;  %s1261_s12 = inlined_call_operand.vmem [shape: f32[1,128], index: 12, kind: input, shape index: {}]   ;;  %s1262_s13 = inlined_call_operand.vmem [shape: f32[7,8,128], index: 13, kind: output, shape index: {}]  }
   0x1   :  { %s19_s27 = sshll.u32 %s1249_s0, 4  ;;  %s20_s27 = int_to_ptr.vmem [resolvable:$true] %s19_s27 }
   0x2   :  { %22 = dma.vmem_to_smem %s20_s27, 16, %s1042_s28, [#allocation6] }
   0x3   :  { %1036 = dma.done.wait [#allocation6], 16 }
   0x4   :  { %1037 = vsyncadd [#allocation6], 4294967280 }
   0x5   :  { %25 = sfence }
   0x6   :  { %s1120_s29 = smov 0  }
   0x7 LB: > { %s879_s30 = sadd.s32 4294967295, %s1040_s29   ;;  %p883_p0 = scmp.ge.s32.totalorder %s1040_s29, 1  ;;  %s1040_s29 = sphi %s1120_s29, %s31_s29  }
   0x8   : > { %p370_p1 = scmp.lt.s32.totalorder %s1040_s29, 8 }
   0xa   : > { %p371_p2 = pnand %p883_p0, %p370_p1 }
   0xb   : > { %p410_p3 = scmp.lt.s32.totalorder (!%p371_p2), %s879_s30, 6  ;;  %p419_p4 = scmp.eq.s32.totalorder (!%p371_p2), %s879_s30, 0 }
   0xc   : > { %374 = sbr.rel (%p371_p2) target bundleno = 1869 (0x74d), region = 68  ;;  %p886_p5 = scmp.ne.s32.totalorder (!%p371_p2), %s879_s30, 0 }
  0x11   : > { %s411_s0 = scalar_select %p410_p3, %s879_s30, 6 }
  0x12   : > { %422 = sbr.rel (%p886_p5) target bundleno = 28 (0x1c), region = 72 }
  0x13   : > { %s884_s14 = sshll.u32 %s411_s0, 2  ;;  %s885_s15 = sshll.u32 %s411_s0, 3 }
  0x14   : > { %s413_s18 = scalar_lea.vmem %s1250_s1, %s884_s14  ;;  %s1134_s21 = scalar_lea.vmem %s1262_s13, %s885_s15 }
  0x17   : > { %v423_v0 = vld [vmem:[%s1258_s9] sm:$0xff]  ;;  %vm425_vm0 = vcmask 261120   ;;  %v424_v1 = vld [vmem:[%s1258_s9 + $0x8] sm:$0xff] }
  0x18   : > { %v428_v2 = vld [vmem:[%s1259_s10] sm:$0xff]  ;;  %426 = vst.msk [vmem:[#allocation2] sm:$0xff] %vm425_vm0, %v423_v0  ;;  %v429_v3 = vld [vmem:[%s1259_s10 + $0x8] sm:$0xff] }
  0x19   : > { %427 = vst.msk [vmem:[#allocation2 + $0x8] sm:$0xff] %vm425_vm0, %v424_v1 }
  0x1a   : > { %430 = vst.msk [vmem:[#allocation3] sm:$0xff] %vm425_vm0, %v428_v2 }
  0x1b   : > { %431 = vst.msk [vmem:[#allocation3 + $0x8] sm:$0xff] %vm425_vm0, %v429_v3 }
  0x1c PF: > { %s887_s14 = sadd.s32 4294967295, %s879_s30 }
  0x1d   : > { %p433_p6 = scmp.gt.s32.totalorder %s887_s14, 0 }
  0x1f   : > { %s1264_s14 = smov (!%p433_p6, %s887_s14), 0 }
  0x20   : > { %s435_s15 = sld [smem:[#allocation7 + %s1264_s14]] }
  0x26   : > { %p436_p7 = scmp.ne.s32.totalorder %s435_s15, 0 }
  0x28   : > { %p437_p8 = por %p436_p7, %p419_p4 }
  0x29   : > { %v441_v4 = vld [vmem:[%s413_s18] sm:$0xf] (%p437_p8)  ;;  %vm442_vm1 = vcmask (%p437_p8), 257024  }
  0x2a   : > { %440 = sbr.rel (!%p437_p8) target bundleno = 47 (0x2f), region = 76  ;;  %443 = vst.msk [vmem:[#allocation4] sm:$0xf] (%p437_p8), %vm442_vm1, %v441_v4 }
  0x2f PF: > { %446 = sbr.rel (%p437_p8) target bundleno = 218 (0xda), region = 80 }
  0x34   : > { %v975_v5 = vld [vmem:[%s1251_s2 + $0x38] sm:$0xff]  ;;  %v974_v6 = vld [vmem:[%s1251_s2 + $0x30] sm:$0xff]  ;;  %v973_v7 = vld [vmem:[%s1251_s2 + $0x28] sm:$0xff]  ;;  %vm526_vm2 = vcmask 257024  }
  0x35   : > { %512 = vmatpush.bf16.msra.mxu0 %v975_v5  ;;  %v972_v8 = vld [vmem:[%s1251_s2 + $0x20] sm:$0xff]  ;;  %v971_v9 = vld [vmem:[%s1251_s2 + $0x18] sm:$0xff]  ;;  %v970_v10 = vld [vmem:[%s1251_s2 + $0x10] sm:$0xff] }
  0x36   : > { %v969_v11 = vld [vmem:[%s1251_s2 + $0x8] sm:$0xff]  ;;  %v968_v12 = vld [vmem:[%s1251_s2] sm:$0xff] }
  0x37   : > { %v447_v13 = vld [vmem:[#allocation5] sm:$0xf] }
  0x39   : > { %513 = vmatpush.bf16.msra.mxu0 %v974_v6 }
  0x3d   : > { %514 = vmatpush.bf16.msra.mxu0 %v973_v7 }
  0x41   : > { %515 = vmatpush.bf16.msra.mxu0 %v972_v8 }
  0x45   : > { %516 = vmatpush.bf16.msra.mxu0 %v971_v9 }
  0x49   : > { %517 = vmatpush.bf16.msra.mxu0 %v970_v10 }
  0x4d   : > { %518 = vmatpush.bf16.msra.mxu0 %v969_v11 }
  0x51   : > { %519 = vmatpush.bf16.msra.mxu0 %v968_v12 }
  0x54   : > { %520 = vmatmul.bf16.vlgmr.msra.gmra.mxu0 %v447_v13 }
  0xd1   : > { %v521_v14 = vpop.f32.mrf.mxu0 }
  0xd2   : > { %v525_v15 = vpack.c.bf16 %v521_v14, %v521_v14 }
  0xd4   : > { %527 = vst.msk [vmem:[#allocation4] sm:$0xf] %vm526_vm2, %v525_v15 }
  0xd9   : > { %v523_v16 = vpop.f32.mrf.mxu0 }
  0xda PF: > { %v529_v17 = vld [vmem:[#allocation2] sm:$0xff]  ;;  %v979_v18 = vld [vmem:[%s1252_s3 + $0x18] sm:$0xff]  ;;  %v978_v20 = vld [vmem:[%s1252_s3 + $0x10] sm:$0xff]  ;;  %s1043_s30 = smov 32   ;;  %vm536_vm3 = vcmask 261120   ;;  %vm576_vm4 = vcmask 523264  }
  0xdb   : > { %v530_v19 = vpack.c.bf16 %v529_v17, %v529_v17  ;;  %583 = vmatpush.bf16.msra.mxu0 %v979_v18  ;;  %v977_v23 = vld [vmem:[%s1252_s3 + $0x8] sm:$0xff]  ;;  %v976_v24 = vld [vmem:[%s1252_s3] sm:$0xff]  ;;  %v612_v25 = vld [vmem:[#allocation3] sm:$0xff]  ;;  %s1044_s27 = smov 64   ;;  %s1045_s28 = smov 96  }
  0xdc   : > { %614 = vrot.lane.b32.xlu1 %v612_v25, %s1043_s30  ;;  %v528_v26 = vld [vmem:[#allocation4] sm:$0xf]  ;;  %v646_v49 = vld [vmem:[#allocation2 + $0x8] sm:$0xff]  ;;  %v983_v58 = vld [vmem:[%s1253_s4 + $0x18] sm:$0xff] }
  0xdd   : > { %v532_v21 = vunpack.c.l.b16 %v530_v19  ;;  %v999_v29 = vld [vmem:[%s1254_s5] ss:$0 sm:$0xff]  ;;  %v647_v50 = vpack.c.bf16 %v646_v49, %v646_v49  ;;  %703 = vmatpush.bf16.msra.mxu1 %v983_v58  ;;  %v982_v59 = vld [vmem:[%s1253_s4 + $0x10] sm:$0xff]  ;;  %v981_v60 = vld [vmem:[%s1253_s4 + $0x8] sm:$0xff] }
  0xde   : > { %v980_v61 = vld [vmem:[%s1253_s4] sm:$0xff]  ;;  %v733_v3 = vld [vmem:[#allocation3 + $0x8] sm:$0xff] }
  0xdf   : > { %v533_v22 = vpack.c.b16 %v532_v21, %v532_v21  ;;  %584 = vmatpush.bf16.msra.mxu0 %v978_v20  ;;  %v654_v51 = vunpack.c.l.b16 %v647_v50  ;;  %v1000_v7 = vld [vmem:[%s1255_s6] ss:$0 sm:$0xff] }
  0xe1   : > { %534 = vrot.lane.b32.xlu0 %v533_v22, %s1043_s30  ;;  %v655_v52 = vpack.c.b16 %v654_v51, %v654_v51  ;;  %704 = vmatpush.bf16.msra.mxu1 %v982_v59 }
  0xe3   : > { %585 = vmatpush.bf16.msra.mxu0 %v977_v23 }
  0xe5   : > { %705 = vmatpush.bf16.msra.mxu1 %v981_v60 }
  0xe7   : > { %586 = vmatpush.bf16.msra.mxu0 %v976_v24 }
  0xe9   : > { %706 = vmatpush.bf16.msra.mxu1 %v980_v61 }
 0x14e   : > { %v615_v53 = vpop.permute.xlu1 %614 }
 0x153   : > { %v535_v27 = vpop.permute.xlu0 %534 }
 0x154   : > { %v539_v28 = vsel %vm536_vm3, %v528_v26, %v535_v27 }
 0x155   : > { %936 = vmatmul.msk.bf16.vlgmr.msra.gmra.mxu0 %vm576_vm4, %v539_v28 }
 0x1d2   : > { %v588_v30 = vpop.f32.mrf.mxu0 }
 0x1d3   : > { %v589_v31 = vadd.f32 %v999_v29, %v588_v30 }
 0x1d5   : > { %1004 = vtanh.f32 %v589_v31  ;;  %v937_v34 = vmul.f32 -1.442695, %v589_v31 }
 0x1d7   : > { %1006 = vpow2.f32 %v937_v34 }
 0x1da   : > { %v590_v32 = vpop.f32.mrf.mxu0 }
 0x1db   : > { %v1005_v33 = vpop.eup %1004 }
 0x1dc   : > { %619 = vrot.lane.b32.xlu0 %v1005_v33, %s1044_s27 }
 0x1dd   : > { %v1007_v35 = vpop.eup %1006 }
 0x1de   : > { %v595_v36 = vadd.f32 1.0, %v1007_v35  ;;  %v985_v35 = vld [vmem:[%s1256_s7 + $0x8] sm:$0xff] }
 0x1df   : > { %798 = vmatpush.bf16.msra.mxu2 %v985_v35 }
 0x1e0   : > { %1008 = vrcp.f32 %v595_v36  ;;  %v607_v42 = vand.u32 2147483648, %v595_v36  ;;  %vm601_vm6 = vweird.f32 %v595_v36  ;;  %v605_v43 = vand.u32 2147483647, %v595_v36 }
 0x1e2   : > { %v608_v45 = vor.u32 1.1754944e-38, %v607_v42  ;;  %vm606_vm8 = vcmp.eq.f32.partialorder %v605_v43, 8.507059e+37  ;;  %v1001_v42 = vld [vmem:[%s1257_s8] ss:$0 sm:$0xff] }
 0x1e3   : > { %v1002_v43 = vld [vmem:[%s1261_s12] ss:$0 sm:$0xff] }
 0x1e4   : > { %656 = vrot.lane.b32.xlu0 %v655_v52, %s1043_s30  ;;  %v1046_v52 = vmov 0.0  }
 0x1e6   : > { %v1009_v37 = vpop.eup %1008 }
 0x1e7   : > { %v597_v38 = vmul.f32 %v1009_v37, %v595_v36  ;;  %vm602_vm5 = vweird.f32 %v1009_v37  ;;  %v984_v36 = vld [vmem:[%s1256_s7] sm:$0xff] }
 0x1e8   : > { %vm603_vm7 = vmor %vm601_vm6, %vm602_vm5  ;;  %799 = vmatpush.bf16.msra.mxu2 %v984_v36 }
 0x1e9   : > { %v598_v39 = vsub.f32 1.0, %v597_v38 }
 0x1eb   : > { %v599_v40 = vmul.f32 %v1009_v37, %v598_v39 }
 0x1ed   : > { %v600_v41 = vadd.f32 %v1009_v37, %v599_v40 }
 0x1ef   : > { %v604_v44 = vsel %vm603_vm7, %v1009_v37, %v600_v41 }
 0x1f0   : > { %v609_v46 = vsel %vm606_vm8, %v608_v45, %v604_v44 }
 0x1f1   : > { %v617_v54 = vmul.f32 %v615_v53, %v609_v46 }
 0x24e   : > { %v620_v47 = vpop.permute.xlu0 %619 }
 0x24f   : > { %v622_v48 = vmul.f32 %v620_v47, %v609_v46 }
 0x251   : > { %624 = vrot.lane.b32.xlu1 %v622_v48, %s1043_s30  ;;  %v1003_v48 = vld [vmem:[%s1260_s11] ss:$0 sm:$0xff] }
 0x256   : > { %v657_v4 = vpop.permute.xlu0 %656 }
 0x2c3   : > { %v625_v55 = vpop.permute.xlu1 %624 }
 0x2c4   : > { %v1195_v56 = vadd.f32 %v625_v55, %v617_v54 }
 0x2c6   : > { %1010 = vtanh.f32 %v1195_v56 }
 0x2cc   : > { %v1011_v57 = vpop.eup %1010 }
 0x2cd   : > { %630 = vrot.lane.b32.xlu2 %v1011_v57, %s1044_s27 }
 0x327   : > { %v631_v62 = vpop.permute.xlu2 %630 }
 0x328   : > { %v633_v63 = vmul.f32 %v631_v62, %v609_v46 }
 0x32a   : > { %v644_v0 = vpack.c.bf16 %v633_v63, %v633_v63 }
 0x32c   : > { %v649_v1 = vunpack.c.l.b16 %v644_v0 }
 0x32e   : > { %v650_v2 = vpack.c.b16 %v649_v1, %v649_v1 }
 0x330   : > { %651 = vrot.lane.b32.xlu2 %v650_v2, %s1043_s30 }
 0x338   : > { %735 = vrot.lane.b32.xlu2 %v733_v3, %s1043_s30 }
 0x38a   : > { %v652_v5 = vpop.permute.xlu2 %651 }
 0x38b   : > { %v660_v6 = vsel %vm536_vm3, %v652_v5, %v657_v4 }
 0x38c   : > { %954 = vmatmul.msk.bf16.vlgmr.msra.gmra.mxu1 %vm576_vm4, %v660_v6 }
 0x392   : > { %v736_v27 = vpop.permute.xlu2 %735 }
 0x409   : > { %v708_v8 = vpop.f32.mrf.mxu1 }
 0x40a   : > { %v709_v9 = vadd.f32 %v1000_v7, %v708_v8 }
 0x40c   : > { %1012 = vtanh.f32 %v709_v9  ;;  %v955_v12 = vmul.f32 -1.442695, %v709_v9 }
 0x40e   : > { %1014 = vpow2.f32 %v955_v12 }
 0x411   : > { %v710_v10 = vpop.f32.mrf.mxu1 }
 0x412   : > { %v1013_v11 = vpop.eup %1012 }
 0x413   : > { %740 = vrot.lane.b32.xlu1 %v1013_v11, %s1044_s27 }
 0x414   : > { %v1015_v13 = vpop.eup %1014 }
 0x415   : > { %v715_v14 = vadd.f32 1.0, %v1015_v13 }
 0x417   : > { %1016 = vrcp.f32 %v715_v14  ;;  %v727_v20 = vand.u32 2147483648, %v715_v14  ;;  %vm721_vm10 = vweird.f32 %v715_v14  ;;  %v725_v21 = vand.u32 2147483647, %v715_v14 }
 0x419   : > { %v728_v23 = vor.u32 1.1754944e-38, %v727_v20  ;;  %vm726_vm12 = vcmp.eq.f32.partialorder %v725_v21, 8.507059e+37 }
 0x41d   : > { %v1017_v15 = vpop.eup %1016 }
 0x41e   : > { %v717_v16 = vmul.f32 %v1017_v15, %v715_v14  ;;  %vm722_vm9 = vweird.f32 %v1017_v15 }
 0x41f   : > { %vm723_vm11 = vmor %vm721_vm10, %vm722_vm9 }
 0x420   : > { %v718_v17 = vsub.f32 1.0, %v717_v16 }
 0x422   : > { %v719_v18 = vmul.f32 %v1017_v15, %v718_v17 }
 0x424   : > { %v720_v19 = vadd.f32 %v1017_v15, %v719_v18 }
 0x426   : > { %v724_v22 = vsel %vm723_vm11, %v1017_v15, %v720_v19 }
 0x427   : > { %v729_v24 = vsel %vm726_vm12, %v728_v23, %v724_v22 }
 0x428   : > { %v738_v28 = vmul.f32 %v736_v27, %v729_v24 }
 0x485   : > { %v741_v25 = vpop.permute.xlu1 %740 }
 0x486   : > { %v743_v26 = vmul.f32 %v741_v25, %v729_v24 }
 0x488   : > { %745 = vrot.lane.b32.xlu0 %v743_v26, %s1043_s30 }
 0x4fa   : > { %v746_v29 = vpop.permute.xlu0 %745 }
 0x4fb   : > { %v748_v30 = vadd.f32 %v746_v29, %v738_v28 }
 0x4fd   : > { %1018 = vtanh.f32 %v748_v30 }
 0x503   : > { %v1019_v31 = vpop.eup %1018 }
 0x504   : > { %751 = vrot.lane.b32.xlu1 %v1019_v31, %s1044_s27 }
 0x576   : > { %v752_v32 = vpop.permute.xlu1 %751 }
 0x577   : > { %v754_v33 = vmul.f32 %v752_v32, %v729_v24 }
 0x579   : > { %v765_v34 = vpack.c.bf16 %v754_v33, %v754_v33 }
 0x57b   : > { %775 = vrot.lane.b32.xlu2 %v765_v34, %s1043_s30 }
 0x583   : > { %635 = vrot.lane.b32.xlu2 %v633_v63, %s1043_s30 }
 0x58b   : > { %640 = vrot.lane.b32.xlu2 %v1195_v56, %s1045_s28 }
 0x593   : > { %756 = vrot.lane.b32.xlu2 %v754_v33, %s1043_s30 }
 0x59b   : > { %761 = vrot.lane.b32.xlu2 %v748_v30, %s1045_s28 }
 0x5d5   : > { %v776_v37 = vpop.permute.xlu2 %775 }
 0x5d6   : > { %964 = vmatmul.msk.bf16.vlgmr.msra.gmra.mxu2 %vm536_vm3, %v776_v37 }
 0x5dd   : > { %v636_v38 = vpop.permute.xlu2 %635 }
 0x5de   : > { %638 = vst.msk [vmem:[#allocation2] sm:$0xff] %vm536_vm3, %v636_v38 }
 0x5e5   : > { %v641_v39 = vpop.permute.xlu2 %640 }
 0x5e6   : > { %643 = vst.msk [vmem:[#allocation3] sm:$0xff] %vm536_vm3, %v641_v39 }
 0x5ed   : > { %v757_v40 = vpop.permute.xlu2 %756 }
 0x5ee   : > { %759 = vst.msk [vmem:[#allocation2 + $0x8] sm:$0xff] %vm536_vm3, %v757_v40 }
 0x5f5   : > { %v762_v41 = vpop.permute.xlu2 %761 }
 0x5f6   : > { %764 = vst.msk [vmem:[#allocation3 + $0x8] sm:$0xff] %vm536_vm3, %v762_v41 }
 0x659   : > { %v801_v44 = vpop.f32.mrf.mxu2 }
 0x65a   : > { %v802_v45 = vadd.f32 %v1001_v42, %v801_v44 }
 0x65c   : > { %805 = vst [vmem:[%s1134_s21] sm:$0xff] %v802_v45  ;;  %v811_v46 = vadd.f32 %v1002_v43, %v802_v45 }
 0x65e   : > { %812 = vmax.xlane.f32.xlu0 %v811_v46 }
 0x661   : > { %v803_v47 = vpop.f32.mrf.mxu2 }
 0x6d1   : > { %v813_v49 = vpop.xlane.xlu0 %812 }
 0x6d2   : > { %vm814_vm13 = vcmp.eq.f32.partialorder %v811_v46, %v813_v49 }
 0x6d3   : > { %v818_v50 = vsel %vm814_vm13, %v1003_v48, 128.0 }
 0x6d4   : > { %819 = vmin.xlane.f32.xlu1 %v818_v50 }
 0x747   : > { %v820_v51 = vpop.xlane.xlu1 %819 }
 0x748   : > { %vm821_vm14 = vcmp.eq.f32.partialorder %v1003_v48, %v820_v51 }
 0x749   : > { %v965_v53 = vsel %vm821_vm14, 1.0, %v1046_v52 }
 0x74a   : > { %v824_v54 = vpack.c.bf16 %v965_v53, %v965_v53 }
 0x74c   : > { %825 = vst [vmem:[#allocation5] sm:$0xf] %v824_v54 }
 0x74d PF: > { %s31_s29 = sadd.s32 1, %s1040_s29  }
 0x74e   : > { %p28_p9 = scmp.ge.s32.totalorder %s31_s29, 9  }
 0x750   :  { %30 = sbr.rel (!%p28_p9) target bundleno = 7 (0x7), region = 112 }

// kernel: forward.4
= control target key start
LH: loop header
LB: loop body
LE: loop exit
PB: predicated region body
PF: predicated region fallthrough
CT: control target
= control target key end

     0   :  { %v1277_v2 = vmov 0   ;;  %s1279_s24 = smov 32   ;;  %vm37_vm4 = vcmask 261120   ;;  %vm136_vm5 = vcmask 523264   ;;  %s1280_s26 = smov 96   ;;  %s1587_s1 = inlined_call_operand.vmem [shape: bf16[32,128], index: 1, kind: input, shape index: {}]   ;;  %s1588_s0 = inlined_call_operand.vmem [shape: f32[8,8,128], index: 0, kind: input, shape index: {}]   ;;  %s1589_s2 = inlined_call_operand.vmem [shape: bf16[64,128], index: 2, kind: input, shape index: {}]   ;;  %s1590_s3 = inlined_call_operand.vmem [shape: f32[1,128], index: 3, kind: input, shape index: {}]   ;;  %s1591_s4 = inlined_call_operand.vmem [shape: f32[2,8,32], index: 4, kind: output, shape index: {0}]   ;;  %s1592_s5 = inlined_call_operand.vmem [shape: f32[2,8,32], index: 5, kind: output, shape index: {1}]  }
   0x1   :  { %v1314_v0 = vld [vmem:[%s1587_s1 + $0x8] sm:$0xff]  ;;  %v1320_v1 = vld [vmem:[%s1587_s1] sm:$0xff]  ;;  %s1278_s1 = smov 64   ;;  %v1341_v27 = vld [vmem:[%s1589_s2 + $0x18] sm:$0xff] }
   0x2   :  { %47 = vmatpush.bf16.msra.mxu0 %v1314_v0  ;;  %199 = vmatpush.bf16.msra.mxu2 %v1314_v0  ;;  %v20_v3 = vld [vmem:[%s1588_s0] sm:$0xff]  ;;  %v1347_v28 = vld [vmem:[%s1589_s2 + $0x10] sm:$0xff]  ;;  %v1355_v29 = vld [vmem:[%s1589_s2 + $0x8] sm:$0xff] }
   0x3   :  { %143 = vmatpush.bf16.msra.mxu1 %v1341_v27  ;;  %265 = vmatpush.bf16.msra.mxu3 %v1341_v27  ;;  %v1363_v30 = vld [vmem:[%s1589_s2] sm:$0xff]  ;;  %v1100_v41 = vld [vmem:[%s1588_s0 + $0x8] sm:$0xff] }
   0x4   :  { %v1389_v38 = vld [vmem:[%s1590_s3] ss:$0 sm:$0xff] }
   0x6   :  { %48 = vmatpush.bf16.msra.mxu0 %v1320_v1  ;;  %200 = vmatpush.bf16.msra.mxu2 %v1320_v1 }
   0x7   :  { %144 = vmatpush.bf16.msra.mxu1 %v1347_v28  ;;  %266 = vmatpush.bf16.msra.mxu3 %v1347_v28 }
   0x9   :  { %49 = vmatmul.bf16.vlgmr.msra.gmra.mxu0 %v1277_v2 }
   0xa   :  { %321 = vmatpush.bf16.msrb.mxu0 %v1314_v0  ;;  %387 = vmatpush.bf16.msrb.mxu2 %v1341_v27 }
   0xb   :  { %145 = vmatpush.bf16.msra.mxu1 %v1355_v29  ;;  %267 = vmatpush.bf16.msra.mxu3 %v1355_v29 }
   0xe   :  { %322 = vmatpush.bf16.msrb.mxu0 %v1320_v1  ;;  %388 = vmatpush.bf16.msrb.mxu2 %v1347_v28 }
   0xf   :  { %146 = vmatpush.bf16.msra.mxu1 %v1363_v30  ;;  %268 = vmatpush.bf16.msra.mxu3 %v1363_v30 }
  0x12   :  { %565 = vmatpush.bf16.msra.mxu0 %v1314_v0  ;;  %389 = vmatpush.bf16.msrb.mxu2 %v1355_v29 }
  0x13   :  { %443 = vmatpush.bf16.msrb.mxu1 %v1314_v0  ;;  %509 = vmatpush.bf16.msrb.mxu3 %v1341_v27 }
  0x16   :  { %566 = vmatpush.bf16.msra.mxu0 %v1320_v1  ;;  %390 = vmatpush.bf16.msrb.mxu2 %v1363_v30 }
  0x17   :  { %444 = vmatpush.bf16.msrb.mxu1 %v1320_v1  ;;  %510 = vmatpush.bf16.msrb.mxu3 %v1347_v28 }
  0x1b   :  { %511 = vmatpush.bf16.msrb.mxu3 %v1355_v29 }
  0x1f   :  { %512 = vmatpush.bf16.msrb.mxu3 %v1363_v30 }
  0x86   :  { %v50_v4 = vpop.f32.mrf.mxu0 }
  0x87   :  { %v54_v5 = vadd.f32 %v50_v4, %v20_v3 }
  0x89   :  { %1148 = vtanh.f32 %v54_v5  ;;  %v1081_v8 = vmul.f32 -1.442695, %v54_v5 }
  0x8b   :  { %1150 = vpow2.f32 %v1081_v8 }
  0x8e   :  { %v52_v6 = vpop.f32.mrf.mxu0 }
  0x8f   :  { %v1149_v7 = vpop.eup %1148 }
  0x90   :  { %77 = vrot.lane.b32.xlu0 %v1149_v7, %s1278_s1 }
  0x91   :  { %v1151_v9 = vpop.eup %1150 }
  0x92   :  { %v58_v10 = vadd.f32 1.0, %v1151_v9 }
  0x94   :  { %1152 = vrcp.f32 %v58_v10  ;;  %v70_v16 = vand.u32 2147483648, %v58_v10  ;;  %vm64_vm1 = vweird.f32 %v58_v10  ;;  %v68_v17 = vand.u32 2147483647, %v58_v10 }
  0x96   :  { %v71_v19 = vor.u32 1.1754944e-38, %v70_v16  ;;  %vm69_vm3 = vcmp.eq.f32.partialorder %v68_v17, 8.507059e+37 }
  0x9a   :  { %v1153_v11 = vpop.eup %1152 }
  0x9b   :  { %v60_v12 = vmul.f32 %v1153_v11, %v58_v10  ;;  %vm65_vm0 = vweird.f32 %v1153_v11 }
  0x9c   :  { %vm66_vm2 = vmor %vm64_vm1, %vm65_vm0 }
  0x9d   :  { %v61_v13 = vsub.f32 1.0, %v60_v12 }
  0x9f   :  { %v62_v14 = vmul.f32 %v1153_v11, %v61_v13 }
  0xa1   :  { %v63_v15 = vadd.f32 %v1153_v11, %v62_v14 }
  0xa3   :  { %v67_v18 = vsel %vm66_vm2, %v1153_v11, %v63_v15 }
  0xa4   :  { %v72_v21 = vsel %vm69_vm3, %v71_v19, %v67_v18 }
  0xa5   :  { %v75_v23 = vmul.f32 0.0, %v72_v21 }
 0x102   :  { %v78_v20 = vpop.permute.xlu0 %77 }
 0x103   :  { %v80_v22 = vmul.f32 %v78_v20, %v72_v21 }
 0x105   :  { %82 = vrot.lane.b32.xlu0 %v80_v22, %s1279_s24 }
 0x177   :  { %v83_v24 = vpop.permute.xlu0 %82 }
 0x178   :  { %v1334_v25 = vadd.f32 %v83_v24, %v75_v23 }
 0x17a   :  { %1154 = vtanh.f32 %v1334_v25 }
 0x180   :  { %v1155_v26 = vpop.eup %1154 }
 0x181   :  { %88 = vrot.lane.b32.xlu1 %v1155_v26, %s1278_s1 }
 0x1f3   :  { %v89_v31 = vpop.permute.xlu1 %88 }
 0x1f4   :  { %v91_v32 = vmul.f32 %v89_v31, %v72_v21 }
 0x1f6   :  { %v92_v33 = vpack.c.bf16 %v91_v32, %v91_v32 }
 0x1f8   :  { %v94_v34 = vunpack.c.l.b16 %v92_v33 }
 0x1fa   :  { %v95_v35 = vpack.c.b16 %v94_v34, %v94_v34 }
 0x1fc   :  { %96 = vrot.lane.b32.xlu1 %v95_v35, %s1279_s24 }
 0x26e   :  { %v97_v36 = vpop.permute.xlu1 %96 }
 0x26f   :  { %1101 = vmatmul.msk.bf16.vlgmr.msra.gmra.mxu2 %vm37_vm4, %v97_v36  ;;  %v99_v37 = vsel %vm37_vm4, %v97_v36, 0 }
 0x270   :  { %1098 = vmatmul.msk.bf16.vlgmr.msra.gmra.mxu1 %vm136_vm5, %v99_v37  ;;  %631 = vmatpush.bf16.msra.mxu2 %v1341_v27 }
 0x271   :  { %687 = vmatpush.bf16.msra.mxu1 %v1314_v0 }
 0x274   :  { %632 = vmatpush.bf16.msra.mxu2 %v1347_v28 }
 0x275   :  { %688 = vmatpush.bf16.msra.mxu1 %v1320_v1 }
 0x278   :  { %633 = vmatpush.bf16.msra.mxu2 %v1355_v29 }
 0x27c   :  { %634 = vmatpush.bf16.msra.mxu2 %v1363_v30 }
 0x2ed   :  { %v148_v39 = vpop.f32.mrf.mxu1 }
 0x2ee   :  { %v149_v40 = vadd.f32 %v1389_v38, %v148_v39 }
 0x2f0   :  { %1156 = vtanh.f32 %v149_v40  ;;  %v1099_v48 = vmul.f32 -1.442695, %v149_v40 }
 0x2f2   :  { %v202_v42 = vpop.f32.mrf.mxu2 }
 0x2f3   :  { %v206_v43 = vadd.f32 %v1100_v41, %v202_v42  ;;  %v1105_v42 = vld [vmem:[%s1588_s0 + $0x10] sm:$0xff] }
 0x2f5   :  { %v150_v44 = vpop.f32.mrf.mxu1  ;;  %1158 = vtanh.f32 %v206_v43  ;;  %v1102_v49 = vmul.f32 -1.442695, %v206_v43 }
 0x2f6   :  { %v1157_v45 = vpop.eup %1156  ;;  %1160 = vpow2.f32 %v1099_v48 }
 0x2f7   :  { %174 = vrot.lane.b32.xlu2 %v1157_v45, %s1278_s1  ;;  %1162 = vpow2.f32 %v1102_v49 }
 0x2fa   :  { %v204_v46 = vpop.f32.mrf.mxu2 }
 0x2fb   :  { %v1159_v47 = vpop.eup %1158 }
 0x2fc   :  { %v1161_v50 = vpop.eup %1160 }
 0x2fd   :  { %v155_v51 = vadd.f32 1.0, %v1161_v50  ;;  %v1163_v52 = vpop.eup %1162 }
 0x2fe   :  { %v210_v53 = vadd.f32 1.0, %v1163_v52 }
 0x2ff   :  { %229 = vrot.lane.b32.xlu2 %v1159_v47, %s1278_s1  ;;  %1164 = vrcp.f32 %v155_v51  ;;  %v167_v62 = vand.u32 2147483648, %v155_v51  ;;  %vm161_vm7 = vweird.f32 %v155_v51  ;;  %v165_v63 = vand.u32 2147483647, %v155_v51 }
 0x300   :  { %1166 = vrcp.f32 %v210_v53  ;;  %v222_v9 = vand.u32 2147483648, %v210_v53  ;;  %vm216_vm11 = vweird.f32 %v210_v53  ;;  %v220_v10 = vand.u32 2147483647, %v210_v53 }
 0x301   :  { %v168_v4 = vor.u32 1.1754944e-38, %v167_v62  ;;  %vm166_vm9 = vcmp.eq.f32.partialorder %v165_v63, 8.507059e+37 }
 0x302   :  { %v223_v12 = vor.u32 1.1754944e-38, %v222_v9  ;;  %vm221_vm13 = vcmp.eq.f32.partialorder %v220_v10, 8.507059e+37 }
 0x305   :  { %v1165_v54 = vpop.eup %1164 }
 0x306   :  { %v157_v55 = vmul.f32 %v1165_v54, %v155_v51  ;;  %v1167_v57 = vpop.eup %1166  ;;  %vm162_vm6 = vweird.f32 %v1165_v54 }
 0x307   :  { %v212_v59 = vmul.f32 %v1167_v57, %v210_v53  ;;  %vm163_vm8 = vmor %vm161_vm7, %vm162_vm6  ;;  %vm217_vm10 = vweird.f32 %v1167_v57 }
 0x308   :  { %v158_v56 = vsub.f32 1.0, %v157_v55  ;;  %vm218_vm12 = vmor %vm216_vm11, %vm217_vm10 }
 0x309   :  { %v213_v61 = vsub.f32 1.0, %v212_v59 }
 0x30a   :  { %v159_v58 = vmul.f32 %v1165_v54, %v158_v56 }
 0x30b   :  { %v214_v3 = vmul.f32 %v1167_v57, %v213_v61 }
 0x30c   :  { %v160_v60 = vadd.f32 %v1165_v54, %v159_v58 }
 0x30d   :  { %v215_v8 = vadd.f32 %v1167_v57, %v214_v3 }
 0x30e   :  { %v164_v2 = vsel %vm163_vm8, %v1165_v54, %v160_v60 }
 0x30f   :  { %v169_v6 = vsel %vm166_vm9, %v168_v4, %v164_v2  ;;  %v219_v11 = vsel %vm218_vm12, %v1167_v57, %v215_v8 }
 0x310   :  { %v224_v13 = vsel %vm221_vm13, %v223_v12, %v219_v11  ;;  %v172_v16 = vmul.f32 0.0, %v169_v6 }
 0x311   :  { %v227_v19 = vmul.f32 %v224_v13, %v1334_v25 }
 0x351   :  { %v175_v5 = vpop.permute.xlu2 %174 }
 0x352   :  { %v177_v7 = vmul.f32 %v175_v5, %v169_v6 }
 0x354   :  { %179 = vrot.lane.b32.xlu0 %v177_v7, %s1279_s24 }
 0x359   :  { %v230_v14 = vpop.permute.xlu2 %229 }
 0x35a   :  { %v232_v15 = vmul.f32 %v230_v14, %v224_v13 }
 0x35c   :  { %234 = vrot.lane.b32.xlu1 %v232_v15, %s1279_s24 }
 0x3c6   :  { %v180_v17 = vpop.permute.xlu0 %179 }
 0x3c7   :  { %v1399_v18 = vadd.f32 %v180_v17, %v172_v16 }
 0x3c9   :  { %1168 = vtanh.f32 %v1399_v18 }
 0x3ce   :  { %v235_v20 = vpop.permute.xlu1 %234 }
 0x3cf   :  { %v1169_v21 = vpop.eup %1168  ;;  %v1403_v22 = vadd.f32 %v235_v20, %v227_v19 }
 0x3d0   :  { %185 = vrot.lane.b32.xlu2 %v1169_v21, %s1278_s1 }
 0x3d1   :  { %1170 = vtanh.f32 %v1403_v22 }
 0x3d7   :  { %v1171_v23 = vpop.eup %1170 }
 0x3d8   :  { %240 = vrot.lane.b32.xlu0 %v1171_v23, %s1278_s1 }
 0x42a   :  { %v186_v24 = vpop.permute.xlu2 %185 }
 0x42b   :  { %v188_v26 = vmul.f32 %v186_v24, %v169_v6 }
 0x42d   :  { %v245_v31 = vpack.c.bf16 %v188_v26, %v188_v26 }
 0x42f   :  { %v252_v32 = vunpack.c.l.b16 %v245_v31 }
 0x431   :  { %v253_v33 = vpack.c.b16 %v252_v32, %v252_v32 }
 0x433   :  { %254 = vrot.lane.b32.xlu2 %v253_v33, %s1278_s1 }
 0x44a   :  { %v241_v34 = vpop.permute.xlu0 %240 }
 0x44b   :  { %v243_v25 = vmul.f32 %v241_v34, %v224_v13 }
 0x44d   :  { %v244_v35 = vpack.c.bf16 %v243_v25, %v243_v25 }
 0x44f   :  { %v247_v36 = vunpack.c.l.b16 %v244_v35 }
 0x451   :  { %v248_v37 = vpack.c.b16 %v247_v36, %v247_v36 }
 0x453   :  { %249 = vrot.lane.b32.xlu1 %v248_v37, %s1279_s24 }
 0x48d   :  { %v255_v39 = vpop.permute.xlu2 %254 }
 0x4c5   :  { %v250_v40 = vpop.permute.xlu1 %249 }
 0x4c6   :  { %1106 = vmatmul.msk.bf16.vlgmr.msrb.gmra.mxu0 %vm37_vm4, %v250_v40  ;;  %v258_v41 = vsel %vm37_vm4, %v250_v40, %v255_v39 }
 0x4c7   :  { %1103 = vmatmul.msk.bf16.vlgmr.msra.gmra.mxu3 %vm136_vm5, %v258_v41  ;;  %809 = vmatpush.bf16.msrb.mxu0 %v1314_v0 }
 0x4c8   :  { %753 = vmatpush.bf16.msra.mxu3 %v1341_v27 }
 0x4cb   :  { %810 = vmatpush.bf16.msrb.mxu0 %v1320_v1 }
 0x4cc   :  { %754 = vmatpush.bf16.msra.mxu3 %v1347_v28 }
 0x4d0   :  { %755 = vmatpush.bf16.msra.mxu3 %v1355_v29 }
 0x4d4   :  { %756 = vmatpush.bf16.msra.mxu3 %v1363_v30 }
 0x543   :  { %v324_v43 = vpop.f32.mrf.mxu0 }
 0x544   :  { %v328_v44 = vadd.f32 %v1105_v42, %v324_v43 }
 0x546   :  { %1172 = vtanh.f32 %v328_v44  ;;  %v1107_v51 = vmul.f32 -1.442695, %v328_v44 }
 0x54a   :  { %v270_v45 = vpop.f32.mrf.mxu3 }
 0x54b   :  { %v271_v46 = vadd.f32 %v1389_v38, %v270_v45  ;;  %v326_v47 = vpop.f32.mrf.mxu0  ;;  %v1110_v45 = vld [vmem:[%s1588_s0 + $0x18] sm:$0xff] }
 0x54c   :  { %v1173_v48 = vpop.eup %1172 }
 0x54d   :  { %1174 = vtanh.f32 %v271_v46  ;;  %351 = vrot.lane.b32.xlu1 %v1173_v48, %s1278_s1  ;;  %v1104_v52 = vmul.f32 -1.442695, %v271_v46 }
 0x54e   :  { %1176 = vpow2.f32 %v1107_v51 }
 0x54f   :  { %1178 = vpow2.f32 %v1104_v52 }
 0x552   :  { %v272_v49 = vpop.f32.mrf.mxu3 }
 0x553   :  { %v1175_v50 = vpop.eup %1174 }
 0x554   :  { %296 = vrot.lane.b32.xlu0 %v1175_v50, %s1278_s1  ;;  %v1177_v53 = vpop.eup %1176 }
 0x555   :  { %v332_v54 = vadd.f32 1.0, %v1177_v53  ;;  %v1179_v55 = vpop.eup %1178 }
 0x556   :  { %v277_v56 = vadd.f32 1.0, %v1179_v55 }
 0x557   :  { %1180 = vrcp.f32 %v332_v54  ;;  %v344_v3 = vand.u32 2147483648, %v332_v54  ;;  %vm338_vm15 = vweird.f32 %v332_v54  ;;  %v342_v4 = vand.u32 2147483647, %v332_v54 }
 0x558   :  { %1182 = vrcp.f32 %v277_v56  ;;  %v289_v12 = vand.u32 2147483648, %v277_v56  ;;  %vm283_vm3 = vweird.f32 %v277_v56  ;;  %v287_v13 = vand.u32 2147483647, %v277_v56 }
 0x559   :  { %v345_v7 = vor.u32 1.1754944e-38, %v344_v3  ;;  %vm343_vm1 = vcmp.eq.f32.partialorder %v342_v4, 8.507059e+37 }
 0x55a   :  { %v290_v15 = vor.u32 1.1754944e-38, %v289_v12  ;;  %vm288_vm7 = vcmp.eq.f32.partialorder %v287_v13, 8.507059e+37 }
 0x55d   :  { %v1181_v57 = vpop.eup %1180 }
 0x55e   :  { %v334_v58 = vmul.f32 %v1181_v57, %v332_v54  ;;  %v1183_v59 = vpop.eup %1182  ;;  %vm339_vm14 = vweird.f32 %v1181_v57 }
 0x55f   :  { %v279_v61 = vmul.f32 %v1183_v59, %v277_v56  ;;  %vm340_vm0 = vmor %vm338_vm15, %vm339_vm14  ;;  %vm284_vm2 = vweird.f32 %v1183_v59 }
 0x560   :  { %v335_v60 = vsub.f32 1.0, %v334_v58  ;;  %vm285_vm6 = vmor %vm283_vm3, %vm284_vm2 }
 0x561   :  { %v280_v63 = vsub.f32 1.0, %v279_v61 }
 0x562   :  { %v336_v62 = vmul.f32 %v1181_v57, %v335_v60 }
 0x563   :  { %v281_v5 = vmul.f32 %v1183_v59, %v280_v63 }
 0x564   :  { %v337_v2 = vadd.f32 %v1181_v57, %v336_v62 }
 0x565   :  { %v282_v10 = vadd.f32 %v1183_v59, %v281_v5 }
 0x566   :  { %v341_v6 = vsel %vm340_vm0, %v1181_v57, %v337_v2 }
 0x567   :  { %v346_v9 = vsel %vm343_vm1, %v345_v7, %v341_v6  ;;  %v286_v14 = vsel %vm285_vm6, %v1183_v59, %v282_v10 }
 0x568   :  { %v291_v17 = vsel %vm288_vm7, %v290_v15, %v286_v14  ;;  %v349_v26 = vmul.f32 %v346_v9, %v1403_v22 }
 0x569   :  { %v294_v20 = vmul.f32 %v291_v17, %v1399_v18 }
 0x5bf   :  { %v352_v8 = vpop.permute.xlu1 %351 }
 0x5c0   :  { %v354_v11 = vmul.f32 %v352_v8, %v346_v9 }
 0x5c2   :  { %356 = vrot.lane.b32.xlu0 %v354_v11, %s1279_s24 }
 0x5c6   :  { %v297_v16 = vpop.permute.xlu0 %296 }
 0x5c7   :  { %v299_v19 = vmul.f32 %v297_v16, %v291_v17 }
 0x5c9   :  { %301 = vrot.lane.b32.xlu2 %v299_v19, %s1279_s24 }
 0x623   :  { %v302_v21 = vpop.permute.xlu2 %301 }
 0x624   :  { %v1428_v23 = vadd.f32 %v302_v21, %v294_v20 }
 0x626   :  { %1184 = vtanh.f32 %v1428_v23 }
 0x62c   :  { %v1185_v24 = vpop.eup %1184 }
 0x62d   :  { %307 = vrot.lane.b32.xlu1 %v1185_v24, %s1278_s1 }
 0x634   :  { %v357_v31 = vpop.permute.xlu0 %356 }
 0x635   :  { %v1433_v32 = vadd.f32 %v357_v31, %v349_v26 }
 0x637   :  { %1186 = vtanh.f32 %v1433_v32 }
 0x63d   :  { %v1187_v33 = vpop.eup %1186 }
 0x63e   :  { %362 = vrot.lane.b32.xlu2 %v1187_v33, %s1278_s1 }
 0x698   :  { %v363_v34 = vpop.permute.xlu2 %362 }
 0x699   :  { %v365_v18 = vmul.f32 %v363_v34, %v346_v9 }
 0x69b   :  { %v366_v25 = vpack.c.bf16 %v365_v18, %v365_v18 }
 0x69d   :  { %v369_v35 = vunpack.c.l.b16 %v366_v25 }
 0x69f   :  { %v370_v36 = vpack.c.b16 %v369_v35, %v369_v35  ;;  %v308_v37 = vpop.permute.xlu1 %307 }
 0x6a0   :  { %v310_v39 = vmul.f32 %v308_v37, %v291_v17 }
 0x6a1   :  { %371 = vrot.lane.b32.xlu0 %v370_v36, %s1279_s24 }
 0x6a2   :  { %v367_v40 = vpack.c.bf16 %v310_v39, %v310_v39 }
 0x6a4   :  { %v374_v41 = vunpack.c.l.b16 %v367_v40 }
 0x6a6   :  { %v375_v22 = vpack.c.b16 %v374_v41, %v374_v41 }
 0x6a8   :  { %376 = vrot.lane.b32.xlu1 %v375_v22, %s1278_s1 }
 0x713   :  { %v372_v42 = vpop.permute.xlu0 %371 }
 0x714   :  { %1111 = vmatmul.msk.bf16.vlgmr.msrb.gmra.mxu1 %vm37_vm4, %v372_v42 }
 0x715   :  { %931 = vmatpush.bf16.msrb.mxu1 %v1314_v0 }
 0x719   :  { %932 = vmatpush.bf16.msrb.mxu1 %v1320_v1 }
 0x71a   :  { %v377_v43 = vpop.permute.xlu1 %376 }
 0x71b   :  { %v380_v44 = vsel %vm37_vm4, %v372_v42, %v377_v43 }
 0x71c   :  { %1108 = vmatmul.msk.bf16.vlgmr.msrb.gmra.mxu2 %vm136_vm5, %v380_v44 }
 0x71d   :  { %875 = vmatpush.bf16.msrb.mxu2 %v1341_v27 }
 0x721   :  { %876 = vmatpush.bf16.msrb.mxu2 %v1347_v28 }
 0x725   :  { %877 = vmatpush.bf16.msrb.mxu2 %v1355_v29 }
 0x729   :  { %878 = vmatpush.bf16.msrb.mxu2 %v1363_v30 }
 0x791   :  { %v446_v0 = vpop.f32.mrf.mxu1 }
 0x792   :  { %v450_v46 = vadd.f32 %v1110_v45, %v446_v0  ;;  %v1115_v0 = vld [vmem:[%s1588_s0 + $0x20] sm:$0xff] }
 0x794   :  { %1188 = vtanh.f32 %v450_v46  ;;  %v1112_v54 = vmul.f32 -1.442695, %v450_v46 }
 0x799   :  { %v448_v1 = vpop.f32.mrf.mxu1 }
 0x79a   :  { %v1189_v47 = vpop.eup %1188 }
 0x79b   :  { %473 = vrot.lane.b32.xlu0 %v1189_v47, %s1278_s1 }
 0x79f   :  { %v392_v48 = vpop.f32.mrf.mxu2 }
 0x7a0   :  { %v393_v49 = vadd.f32 %v1389_v38, %v392_v48 }
 0x7a2   :  { %1190 = vtanh.f32 %v393_v49  ;;  %v1109_v52 = vmul.f32 -1.442695, %v393_v49 }
 0x7a4   :  { %1192 = vpow2.f32 %v1109_v52 }
 0x7a5   :  { %1194 = vpow2.f32 %v1112_v54 }
 0x7a7   :  { %v394_v50 = vpop.f32.mrf.mxu2 }
 0x7a8   :  { %v1191_v51 = vpop.eup %1190 }
 0x7a9   :  { %418 = vrot.lane.b32.xlu2 %v1191_v51, %s1278_s1 }
 0x7aa   :  { %v1193_v53 = vpop.eup %1192 }
 0x7ab   :  { %v399_v55 = vadd.f32 1.0, %v1193_v53  ;;  %v1195_v56 = vpop.eup %1194 }
 0x7ac   :  { %v454_v58 = vadd.f32 1.0, %v1195_v56 }
 0x7ad   :  { %1196 = vrcp.f32 %v399_v55  ;;  %v411_v3 = vand.u32 2147483648, %v399_v55  ;;  %vm405_vm9 = vweird.f32 %v399_v55  ;;  %v409_v4 = vand.u32 2147483647, %v399_v55 }
 0x7ae   :  { %1198 = vrcp.f32 %v454_v58  ;;  %v466_v13 = vand.u32 2147483648, %v454_v58  ;;  %vm460_vm13 = vweird.f32 %v454_v58  ;;  %v464_v14 = vand.u32 2147483647, %v454_v58 }
 0x7af   :  { %v412_v7 = vor.u32 1.1754944e-38, %v411_v3  ;;  %vm410_vm11 = vcmp.eq.f32.partialorder %v409_v4, 8.507059e+37 }
 0x7b0   :  { %v467_v16 = vor.u32 1.1754944e-38, %v466_v13  ;;  %vm465_vm15 = vcmp.eq.f32.partialorder %v464_v14, 8.507059e+37 }
 0x7b3   :  { %v1197_v57 = vpop.eup %1196 }
 0x7b4   :  { %v401_v59 = vmul.f32 %v1197_v57, %v399_v55  ;;  %v1199_v61 = vpop.eup %1198  ;;  %vm406_vm8 = vweird.f32 %v1197_v57 }
 0x7b5   :  { %v456_v63 = vmul.f32 %v1199_v61, %v454_v58  ;;  %vm407_vm10 = vmor %vm405_vm9, %vm406_vm8  ;;  %vm461_vm12 = vweird.f32 %v1199_v61 }
 0x7b6   :  { %v402_v60 = vsub.f32 1.0, %v401_v59  ;;  %vm462_vm14 = vmor %vm460_vm13, %vm461_vm12 }
 0x7b7   :  { %v457_v5 = vsub.f32 1.0, %v456_v63 }
 0x7b8   :  { %v403_v62 = vmul.f32 %v1197_v57, %v402_v60 }
 0x7b9   :  { %v458_v8 = vmul.f32 %v1199_v61, %v457_v5 }
 0x7ba   :  { %v404_v2 = vadd.f32 %v1197_v57, %v403_v62 }
 0x7bb   :  { %v459_v12 = vadd.f32 %v1199_v61, %v458_v8 }
 0x7bc   :  { %v408_v6 = vsel %vm407_vm10, %v1197_v57, %v404_v2 }
 0x7bd   :  { %v413_v10 = vsel %vm410_vm11, %v412_v7, %v408_v6  ;;  %v463_v15 = vsel %vm462_vm14, %v1199_v61, %v459_v12 }
 0x7be   :  { %v468_v19 = vsel %vm465_vm15, %v467_v16, %v463_v15  ;;  %v416_v33 = vmul.f32 %v413_v10, %v1428_v23 }
 0x7bf   :  { %v471_v21 = vmul.f32 %v468_v19, %v1433_v32 }
 0x803   :  { %v419_v9 = vpop.permute.xlu2 %418 }
 0x804   :  { %v421_v11 = vmul.f32 %v419_v9, %v413_v10 }
 0x806   :  { %423 = vrot.lane.b32.xlu1 %v421_v11, %s1279_s24 }
 0x80d   :  { %v474_v17 = vpop.permute.xlu0 %473 }
 0x80e   :  { %v476_v20 = vmul.f32 %v474_v17, %v468_v19 }
 0x810   :  { %478 = vrot.lane.b32.xlu2 %v476_v20, %s1279_s24 }
 0x86a   :  { %v479_v24 = vpop.permute.xlu2 %478 }
 0x86b   :  { %v1457_v26 = vadd.f32 %v479_v24, %v471_v21 }
 0x86d   :  { %1200 = vtanh.f32 %v1457_v26 }
 0x873   :  { %v1201_v31 = vpop.eup %1200 }
 0x874   :  { %484 = vrot.lane.b32.xlu1 %v1201_v31, %s1278_s1 }
 0x878   :  { %v424_v34 = vpop.permute.xlu1 %423 }
 0x879   :  { %v1462_v18 = vadd.f32 %v424_v34, %v416_v33 }
 0x87b   :  { %1202 = vtanh.f32 %v1462_v18 }
 0x881   :  { %v1203_v25 = vpop.eup %1202 }
 0x882   :  { %429 = vrot.lane.b32.xlu0 %v1203_v25, %s1278_s1 }
 0x8e6   :  { %v485_v35 = vpop.permute.xlu1 %484 }
 0x8e7   :  { %v487_v32 = vmul.f32 %v485_v35, %v468_v19 }
 0x8e9   :  { %v488_v36 = vpack.c.bf16 %v487_v32, %v487_v32 }
 0x8eb   :  { %v491_v37 = vunpack.c.l.b16 %v488_v36 }
 0x8ed   :  { %v492_v39 = vpack.c.b16 %v491_v37, %v491_v37 }
 0x8ef   :  { %493 = vrot.lane.b32.xlu2 %v492_v39, %s1279_s24 }
 0x8f4   :  { %v430_v40 = vpop.permute.xlu0 %429 }
 0x8f5   :  { %v432_v41 = vmul.f32 %v430_v40, %v413_v10 }
 0x8f7   :  { %v489_v22 = vpack.c.bf16 %v432_v41, %v432_v41 }
 0x8f9   :  { %v496_v42 = vunpack.c.l.b16 %v489_v22 }
 0x8fb   :  { %v497_v23 = vpack.c.b16 %v496_v42, %v496_v42 }
 0x8fd   :  { %498 = vrot.lane.b32.xlu0 %v497_v23, %s1278_s1 }
 0x949   :  { %v494_v43 = vpop.permute.xlu2 %493 }
 0x94a   :  { %1116 = vmatmul.msk.bf16.vlgmr.msra.gmra.mxu0 %vm37_vm4, %v494_v43 }
 0x96f   :  { %v499_v44 = vpop.permute.xlu0 %498 }
 0x970   :  { %v502_v45 = vsel %vm37_vm4, %v494_v43, %v499_v44  ;;  %v1120_v43 = vld [vmem:[%s1588_s0 + $0x28] sm:$0xff] }
 0x971   :  { %1113 = vmatmul.msk.bf16.vlgmr.msrb.gmra.mxu3 %vm136_vm5, %v502_v45 }
 0x972   :  { %997 = vmatpush.bf16.msrb.mxu3 %v1341_v27 }
 0x976   :  { %998 = vmatpush.bf16.msrb.mxu3 %v1347_v28 }
 0x97a   :  { %999 = vmatpush.bf16.msrb.mxu3 %v1355_v29 }
 0x97e   :  { %1000 = vmatpush.bf16.msrb.mxu3 %v1363_v30 }
 0x9c7   :  { %v568_v46 = vpop.f32.mrf.mxu0 }
 0x9c8   :  { %v572_v1 = vadd.f32 %v1115_v0, %v568_v46 }
 0x9ca   :  { %1204 = vtanh.f32 %v572_v1  ;;  %v1117_v29 = vmul.f32 -1.442695, %v572_v1 }
 0x9cf   :  { %v570_v47 = vpop.f32.mrf.mxu0 }
 0x9d0   :  { %v1205_v48 = vpop.eup %1204 }
 0x9d1   :  { %595 = vrot.lane.b32.xlu2 %v1205_v48, %s1278_s1 }
 0x9f4   :  { %v514_v49 = vpop.f32.mrf.mxu3 }
 0x9f5   :  { %v515_v27 = vadd.f32 %v1389_v38, %v514_v49 }
 0x9f7   :  { %1206 = vtanh.f32 %v515_v27  ;;  %v1114_v2 = vmul.f32 -1.442695, %v515_v27 }
 0x9f8   :  { %1208 = vpow2.f32 %v1117_v29 }
 0x9fc   :  { %v516_v28 = vpop.f32.mrf.mxu3 }
 0x9fd   :  { %v1207_v50 = vpop.eup %1206 }
 0x9fe   :  { %540 = vrot.lane.b32.xlu1 %v1207_v50, %s1278_s1  ;;  %v1209_v30 = vpop.eup %1208 }
 0x9ff   :  { %v576_v51 = vadd.f32 1.0, %v1209_v30 }
 0xa01   :  { %1210 = vrcp.f32 %v576_v51  ;;  %v588_v57 = vand.u32 2147483648, %v576_v51  ;;  %vm582_vm1 = vweird.f32 %v576_v51  ;;  %v586_v58 = vand.u32 2147483647, %v576_v51 }
 0xa02   :  { %1212 = vpow2.f32 %v1114_v2 }
 0xa03   :  { %v589_v60 = vor.u32 1.1754944e-38, %v588_v57  ;;  %vm587_vm3 = vcmp.eq.f32.partialorder %v586_v58, 8.507059e+37 }
 0xa07   :  { %v1211_v52 = vpop.eup %1210 }
 0xa08   :  { %v578_v53 = vmul.f32 %v1211_v52, %v576_v51  ;;  %vm583_vm0 = vweird.f32 %v1211_v52  ;;  %v1213_v3 = vpop.eup %1212 }
 0xa09   :  { %vm584_vm2 = vmor %vm582_vm1, %vm583_vm0  ;;  %v521_v4 = vadd.f32 1.0, %v1213_v3 }
 0xa0a   :  { %v579_v54 = vsub.f32 1.0, %v578_v53 }
 0xa0b   :  { %1214 = vrcp.f32 %v521_v4  ;;  %v533_v10 = vand.u32 2147483648, %v521_v4  ;;  %vm527_vm7 = vweird.f32 %v521_v4  ;;  %v531_v11 = vand.u32 2147483647, %v521_v4 }
 0xa0c   :  { %v580_v55 = vmul.f32 %v1211_v52, %v579_v54 }
 0xa0d   :  { %v534_v13 = vor.u32 1.1754944e-38, %v533_v10  ;;  %vm532_vm9 = vcmp.eq.f32.partialorder %v531_v11, 8.507059e+37 }
 0xa0e   :  { %v581_v56 = vadd.f32 %v1211_v52, %v580_v55 }
 0xa10   :  { %v585_v59 = vsel %vm584_vm2, %v1211_v52, %v581_v56 }
 0xa11   :  { %v590_v62 = vsel %vm587_vm3, %v589_v60, %v585_v59  ;;  %v1215_v5 = vpop.eup %1214 }
 0xa12   :  { %v523_v6 = vmul.f32 %v1215_v5, %v521_v4  ;;  %vm528_vm6 = vweird.f32 %v1215_v5  ;;  %v593_v17 = vmul.f32 %v590_v62, %v1457_v26 }
 0xa13   :  { %vm529_vm8 = vmor %vm527_vm7, %vm528_vm6 }
 0xa14   :  { %v524_v7 = vsub.f32 1.0, %v523_v6 }
 0xa16   :  { %v525_v8 = vmul.f32 %v1215_v5, %v524_v7 }
 0xa18   :  { %v526_v9 = vadd.f32 %v1215_v5, %v525_v8 }
 0xa1a   :  { %v530_v12 = vsel %vm529_vm8, %v1215_v5, %v526_v9 }
 0xa1b   :  { %v535_v15 = vsel %vm532_vm9, %v534_v13, %v530_v12 }
 0xa1c   :  { %v538_v24 = vmul.f32 %v535_v15, %v1462_v18 }
 0xa2b   :  { %v596_v61 = vpop.permute.xlu2 %595 }
 0xa2c   :  { %v598_v63 = vmul.f32 %v596_v61, %v590_v62 }
 0xa2e   :  { %600 = vrot.lane.b32.xlu1 %v598_v63, %s1279_s24 }
 0xa70   :  { %v541_v14 = vpop.permute.xlu1 %540 }
 0xa71   :  { %v543_v16 = vmul.f32 %v541_v14, %v535_v15 }
 0xa73   :  { %545 = vrot.lane.b32.xlu0 %v543_v16, %s1279_s24 }
 0xaa0   :  { %v601_v19 = vpop.permute.xlu1 %600 }
 0xaa1   :  { %v1484_v20 = vadd.f32 %v601_v19, %v593_v17 }
 0xaa3   :  { %1216 = vtanh.f32 %v1484_v20 }
 0xaa9   :  { %v1217_v21 = vpop.eup %1216 }
 0xaaa   :  { %606 = vrot.lane.b32.xlu0 %v1217_v21, %s1278_s1 }
 0xae5   :  { %v546_v31 = vpop.permute.xlu0 %545 }
 0xae6   :  { %v1489_v33 = vadd.f32 %v546_v31, %v538_v24 }
 0xae8   :  { %1218 = vtanh.f32 %v1489_v33 }
 0xaee   :  { %v1219_v34 = vpop.eup %1218 }
 0xaef   :  { %551 = vrot.lane.b32.xlu2 %v1219_v34, %s1278_s1 }
 0xb1c   :  { %v607_v25 = vpop.permute.xlu0 %606 }
 0xb1d   :  { %v609_v26 = vmul.f32 %v607_v25, %v590_v62 }
 0xb1f   :  { %v610_v35 = vpack.c.bf16 %v609_v26, %v609_v26 }
 0xb21   :  { %v613_v32 = vunpack.c.l.b16 %v610_v35 }
 0xb23   :  { %v614_v36 = vpack.c.b16 %v613_v32, %v613_v32 }
 0xb25   :  { %615 = vrot.lane.b32.xlu1 %v614_v36, %s1279_s24 }
 0xb49   :  { %v552_v37 = vpop.permute.xlu2 %551 }
 0xb4a   :  { %v554_v39 = vmul.f32 %v552_v37, %v535_v15 }
 0xb4c   :  { %v611_v40 = vpack.c.bf16 %v554_v39, %v554_v39 }
 0xb4e   :  { %v618_v41 = vunpack.c.l.b16 %v611_v40 }
 0xb50   :  { %v619_v18 = vpack.c.b16 %v618_v41, %v618_v41 }
 0xb52   :  { %620 = vrot.lane.b32.xlu2 %v619_v18, %s1278_s1 }
 0xb97   :  { %v616_v22 = vpop.permute.xlu1 %615 }
 0xb98   :  { %1121 = vmatmul.msk.bf16.vlgmr.msra.gmra.mxu1 %vm37_vm4, %v616_v22 }
 0xbac   :  { %v621_v42 = vpop.permute.xlu2 %620 }
 0xbad   :  { %v624_v23 = vsel %vm37_vm4, %v616_v22, %v621_v42  ;;  %v1125_v22 = vld [vmem:[%s1588_s0 + $0x30] sm:$0xff] }
 0xbae   :  { %1118 = vmatmul.msk.bf16.vlgmr.msra.gmra.mxu2 %vm136_vm5, %v624_v23 }
 0xc15   :  { %v690_v44 = vpop.f32.mrf.mxu1 }
 0xc16   :  { %v694_v45 = vadd.f32 %v1120_v43, %v690_v44 }
 0xc18   :  { %1220 = vtanh.f32 %v694_v45  ;;  %v1122_v27 = vmul.f32 -1.442695, %v694_v45 }
 0xc1d   :  { %v692_v0 = vpop.f32.mrf.mxu1 }
 0xc1e   :  { %v1221_v46 = vpop.eup %1220 }
 0xc1f   :  { %717 = vrot.lane.b32.xlu1 %v1221_v46, %s1278_s1 }
 0xc31   :  { %v636_v1 = vpop.f32.mrf.mxu2 }
 0xc32   :  { %v637_v47 = vadd.f32 %v1389_v38, %v636_v1 }
 0xc34   :  { %1222 = vtanh.f32 %v637_v47  ;;  %v1119_v51 = vmul.f32 -1.442695, %v637_v47 }
 0xc35   :  { %1224 = vpow2.f32 %v1122_v27 }
 0xc39   :  { %v638_v48 = vpop.f32.mrf.mxu2 }
 0xc3a   :  { %v1223_v49 = vpop.eup %1222 }
 0xc3b   :  { %662 = vrot.lane.b32.xlu0 %v1223_v49, %s1278_s1  ;;  %v1225_v28 = vpop.eup %1224 }
 0xc3c   :  { %v698_v50 = vadd.f32 1.0, %v1225_v28 }
 0xc3e   :  { %1226 = vrcp.f32 %v698_v50  ;;  %v710_v56 = vand.u32 2147483648, %v698_v50  ;;  %vm704_vm11 = vweird.f32 %v698_v50  ;;  %v708_v57 = vand.u32 2147483647, %v698_v50 }
 0xc3f   :  { %1228 = vpow2.f32 %v1119_v51 }
 0xc40   :  { %v711_v60 = vor.u32 1.1754944e-38, %v710_v56  ;;  %vm709_vm13 = vcmp.eq.f32.partialorder %v708_v57, 8.507059e+37 }
 0xc44   :  { %v1227_v29 = vpop.eup %1226 }
 0xc45   :  { %v700_v30 = vmul.f32 %v1227_v29, %v698_v50  ;;  %v1229_v54 = vpop.eup %1228  ;;  %vm705_vm10 = vweird.f32 %v1227_v29 }
 0xc46   :  { %v643_v58 = vadd.f32 1.0, %v1229_v54  ;;  %vm706_vm12 = vmor %vm704_vm11, %vm705_vm10 }
 0xc47   :  { %v701_v52 = vsub.f32 1.0, %v700_v30 }
 0xc48   :  { %1230 = vrcp.f32 %v643_v58  ;;  %v655_v7 = vand.u32 2147483648, %v643_v58  ;;  %vm649_vm15 = vweird.f32 %v643_v58  ;;  %v653_v8 = vand.u32 2147483647, %v643_v58 }
 0xc49   :  { %v702_v53 = vmul.f32 %v1227_v29, %v701_v52 }
 0xc4a   :  { %v656_v10 = vor.u32 1.1754944e-38, %v655_v7  ;;  %vm654_vm1 = vcmp.eq.f32.partialorder %v653_v8, 8.507059e+37 }
 0xc4b   :  { %v703_v55 = vadd.f32 %v1227_v29, %v702_v53 }
 0xc4d   :  { %v707_v59 = vsel %vm706_vm12, %v1227_v29, %v703_v55 }
 0xc4e   :  { %v712_v62 = vsel %vm709_vm13, %v711_v60, %v707_v59  ;;  %v1231_v2 = vpop.eup %1230 }
 0xc4f   :  { %v645_v3 = vmul.f32 %v1231_v2, %v643_v58  ;;  %vm650_vm14 = vweird.f32 %v1231_v2  ;;  %v715_v14 = vmul.f32 %v712_v62, %v1484_v20 }
 0xc50   :  { %vm651_vm0 = vmor %vm649_vm15, %vm650_vm14 }
 0xc51   :  { %v646_v4 = vsub.f32 1.0, %v645_v3 }
 0xc53   :  { %v647_v5 = vmul.f32 %v1231_v2, %v646_v4 }
 0xc55   :  { %v648_v6 = vadd.f32 %v1231_v2, %v647_v5 }
 0xc57   :  { %v652_v9 = vsel %vm651_vm0, %v1231_v2, %v648_v6 }
 0xc58   :  { %v657_v12 = vsel %vm654_vm1, %v656_v10, %v652_v9 }
 0xc59   :  { %v660_v17 = vmul.f32 %v657_v12, %v1489_v33 }
 0xc91   :  { %v718_v61 = vpop.permute.xlu1 %717 }
 0xc92   :  { %v720_v63 = vmul.f32 %v718_v61, %v712_v62 }
 0xc94   :  { %722 = vrot.lane.b32.xlu0 %v720_v63, %s1279_s24 }
 0xcad   :  { %v663_v11 = vpop.permute.xlu0 %662 }
 0xcae   :  { %v665_v13 = vmul.f32 %v663_v11, %v657_v12 }
 0xcb0   :  { %667 = vrot.lane.b32.xlu2 %v665_v13, %s1279_s24 }
 0xd06   :  { %v723_v15 = vpop.permute.xlu0 %722 }
 0xd07   :  { %v1507_v16 = vadd.f32 %v723_v15, %v715_v14 }
 0xd09   :  { %1232 = vtanh.f32 %v1507_v16 }
 0xd0a   :  { %v668_v19 = vpop.permute.xlu2 %667 }
 0xd0b   :  { %v1511_v21 = vadd.f32 %v668_v19, %v660_v17 }
 0xd0d   :  { %1234 = vtanh.f32 %v1511_v21 }
 0xd0f   :  { %v1233_v24 = vpop.eup %1232 }
 0xd10   :  { %728 = vrot.lane.b32.xlu2 %v1233_v24, %s1278_s1 }
 0xd13   :  { %v1235_v31 = vpop.eup %1234 }
 0xd14   :  { %673 = vrot.lane.b32.xlu1 %v1235_v31, %s1278_s1 }
 0xd6a   :  { %v729_v34 = vpop.permute.xlu2 %728 }
 0xd6b   :  { %v731_v20 = vmul.f32 %v729_v34, %v712_v62 }
 0xd6d   :  { %v732_v25 = vpack.c.bf16 %v731_v20, %v731_v20 }
 0xd6f   :  { %v735_v26 = vunpack.c.l.b16 %v732_v25 }
 0xd71   :  { %v736_v35 = vpack.c.b16 %v735_v26, %v735_v26 }
 0xd73   :  { %737 = vrot.lane.b32.xlu0 %v736_v35, %s1279_s24 }
 0xd86   :  { %v674_v32 = vpop.permute.xlu1 %673 }
 0xd87   :  { %v676_v33 = vmul.f32 %v674_v32, %v657_v12 }
 0xd89   :  { %v733_v36 = vpack.c.bf16 %v676_v33, %v676_v33 }
 0xd8b   :  { %v740_v37 = vunpack.c.l.b16 %v733_v36 }
 0xd8d   :  { %v741_v39 = vpack.c.b16 %v740_v37, %v740_v37 }
 0xd8f   :  { %742 = vrot.lane.b32.xlu1 %v741_v39, %s1278_s1  ;;  %v1130_v39 = vld [vmem:[%s1588_s0 + $0x38] sm:$0xff] }
 0xde5   :  { %v738_v40 = vpop.permute.xlu0 %737 }
 0xde6   :  { %1126 = vmatmul.msk.bf16.vlgmr.msrb.gmra.mxu0 %vm37_vm4, %v738_v40 }
 0xe01   :  { %v743_v41 = vpop.permute.xlu1 %742 }
 0xe02   :  { %v746_v18 = vsel %vm37_vm4, %v738_v40, %v743_v41 }
 0xe03   :  { %1123 = vmatmul.msk.bf16.vlgmr.msra.gmra.mxu3 %vm136_vm5, %v746_v18 }
 0xe63   :  { %v812_v42 = vpop.f32.mrf.mxu0 }
 0xe64   :  { %v816_v23 = vadd.f32 %v1125_v22, %v812_v42 }
 0xe66   :  { %1236 = vtanh.f32 %v816_v23  ;;  %v1127_v47 = vmul.f32 -1.442695, %v816_v23 }
 0xe6b   :  { %v814_v43 = vpop.f32.mrf.mxu0 }
 0xe6c   :  { %v1237_v44 = vpop.eup %1236 }
 0xe6d   :  { %839 = vrot.lane.b32.xlu0 %v1237_v44, %s1278_s1  ;;  %v1551_v44 = vld [vmem:[%s1590_s3] ss:$0 sm:$0xff] }
 0xe86   :  { %v758_v45 = vpop.f32.mrf.mxu3 }
 0xe87   :  { %v759_v0 = vadd.f32 %v1389_v38, %v758_v45 }
 0xe89   :  { %1238 = vtanh.f32 %v759_v0  ;;  %v1124_v49 = vmul.f32 -1.442695, %v759_v0 }
 0xe8a   :  { %1240 = vpow2.f32 %v1127_v47 }
 0xe8b   :  { %1242 = vpow2.f32 %v1124_v49 }
 0xe8e   :  { %v760_v46 = vpop.f32.mrf.mxu3 }
 0xe8f   :  { %v1239_v1 = vpop.eup %1238 }
 0xe90   :  { %784 = vrot.lane.b32.xlu2 %v1239_v1, %s1278_s1  ;;  %v1241_v48 = vpop.eup %1240 }
 0xe91   :  { %v820_v27 = vadd.f32 1.0, %v1241_v48  ;;  %v1243_v28 = vpop.eup %1242 }
 0xe92   :  { %v765_v29 = vadd.f32 1.0, %v1243_v28 }
 0xe93   :  { %1244 = vrcp.f32 %v820_v27  ;;  %v832_v55 = vand.u32 2147483648, %v820_v27  ;;  %vm826_vm3 = vweird.f32 %v820_v27  ;;  %v830_v56 = vand.u32 2147483647, %v820_v27 }
 0xe94   :  { %1246 = vrcp.f32 %v765_v29  ;;  %v777_v3 = vand.u32 2147483648, %v765_v29  ;;  %vm771_vm9 = vweird.f32 %v765_v29  ;;  %v775_v4 = vand.u32 2147483647, %v765_v29 }
 0xe95   :  { %v833_v59 = vor.u32 1.1754944e-38, %v832_v55  ;;  %vm831_vm7 = vcmp.eq.f32.partialorder %v830_v56, 8.507059e+37 }
 0xe96   :  { %v778_v6 = vor.u32 1.1754944e-38, %v777_v3  ;;  %vm776_vm11 = vcmp.eq.f32.partialorder %v775_v4, 8.507059e+37 }
 0xe99   :  { %v1245_v50 = vpop.eup %1244 }
 0xe9a   :  { %v822_v30 = vmul.f32 %v1245_v50, %v820_v27  ;;  %v1247_v52 = vpop.eup %1246  ;;  %vm827_vm2 = vweird.f32 %v1245_v50 }
 0xe9b   :  { %v767_v53 = vmul.f32 %v1247_v52, %v765_v29  ;;  %vm828_vm6 = vmor %vm826_vm3, %vm827_vm2  ;;  %vm772_vm8 = vweird.f32 %v1247_v52 }
 0xe9c   :  { %v823_v51 = vsub.f32 1.0, %v822_v30  ;;  %vm773_vm10 = vmor %vm771_vm9, %vm772_vm8 }
 0xe9d   :  { %v768_v57 = vsub.f32 1.0, %v767_v53 }
 0xe9e   :  { %v824_v38 = vmul.f32 %v1245_v50, %v823_v51 }
 0xe9f   :  { %v769_v62 = vmul.f32 %v1247_v52, %v768_v57 }
 0xea0   :  { %v825_v54 = vadd.f32 %v1245_v50, %v824_v38 }
 0xea1   :  { %v770_v2 = vadd.f32 %v1247_v52, %v769_v62 }
 0xea2   :  { %v829_v58 = vsel %vm828_vm6, %v1245_v50, %v825_v54 }
 0xea3   :  { %v834_v61 = vsel %vm831_vm7, %v833_v59, %v829_v58  ;;  %v774_v5 = vsel %vm773_vm10, %v1247_v52, %v770_v2 }
 0xea4   :  { %v779_v8 = vsel %vm776_vm11, %v778_v6, %v774_v5  ;;  %v837_v10 = vmul.f32 %v834_v61, %v1507_v16 }
 0xea5   :  { %v782_v14 = vmul.f32 %v779_v8, %v1511_v21 }
 0xedf   :  { %v840_v60 = vpop.permute.xlu0 %839 }
 0xee0   :  { %v842_v63 = vmul.f32 %v840_v60, %v834_v61 }
 0xee2   :  { %844 = vrot.lane.b32.xlu2 %v842_v63, %s1279_s24 }
 0xeea   :  { %v785_v7 = vpop.permute.xlu2 %784 }
 0xeeb   :  { %v787_v9 = vmul.f32 %v785_v7, %v779_v8 }
 0xeed   :  { %789 = vrot.lane.b32.xlu1 %v787_v9, %s1279_s24 }
 0xf3c   :  { %v845_v11 = vpop.permute.xlu2 %844 }
 0xf3d   :  { %v1530_v12 = vadd.f32 %v845_v11, %v837_v10 }
 0xf3f   :  { %1248 = vtanh.f32 %v1530_v12 }
 0xf45   :  { %v1249_v13 = vpop.eup %1248 }
 0xf46   :  { %850 = vrot.lane.b32.xlu1 %v1249_v13, %s1278_s1 }
 0xf5f   :  { %v790_v15 = vpop.permute.xlu1 %789 }
 0xf60   :  { %v1535_v17 = vadd.f32 %v790_v15, %v782_v14 }
 0xf62   :  { %1250 = vtanh.f32 %v1535_v17 }
 0xf68   :  { %v1251_v19 = vpop.eup %1250 }
 0xf69   :  { %795 = vrot.lane.b32.xlu0 %v1251_v19, %s1278_s1 }
 0xfb8   :  { %v851_v24 = vpop.permute.xlu1 %850 }
 0xfb9   :  { %v853_v16 = vmul.f32 %v851_v24, %v834_v61 }
 0xfbb   :  { %v854_v31 = vpack.c.bf16 %v853_v16, %v853_v16 }
 0xfbd   :  { %v857_v34 = vunpack.c.l.b16 %v854_v31 }
 0xfbf   :  { %v858_v20 = vpack.c.b16 %v857_v34, %v857_v34 }
 0xfc1   :  { %859 = vrot.lane.b32.xlu2 %v858_v20, %s1279_s24 }
 0xfdb   :  { %v796_v25 = vpop.permute.xlu0 %795 }
 0xfdc   :  { %v798_v26 = vmul.f32 %v796_v25, %v779_v8 }
 0xfde   :  { %v855_v35 = vpack.c.bf16 %v798_v26, %v798_v26 }
 0xfe0   :  { %v862_v32 = vunpack.c.l.b16 %v855_v35 }
 0xfe2   :  { %v863_v21 = vpack.c.b16 %v862_v32, %v862_v32 }
 0xfe4   :  { %864 = vrot.lane.b32.xlu0 %v863_v21, %s1278_s1 }
0x101b   :  { %v860_v33 = vpop.permute.xlu2 %859 }
0x101c   :  { %1131 = vmatmul.msk.bf16.vlgmr.msrb.gmra.mxu1 %vm37_vm4, %v860_v33 }
0x1056   :  { %v865_v36 = vpop.permute.xlu0 %864 }
0x1057   :  { %v868_v37 = vsel %vm37_vm4, %v860_v33, %v865_v36 }
0x1058   :  { %1128 = vmatmul.msk.bf16.vlgmr.msrb.gmra.mxu2 %vm136_vm5, %v868_v37 }
0x1099   :  { %v934_v40 = vpop.f32.mrf.mxu1 }
0x109a   :  { %v938_v41 = vadd.f32 %v1130_v39, %v934_v40 }
0x109c   :  { %1252 = vtanh.f32 %v938_v41  ;;  %v1132_v42 = vmul.f32 -1.442695, %v938_v41 }
0x109e   :  { %1254 = vpow2.f32 %v1132_v42 }
0x10a1   :  { %v936_v18 = vpop.f32.mrf.mxu1 }
0x10a2   :  { %v1253_v22 = vpop.eup %1252 }
0x10a3   :  { %961 = vrot.lane.b32.xlu2 %v1253_v22, %s1278_s1 }
0x10a4   :  { %v1255_v23 = vpop.eup %1254 }
0x10a5   :  { %v942_v0 = vadd.f32 1.0, %v1255_v23 }
0x10a7   :  { %v954_v50 = vand.u32 2147483648, %v942_v0  ;;  %vm948_vm13 = vweird.f32 %v942_v0  ;;  %v952_v29 = vand.u32 2147483647, %v942_v0 }
0x10a9   :  { %v955_v51 = vor.u32 1.1754944e-38, %v954_v50  ;;  %vm953_vm15 = vcmp.eq.f32.partialorder %v952_v29, 8.507059e+37 }
0x10db   :  { %v880_v43 = vpop.f32.mrf.mxu2 }
0x10dc   :  { %v881_v45 = vadd.f32 %v1551_v44, %v880_v43 }
0x10de   :  { %1256 = vtanh.f32 %v881_v45  ;;  %v1129_v54 = vmul.f32 -1.442695, %v881_v45 }
0x10df   :  { %1258 = vrcp.f32 %v942_v0 }
0x10e0   :  { %1260 = vpow2.f32 %v1129_v54 }
0x10e3   :  { %v882_v46 = vpop.f32.mrf.mxu2 }
0x10e4   :  { %v1257_v1 = vpop.eup %1256 }
0x10e5   :  { %906 = vrot.lane.b32.xlu1 %v1257_v1, %s1278_s1  ;;  %v1259_v47 = vpop.eup %1258 }
0x10e6   :  { %v944_v48 = vmul.f32 %v1259_v47, %v942_v0  ;;  %vm949_vm12 = vweird.f32 %v1259_v47  ;;  %v1261_v55 = vpop.eup %1260 }
0x10e7   :  { %vm950_vm14 = vmor %vm948_vm13, %vm949_vm12  ;;  %v887_v56 = vadd.f32 1.0, %v1261_v55 }
0x10e8   :  { %v945_v49 = vsub.f32 1.0, %v944_v48 }
0x10e9   :  { %1262 = vrcp.f32 %v887_v56  ;;  %v899_v62 = vand.u32 2147483648, %v887_v56  ;;  %vm893_vm1 = vweird.f32 %v887_v56  ;;  %v897_v63 = vand.u32 2147483647, %v887_v56 }
0x10ea   :  { %v946_v27 = vmul.f32 %v1259_v47, %v945_v49 }
0x10eb   :  { %v900_v3 = vor.u32 1.1754944e-38, %v899_v62  ;;  %vm898_vm3 = vcmp.eq.f32.partialorder %v897_v63, 8.507059e+37 }
0x10ec   :  { %v947_v28 = vadd.f32 %v1259_v47, %v946_v27 }
0x10ee   :  { %v951_v30 = vsel %vm950_vm14, %v1259_v47, %v947_v28 }
0x10ef   :  { %v956_v38 = vsel %vm953_vm15, %v955_v51, %v951_v30  ;;  %v1263_v57 = vpop.eup %1262 }
0x10f0   :  { %v889_v58 = vmul.f32 %v1263_v57, %v887_v56  ;;  %vm894_vm0 = vweird.f32 %v1263_v57  ;;  %v959_v7 = vmul.f32 %v956_v38, %v1530_v12 }
0x10f1   :  { %vm895_vm2 = vmor %vm893_vm1, %vm894_vm0 }
0x10f2   :  { %v890_v59 = vsub.f32 1.0, %v889_v58 }
0x10f4   :  { %v891_v60 = vmul.f32 %v1263_v57, %v890_v59 }
0x10f6   :  { %v892_v61 = vadd.f32 %v1263_v57, %v891_v60 }
0x10f8   :  { %v896_v2 = vsel %vm895_vm2, %v1263_v57, %v892_v61 }
0x10f9   :  { %v901_v5 = vsel %vm898_vm3, %v900_v3, %v896_v2 }
0x10fa   :  { %v904_v11 = vmul.f32 %v901_v5, %v1535_v17 }
0x10fd   :  { %v962_v52 = vpop.permute.xlu2 %961 }
0x10fe   :  { %v964_v53 = vmul.f32 %v962_v52, %v956_v38 }
0x1100   :  { %966 = vrot.lane.b32.xlu1 %v964_v53, %s1279_s24 }
0x1157   :  { %v907_v4 = vpop.permute.xlu1 %906 }
0x1158   :  { %v909_v6 = vmul.f32 %v907_v4, %v901_v5 }
0x115a   :  { %911 = vrot.lane.b32.xlu0 %v909_v6, %s1279_s24 }
0x1172   :  { %v967_v8 = vpop.permute.xlu1 %966 }
0x1173   :  { %v969_v9 = vadd.f32 %v967_v8, %v959_v7 }
0x1175   :  { %1264 = vtanh.f32 %v969_v9 }
0x117b   :  { %v1265_v10 = vpop.eup %1264 }
0x117c   :  { %972 = vrot.lane.b32.xlu0 %v1265_v10, %s1278_s1 }
0x11cc   :  { %v912_v13 = vpop.permute.xlu0 %911 }
0x11cd   :  { %v914_v14 = vadd.f32 %v912_v13, %v904_v11 }
0x11cf   :  { %1266 = vtanh.f32 %v914_v14 }
0x11d5   :  { %v1267_v15 = vpop.eup %1266 }
0x11d6   :  { %917 = vrot.lane.b32.xlu2 %v1267_v15, %s1278_s1 }
0x11ee   :  { %v973_v19 = vpop.permute.xlu0 %972 }
0x11ef   :  { %v975_v24 = vmul.f32 %v973_v19, %v956_v38 }
0x11f1   :  { %v976_v16 = vpack.c.bf16 %v975_v24, %v975_v24 }
0x11f3   :  { %v979_v31 = vunpack.c.l.b16 %v976_v16 }
0x11f5   :  { %v980_v34 = vpack.c.b16 %v979_v31, %v979_v31 }
0x11f7   :  { %981 = vrot.lane.b32.xlu1 %v980_v34, %s1279_s24 }
0x1230   :  { %v918_v12 = vpop.permute.xlu2 %917 }
0x1231   :  { %v920_v20 = vmul.f32 %v918_v12, %v901_v5 }
0x1233   :  { %v977_v25 = vpack.c.bf16 %v920_v20, %v920_v20 }
0x1235   :  { %v984_v26 = vunpack.c.l.b16 %v977_v25 }
0x1237   :  { %v985_v35 = vpack.c.b16 %v984_v26, %v984_v26 }
0x1239   :  { %986 = vrot.lane.b32.xlu2 %v985_v35, %s1278_s1 }
0x1269   :  { %v982_v17 = vpop.permute.xlu1 %981 }
0x1293   :  { %v987_v32 = vpop.permute.xlu2 %986 }
0x1294   :  { %v990_v21 = vsel %vm37_vm4, %v982_v17, %v987_v32 }
0x1295   :  { %1133 = vmatmul.msk.bf16.vlgmr.msrb.gmra.mxu3 %vm136_vm5, %v990_v21 }
0x1318   :  { %v1002_v33 = vpop.f32.mrf.mxu3 }
0x1319   :  { %v1003_v36 = vadd.f32 %v1551_v44, %v1002_v33 }
0x131b   :  { %1268 = vtanh.f32 %v1003_v36  ;;  %v1134_v40 = vmul.f32 -1.442695, %v1003_v36 }
0x131d   :  { %1270 = vpow2.f32 %v1134_v40 }
0x1320   :  { %v1004_v37 = vpop.f32.mrf.mxu3 }
0x1321   :  { %v1269_v39 = vpop.eup %1268 }
0x1322   :  { %1028 = vrot.lane.b32.xlu0 %v1269_v39, %s1278_s1 }
0x1323   :  { %v1271_v41 = vpop.eup %1270 }
0x1324   :  { %v1009_v18 = vadd.f32 1.0, %v1271_v41 }
0x1326   :  { %1272 = vrcp.f32 %v1009_v18  ;;  %v1021_v0 = vand.u32 2147483648, %v1009_v18  ;;  %vm1015_vm6 = vweird.f32 %v1009_v18  ;;  %v1019_v44 = vand.u32 2147483647, %v1009_v18 }
0x1328   :  { %v1022_v1 = vor.u32 1.1754944e-38, %v1021_v0  ;;  %vm1020_vm8 = vcmp.eq.f32.partialorder %v1019_v44, 8.507059e+37 }
0x132a   :  { %1044 = vrot.lane.b32.xlu0 %v975_v24, %s1279_s24 }
0x132c   :  { %v1273_v22 = vpop.eup %1272 }
0x132d   :  { %v1011_v42 = vmul.f32 %v1273_v22, %v1009_v18  ;;  %vm1016_vm5 = vweird.f32 %v1273_v22 }
0x132e   :  { %vm1017_vm7 = vmor %vm1015_vm6, %vm1016_vm5 }
0x132f   :  { %v1012_v23 = vsub.f32 1.0, %v1011_v42 }
0x1331   :  { %v1013_v43 = vmul.f32 %v1273_v22, %v1012_v23 }
0x1333   :  { %v1014_v45 = vadd.f32 %v1273_v22, %v1013_v43 }
0x1335   :  { %v1018_v46 = vsel %vm1017_vm7, %v1273_v22, %v1014_v45 }
0x1336   :  { %v1023_v48 = vsel %vm1020_vm8, %v1022_v1, %v1018_v46 }
0x1337   :  { %v1026_v28 = vmul.f32 %v1023_v48, %v914_v14 }
0x1394   :  { %v1029_v47 = vpop.permute.xlu0 %1028 }
0x1395   :  { %v1031_v49 = vmul.f32 %v1029_v47, %v1023_v48 }
0x1397   :  { %1033 = vrot.lane.b32.xlu1 %v1031_v49, %s1279_s24 }
0x139c   :  { %v1045_v27 = vpop.permute.xlu0 %1044 }
0x139d   :  { %1047 = vst.msk [vmem:[%s1591_s4] sm:$0xff] %vm37_vm4, %v1045_v27 }
0x139f   :  { %1049 = vrot.lane.b32.xlu1 %v969_v9, %s1280_s26 }
0x1409   :  { %v1034_v50 = vpop.permute.xlu1 %1033 }
0x140a   :  { %v1036_v29 = vadd.f32 %v1034_v50, %v1026_v28 }
0x140c   :  { %1274 = vtanh.f32 %v1036_v29  ;;  %1060 = vrot.lane.b32.xlu0 %v1036_v29, %s1280_s26 }
0x1411   :  { %v1050_v30 = vpop.permute.xlu1 %1049 }
0x1412   :  { %v1275_v51 = vpop.eup %1274  ;;  %1052 = vst.msk [vmem:[%s1592_s5] sm:$0xff] %vm37_vm4, %v1050_v30 }
0x1413   :  { %1039 = vrot.lane.b32.xlu2 %v1275_v51, %s1278_s1 }
0x146d   :  { %v1040_v52 = vpop.permute.xlu2 %1039 }
0x146e   :  { %v1042_v38 = vmul.f32 %v1040_v52, %v1023_v48 }
0x1470   :  { %1054 = vrot.lane.b32.xlu2 %v1042_v38, %s1279_s24 }
0x147e   :  { %v1061_v53 = vpop.permute.xlu0 %1060 }
0x147f   :  { %1136 = vst.msk [vmem:[%s1592_s5 + $0x8] sm:$0xff] %vm37_vm4, %v1061_v53 }
0x14ca   :  { %v1055_v54 = vpop.permute.xlu2 %1054 }
0x14cb   :  { %1135 = vst.msk [vmem:[%s1591_s4 + $0x8] sm:$0xff] %vm37_vm4, %v1055_v54 }

</bundles_post_ra>
